<compile_context>
chip_gen: v6e
topology: v6e:2x2x1
jax: 0.10.0
libtpu: 0.0.40
codegen_flags: <defaults>
</compile_context>

<pallas_src>
import functools

import jax
import jax.numpy as jnp
from jax.experimental import pallas as pl
from jax.experimental.pallas import tpu as pltpu


_VMEM_LIMIT = 64 * 1024 * 1024  # <= v7x physical VMEM; raises v5e/v6e default.


# ----------------------------------------------------------------------------
# Row tiling helpers
# ----------------------------------------------------------------------------

def _row_tiling(m):
    """Returns (row_tile, padded_rows).

    Rows are padded to a multiple of 16 (clean bf16 sublane packing).  The
    tile is capped at 256 rows (amortizes per-grid-step overhead on v6e) and,
    when there are enough rows, chosen so the grid has >= 2 row steps so both
    v7x TensorCores can be used via the 'parallel' dimension semantics.
    """
    m16 = ((m + 15) // 16) * 16
    if m16 >= 512:
        tm = 256
    elif m16 >= 32:
        tm = m16 // 2
        if tm % 16:
            tm = ((tm // 16) + 1) * 16
    else:
        tm = m16
    mp = ((m + tm - 1) // tm) * tm
    return tm, mp


def _pad_rows(a, mp, axis):
    m = a.shape[axis]
    if mp == m:
        return a
    pads = [(0, 0)] * a.ndim
    pads[axis] = (0, mp - m)
    return jnp.pad(a, pads)


def _const_weight_spec(shape, index_map):
    """Single-buffered BlockSpec for blocks with a constant index_map."""
    try:
        return pl.BlockSpec(shape, index_map, pipeline_mode=pl.Buffered(1))
    except Exception:  # older jax without pipeline_mode / Buffered(1)
        return pl.BlockSpec(shape, index_map)


# ----------------------------------------------------------------------------
# Pallas kernels
# ----------------------------------------------------------------------------

def _lm_topk_kernel(x_ref, w_ref, vals_ref, idx_ref, *, k):
    """Fused: logits = x @ W -> softmax -> per-row top-k (values, indices).

    x_ref: (1, tm, H) bf16   w_ref: (1, H, V) bf16
    vals_ref: (1, tm, k) f32  (softmax probabilities of the kept entries)
    idx_ref:  (1, tm, k) i32  (vocab indices of the kept entries)
    """
    logits = jnp.dot(x_ref[0], w_ref[0],
                     preferred_element_type=jnp.float32)          # (tm, V) f32
    v = logits.shape[-1]
    lane = jax.lax.broadcasted_iota(jnp.int32, logits.shape, 1)

    # k sequential argmax passes on the raw logits (softmax is monotone).
    # Each pass knocks out exactly one element per row (lowest index on ties),
    # so exactly k entries are kept, matching torch.topk.  Pass 0's row max is
    # reused as the softmax max.
    # TODO(synk): for production V, stream V in 128-lane chunks with a
    # (tm, 128) running top-k buffer so these passes touch 128 lanes, not V.
    work = logits
    m = None
    for j in range(k):
        thr = jnp.max(work, axis=-1, keepdims=True)               # (tm, 1)
        if j == 0:
            m = thr                                               # global max
        sel = jnp.min(jnp.where(work == thr, lane, v),
                      axis=-1, keepdims=True)                     # (tm, 1) i32
        vals_ref[0, :, j:j + 1] = thr                             # raw logit
        idx_ref[0, :, j:j + 1] = sel
        work = jnp.where(lane == sel, -jnp.inf, work)

    # Exact softmax denominator over the full vocab; reciprocal -> EUP slot.
    denom = jnp.sum(jnp.exp(logits - m), axis=-1, keepdims=True)
    inv = pl.reciprocal(denom, approx=True)
    # Finalize: convert the stored raw top-k logits into probabilities.
    vals_ref[0] = jnp.exp(vals_ref[0] - m) * inv


def _encoder_fused_kernel(emb_ref, lm_ref, wh_ref, o_ref):
    """o = relu((emb + lm_contrib) @ W_h), f32 accumulation."""
    e = emb_ref[...].astype(jnp.float32) + lm_ref[...]
    h = jnp.dot(e.astype(jnp.bfloat16), wh_ref[...],
                preferred_element_type=jnp.float32)
    o_ref[...] = jnp.maximum(h, 0.0)


def _decoder_fused_kernel(emb_ref, lm_ref, ctx_ref, wh_ref, wout_ref, o_ref):
    """logits = relu((emb + lm_contrib + ctx) @ W_h) @ W_out."""
    d = emb_ref[...].astype(jnp.float32) + lm_ref[...] + ctx_ref[...]
    h = jnp.maximum(
        jnp.dot(d.astype(jnp.bfloat16), wh_ref[...],
                preferred_element_type=jnp.float32), 0.0)
    o_ref[...] = jnp.dot(h.astype(jnp.bfloat16), wout_ref[...],
                         preferred_element_type=jnp.float32)


# ----------------------------------------------------------------------------
# Pallas wrappers
# ----------------------------------------------------------------------------

def pallas_fused_lm(x2, w2, *, k):
    """x2: (2, M, H) bf16, w2: (2, H, V) bf16 -> ((2, M, k) f32, (2, M, k) i32).

    One launch covers both the src-LM and tgt-LM branches (leading grid axis
    of size 2 selects the per-branch projection weight).  Only the top-k
    probabilities + indices are written back (no dense (M, V) intermediate).
    """
    L, M, H = x2.shape
    V = w2.shape[-1]
    tm, Mp = _row_tiling(M)
    x2 = _pad_rows(x2, Mp, axis=1)
    vals, idxs = pl.pallas_call(
        functools.partial(_lm_topk_kernel, k=k),
        out_shape=(jax.ShapeDtypeStruct((L, Mp, k), jnp.float32),
                   jax.ShapeDtypeStruct((L, Mp, k), jnp.int32)),
        grid=(L, Mp // tm),
        in_specs=[
            pl.BlockSpec((1, tm, H), lambda l, i: (l, i, 0)),
            # weight changes along the (outer) branch axis, so keep default
            # buffering here; at production V this block must be V-tiled.
            pl.BlockSpec((1, H, V), lambda l, i: (l, 0, 0)),
        ],
        out_specs=(pl.BlockSpec((1, tm, k), lambda l, i: (l, i, 0)),
                   pl.BlockSpec((1, tm, k), lambda l, i: (l, i, 0))),
        compiler_params=pltpu.CompilerParams(
            dimension_semantics=("parallel", "parallel"),
            vmem_limit_bytes=_VMEM_LIMIT),
    )(x2, w2)
    # Padded rows produce valid-but-meaningless top-k entries; slice them off.
    return vals[:, :M], idxs[:, :M]


def pallas_fused_encoder(emb, lm_contrib, w_h):
    """emb: (M, H) bf16, lm_contrib: (M, H) f32 -> (M, H) f32 (ReLU'd)."""
    M, H = emb.shape
    tm, Mp = _row_tiling(M)
    emb = _pad_rows(emb, Mp, axis=0)
    lm_contrib = _pad_rows(lm_contrib, Mp, axis=0)
    out = pl.pallas_call(
        _encoder_fused_kernel,
        out_shape=jax.ShapeDtypeStruct((Mp, H), jnp.float32),
        grid=(Mp // tm,),
        in_specs=[
            pl.BlockSpec((tm, H), lambda i: (i, 0)),
            pl.BlockSpec((tm, H), lambda i: (i, 0)),
            _const_weight_spec((H, H), lambda i: (0, 0)),
        ],
        out_specs=pl.BlockSpec((tm, H), lambda i: (i, 0)),
        compiler_params=pltpu.CompilerParams(
            dimension_semantics=("parallel",),
            vmem_limit_bytes=_VMEM_LIMIT),
    )(emb, lm_contrib, w_h)
    return out[:M]


def pallas_fused_decoder(emb, lm_contrib, ctx_b, w_h, w_out):
    """emb: (M, H) bf16, lm_contrib/ctx_b: (M, H) f32 -> (M, V) f32 logits."""
    M, H = emb.shape
    V = w_out.shape[-1]
    tm, Mp = _row_tiling(M)
    emb = _pad_rows(emb, Mp, axis=0)
    lm_contrib = _pad_rows(lm_contrib, Mp, axis=0)
    ctx_b = _pad_rows(ctx_b, Mp, axis=0)
    out = pl.pallas_call(
        _decoder_fused_kernel,
        out_shape=jax.ShapeDtypeStruct((Mp, V), jnp.float32),
        grid=(Mp // tm,),
        in_specs=[
            pl.BlockSpec((tm, H), lambda i: (i, 0)),
            pl.BlockSpec((tm, H), lambda i: (i, 0)),
            pl.BlockSpec((tm, H), lambda i: (i, 0)),
            _const_weight_spec((H, H), lambda i: (0, 0)),
            _const_weight_spec((H, V), lambda i: (0, 0)),
        ],
        out_specs=pl.BlockSpec((tm, V), lambda i: (i, 0)),
        compiler_params=pltpu.CompilerParams(
            dimension_semantics=("parallel",),
            vmem_limit_bytes=_VMEM_LIMIT),
    )(emb, lm_contrib, ctx_b, w_h, w_out)
    return out[:M]


# ----------------------------------------------------------------------------
# Top-k "sparse @ W" as a k-row gather/accumulate (no dense (M, V) matrix)
# ----------------------------------------------------------------------------

def _topk_matmul(vals, idxs, w):
    """scatter(topk) @ w  ==  sum_j vals[:, j] * w[idxs[:, j], :].

    vals: (M, k) f32, idxs: (M, k) i32, w: (V, H) bf16 -> (M, H) f32.
    """
    rows = jnp.take(w, idxs, axis=0).astype(jnp.float32)        # (M, k, H)
    return jnp.einsum("mk,mkh->mh", vals, rows)


# ----------------------------------------------------------------------------
# Synthetic parameters for the sub-modules (deterministic init, bf16 storage)
# ----------------------------------------------------------------------------

def init_params(key, V, H):
    ks = jax.random.split(key, 11)
    s = 0.05
    n = lambda k, shp: (s * jax.random.normal(k, shp, jnp.float32)).astype(
        jnp.bfloat16)
    return {
        "src_lm_emb":  n(ks[0], (V, H)),
        "tgt_lm_emb":  n(ks[2], (V, H)),
        # src/tgt vocab projections stacked so both LM branches run in one call
        "lm_proj":     jnp.stack([n(ks[1], (H, V)), n(ks[3], (H, V))], axis=0),
        "enc_emb":     n(ks[4], (V, H)),
        "enc_lm_proj": n(ks[5], (V, H)),
        "enc_w":       n(ks[6], (H, H)),
        "dec_emb":     n(ks[7], (V, H)),
        "dec_lm_proj": n(ks[8], (V, H)),
        "dec_w":       n(ks[9], (H, H)),
        "dec_out":     n(ks[10], (H, V)),
    }


# ----------------------------------------------------------------------------
# FairseqAugment.forward
# ----------------------------------------------------------------------------

def fairseq_augment_forward(params, src_tokens_lm, prev_output_tokens_lm,
                            src_tokens, src_lengths, prev_output_tokens, k=20):
    B, T = src_tokens_lm.shape
    M = B * T
    V, H = params["enc_emb"].shape

    # ---- src/tgt LM (one fused launch): logits -> softmax -> top-k ----------
    x_src = jnp.take(params["src_lm_emb"], src_tokens_lm.reshape(M), axis=0)
    x_tgt = jnp.take(params["tgt_lm_emb"],
                     prev_output_tokens_lm.reshape(M), axis=0)
    x2 = jnp.stack([x_src, x_tgt], axis=0)                      # (2, M, H) bf16
    vals, idxs = pallas_fused_lm(x2, params["lm_proj"], k=k)    # (2, M, k)

    # sparse @ W_lm as a k-row gather/accumulate (dense (M,V) never built).
    src_lm_contrib = _topk_matmul(vals[0], idxs[0], params["enc_lm_proj"])
    tgt_lm_contrib = _topk_matmul(vals[1], idxs[1], params["dec_lm_proj"])

    # ---- encoder(src_tokens, src_lm_out, src_lengths), fused -----------------
    e_emb = jnp.take(params["enc_emb"], src_tokens.reshape(M), axis=0)
    enc_out = pallas_fused_encoder(e_emb, src_lm_contrib, params["enc_w"])
    enc_bth = enc_out.reshape(B, T, H)
    mask = (jnp.arange(T)[None, :] < src_lengths[:, None]).astype(jnp.float32)
    denom = jnp.maximum(src_lengths[:, None].astype(jnp.float32), 1.0)
    ctx = (enc_bth * mask[..., None]).sum(axis=1) / denom                # (B,H)
    ctx_b = jnp.broadcast_to(ctx[:, None, :], (B, T, H)).reshape(M, H)

    # ---- decoder(prev_output_tokens, tgt_lm_out, encoder_out), fused ---------
    d_emb = jnp.take(params["dec_emb"], prev_output_tokens.reshape(M), axis=0)
    logits = pallas_fused_decoder(d_emb, tgt_lm_contrib, ctx_b,
                                  params["dec_w"], params["dec_out"])    # (M,V)
    return logits.reshape(B, T, V)


# ----------------------------------------------------------------------------
# Pure-JAX reference (f32 everywhere) for correctness checking
# ----------------------------------------------------------------------------

def reference_forward(params, src_tokens_lm, prev_output_tokens_lm,
                      src_tokens, src_lengths, prev_output_tokens, k=20):
    f32 = jnp.float32
    B, T = src_tokens_lm.shape
    M = B * T
    V, H = params["enc_emb"].shape

    def lm_sparse(emb_tbl, proj, toks):
        x = jnp.take(emb_tbl, toks.reshape(M), axis=0).astype(f32)
        p = jax.nn.softmax(x @ proj.astype(f32), axis=-1)
        v, i = jax.lax.top_k(p, k)
        return jnp.zeros((M, V), f32).at[jnp.arange(M)[:, None], i].set(v)

    src_sp = lm_sparse(params["src_lm_emb"], params["lm_proj"][0],
                       src_tokens_lm)
    tgt_sp = lm_sparse(params["tgt_lm_emb"], params["lm_proj"][1],
                       prev_output_tokens_lm)

    e = (jnp.take(params["enc_emb"], src_tokens.reshape(M), axis=0).astype(f32)
         + src_sp @ params["enc_lm_proj"].astype(f32))
    enc = jnp.maximum(e @ params["enc_w"].astype(f32), 0.0).reshape(B, T, H)
    mask = (jnp.arange(T)[None, :] < src_lengths[:, None]).astype(f32)
    ctx = (enc * mask[..., None]).sum(1) / jnp.maximum(
        src_lengths[:, None].astype(f32), 1.0)
    ctx_b = jnp.broadcast_to(ctx[:, None, :], (B, T, H)).reshape(M, H)

    d = (jnp.take(params["dec_emb"], prev_output_tokens.reshape(M),
                  axis=0).astype(f32)
         + tgt_sp @ params["dec_lm_proj"].astype(f32) + ctx_b)
    h = jnp.maximum(d @ params["dec_w"].astype(f32), 0.0)
    return (h @ params["dec_out"].astype(f32)).reshape(B, T, V)


# ----------------------------------------------------------------------------
# main
# ----------------------------------------------------------------------------

if __name__ == "__main__":
    B, T, V, H, K = 2, 8, 256, 128, 20

    key = jax.random.PRNGKey(0)
    kp, k1, k2, k3, k4 = jax.random.split(key, 5)
    params = init_params(kp, V, H)

    src_tokens_lm = jax.random.randint(k1, (B, T), 0, V, dtype=jnp.int32)
    prev_output_tokens_lm = jax.random.randint(k2, (B, T), 0, V, dtype=jnp.int32)
    src_tokens = jax.random.randint(k3, (B, T), 0, V, dtype=jnp.int32)
    prev_output_tokens = jax.random.randint(k4, (B, T), 0, V, dtype=jnp.int32)
    src_lengths = jnp.array([T, T - 2], dtype=jnp.int32)

    out = fairseq_augment_forward(params, src_tokens_lm, prev_output_tokens_lm,
                                  src_tokens, src_lengths, prev_output_tokens,
                                  K)
    jax.block_until_ready(out)
    assert out.shape == (B, T, V) and out.dtype == jnp.float32

    # ---- sanity checks on the fused LM top-k kernel -------------------------
    M = B * T
    x_src = jnp.take(params["src_lm_emb"], src_tokens_lm.reshape(M), axis=0)
    x_tgt = jnp.take(params["tgt_lm_emb"],
                     prev_output_tokens_lm.reshape(M), axis=0)
    vals, idxs = pallas_fused_lm(jnp.stack([x_src, x_tgt], 0),
                                 params["lm_proj"], k=K)
    jax.block_until_ready((vals, idxs))

    # exactly K distinct indices per row, all probabilities > 0 and summing <=1
    si = jnp.sort(idxs, axis=-1)
    assert bool(jnp.all(si[..., 1:] > si[..., :-1]))
    assert bool(jnp.all((idxs >= 0) & (idxs < V)))
    assert bool(jnp.all(vals > 0.0))
    assert float(jnp.max(jnp.sum(vals, axis=-1))) <= 1.0 + 1e-2
    # values are non-increasing (top-k order)
    assert bool(jnp.all(vals[..., 1:] <= vals[..., :-1] + 1e-6))

    # top-k values match a pure-JAX softmax + top_k reference
    logits_ref = jnp.einsum(
        "lmh,lhv->lmv",
        jnp.stack([x_src, x_tgt], 0).astype(jnp.float32),
        params["lm_proj"].astype(jnp.float32))
    ref_vals, _ = jax.lax.top_k(jax.nn.softmax(logits_ref, axis=-1), K)
    assert float(jnp.max(jnp.abs(vals - ref_vals))) < 2e-3

    # ---- full forward vs. all-f32 reference ----------------------------------
    ref_out = reference_forward(params, src_tokens_lm, prev_output_tokens_lm,
                                src_tokens, src_lengths, prev_output_tokens, K)
    assert float(jnp.max(jnp.abs(out - ref_out))) < 2e-2

    print("KERNEL_OK")
</pallas_src>

<mosaic_0001>
module attributes {stable_mosaic.version = 11 : i64} {
  func.func @_lm_topk_kernel(%arg0: i32, %arg1: i32, %arg2: memref<1x16x128xbf16, #tpu.memory_space<vmem>>, %arg3: memref<1x128x256xbf16, #tpu.memory_space<vmem>>, %arg4: memref<1x16x20xf32, #tpu.memory_space<vmem>>, %arg5: memref<1x16x20xi32, #tpu.memory_space<vmem>>) attributes {dimension_semantics = [#tpu.dimension_semantics<parallel>, #tpu.dimension_semantics<parallel>], iteration_bounds = array<i64: 2, 1>, scalar_prefetch = 0 : i64, scratch_operands = 0 : i64, tpu.core_type = #tpu.core_type<tc>, window_params = [{transform_indices = @transform_0, window_bounds = array<i64: 1, 16, 128>}, {transform_indices = @transform_1, window_bounds = array<i64: 1, 128, 256>}, {transform_indices = @transform_2, window_bounds = array<i64: 1, 16, 20>}, {transform_indices = @transform_3, window_bounds = array<i64: 1, 16, 20>}]} {
    %c0 = arith.constant 0 : index
    %c0_0 = arith.constant 0 : index
    %c0_1 = arith.constant 0 : index
    %0 = vector.load %arg2[%c0, %c0_0, %c0_1] : memref<1x16x128xbf16, #tpu.memory_space<vmem>>, vector<1x16x128xbf16>
    %1 = vector.shape_cast %0 : vector<1x16x128xbf16> to vector<16x128xbf16>
    %c0_2 = arith.constant 0 : index
    %c0_3 = arith.constant 0 : index
    %c0_4 = arith.constant 0 : index
    %2 = vector.load %arg3[%c0_2, %c0_3, %c0_4] : memref<1x128x256xbf16, #tpu.memory_space<vmem>>, vector<1x128x256xbf16>
    %3 = vector.shape_cast %2 : vector<1x128x256xbf16> to vector<128x256xbf16>
    %cst = arith.constant dense<0.000000e+00> : vector<16x256xf32>
    %4 = tpu.matmul %1, %3, %cst {dimension_numbers = #tpu.dot_dimension_numbers<[1], [0], [0], [1], [0, 0, 1, 1], [], []>} : vector<16x128xbf16>, vector<128x256xbf16>, vector<16x256xf32> -> vector<16x256xf32>
    %5 = tpu.iota {dimensions = array<i32: 1>} : vector<16x256xi32>
    %cst_5 = arith.constant dense<0xFF800000> : vector<16xf32>
    %6 = vector.multi_reduction <maximumf>, %4, %cst_5 [1] : vector<16x256xf32> to vector<16xf32>
    %7 = vector.shape_cast %6 : vector<16xf32> to vector<16x1xf32>
    %8 = vector.broadcast %7 : vector<16x1xf32> to vector<16x256xf32>
    %9 = arith.cmpf oeq, %4, %8 : vector<16x256xf32>
    %c256_i32 = arith.constant 256 : i32
    %10 = vector.broadcast %c256_i32 : i32 to vector<16x256xi32>
    %11 = arith.select %9, %5, %10 : vector<16x256xi1>, vector<16x256xi32>
    %cst_6 = arith.constant dense<2147483647> : vector<16xi32>
    %12 = vector.multi_reduction <minsi>, %11, %cst_6 [1] : vector<16x256xi32> to vector<16xi32>
    %13 = vector.shape_cast %12 : vector<16xi32> to vector<16x1xi32>
    %c0_7 = arith.constant 0 : index
    %c0_8 = arith.constant 0 : index
    %c0_9 = arith.constant 0 : index
    %14 = vector.load %arg4[%c0_7, %c0_8, %c0_9] : memref<1x16x20xf32, #tpu.memory_space<vmem>>, vector<1x16x1xf32>
    %15 = vector.shape_cast %14 : vector<1x16x1xf32> to vector<16x1xf32>
    %16 = vector.shape_cast %7 : vector<16x1xf32> to vector<1x16x1xf32>
    tpu.vector_store %arg4[%c0_7, %c0_8, %c0_9], %16 {strides = array<i32>} : memref<1x16x20xf32, #tpu.memory_space<vmem>>, vector<1x16x1xf32>,
    %c0_10 = arith.constant 0 : index
    %c0_11 = arith.constant 0 : index
    %c0_12 = arith.constant 0 : index
    %17 = vector.load %arg5[%c0_10, %c0_11, %c0_12] : memref<1x16x20xi32, #tpu.memory_space<vmem>>, vector<1x16x1xi32>
    %18 = vector.shape_cast %17 : vector<1x16x1xi32> to vector<16x1xi32>
    %19 = vector.shape_cast %13 : vector<16x1xi32> to vector<1x16x1xi32>
    tpu.vector_store %arg5[%c0_10, %c0_11, %c0_12], %19 {strides = array<i32>} : memref<1x16x20xi32, #tpu.memory_space<vmem>>, vector<1x16x1xi32>,
    %20 = vector.broadcast %13 : vector<16x1xi32> to vector<16x256xi32>
    %21 = arith.cmpi eq, %5, %20 : vector<16x256xi32>
    %cst_13 = arith.constant 0xFF800000 : f32
    %22 = vector.broadcast %cst_13 : f32 to vector<16x256xf32>
    %23 = arith.select %21, %22, %4 : vector<16x256xi1>, vector<16x256xf32>
    %cst_14 = arith.constant dense<0xFF800000> : vector<16xf32>
    %24 = vector.multi_reduction <maximumf>, %23, %cst_14 [1] : vector<16x256xf32> to vector<16xf32>
    %25 = vector.shape_cast %24 : vector<16xf32> to vector<16x1xf32>
    %26 = vector.broadcast %25 : vector<16x1xf32> to vector<16x256xf32>
    %27 = arith.cmpf oeq, %23, %26 : vector<16x256xf32>
    %c256_i32_15 = arith.constant 256 : i32
    %28 = vector.broadcast %c256_i32_15 : i32 to vector<16x256xi32>
    %29 = arith.select %27, %5, %28 : vector<16x256xi1>, vector<16x256xi32>
    %cst_16 = arith.constant dense<2147483647> : vector<16xi32>
    %30 = vector.multi_reduction <minsi>, %29, %cst_16 [1] : vector<16x256xi32> to vector<16xi32>
    %31 = vector.shape_cast %30 : vector<16xi32> to vector<16x1xi32>
    %c0_17 = arith.constant 0 : index
    %c0_18 = arith.constant 0 : index
    %c1 = arith.constant 1 : index
    %32 = vector.load %arg4[%c0_17, %c0_18, %c1] : memref<1x16x20xf32, #tpu.memory_space<vmem>>, vector<1x16x1xf32>
    %33 = vector.shape_cast %32 : vector<1x16x1xf32> to vector<16x1xf32>
    %34 = vector.shape_cast %25 : vector<16x1xf32> to vector<1x16x1xf32>
    tpu.vector_store %arg4[%c0_17, %c0_18, %c1], %34 {strides = array<i32>} : memref<1x16x20xf32, #tpu.memory_space<vmem>>, vector<1x16x1xf32>,
    %c0_19 = arith.constant 0 : index
    %c0_20 = arith.constant 0 : index
    %c1_21 = arith.constant 1 : index
    %35 = vector.load %arg5[%c0_19, %c0_20, %c1_21] : memref<1x16x20xi32, #tpu.memory_space<vmem>>, vector<1x16x1xi32>
    %36 = vector.shape_cast %35 : vector<1x16x1xi32> to vector<16x1xi32>
    %37 = vector.shape_cast %31 : vector<16x1xi32> to vector<1x16x1xi32>
    tpu.vector_store %arg5[%c0_19, %c0_20, %c1_21], %37 {strides = array<i32>} : memref<1x16x20xi32, #tpu.memory_space<vmem>>, vector<1x16x1xi32>,
    %38 = vector.broadcast %31 : vector<16x1xi32> to vector<16x256xi32>
    %39 = arith.cmpi eq, %5, %38 : vector<16x256xi32>
    %cst_22 = arith.constant 0xFF800000 : f32
    %40 = vector.broadcast %cst_22 : f32 to vector<16x256xf32>
    %41 = arith.select %39, %40, %23 : vector<16x256xi1>, vector<16x256xf32>
    %cst_23 = arith.constant dense<0xFF800000> : vector<16xf32>
    %42 = vector.multi_reduction <maximumf>, %41, %cst_23 [1] : vector<16x256xf32> to vector<16xf32>
    %43 = vector.shape_cast %42 : vector<16xf32> to vector<16x1xf32>
    %44 = vector.broadcast %43 : vector<16x1xf32> to vector<16x256xf32>
    %45 = arith.cmpf oeq, %41, %44 : vector<16x256xf32>
    %c256_i32_24 = arith.constant 256 : i32
    %46 = vector.broadcast %c256_i32_24 : i32 to vector<16x256xi32>
    %47 = arith.select %45, %5, %46 : vector<16x256xi1>, vector<16x256xi32>
    %cst_25 = arith.constant dense<2147483647> : vector<16xi32>
    %48 = vector.multi_reduction <minsi>, %47, %cst_25 [1] : vector<16x256xi32> to vector<16xi32>
    %49 = vector.shape_cast %48 : vector<16xi32> to vector<16x1xi32>
    %c0_26 = arith.constant 0 : index
    %c0_27 = arith.constant 0 : index
    %c2 = arith.constant 2 : index
    %50 = vector.load %arg4[%c0_26, %c0_27, %c2] : memref<1x16x20xf32, #tpu.memory_space<vmem>>, vector<1x16x1xf32>
    %51 = vector.shape_cast %50 : vector<1x16x1xf32> to vector<16x1xf32>
    %52 = vector.shape_cast %43 : vector<16x1xf32> to vector<1x16x1xf32>
    tpu.vector_store %arg4[%c0_26, %c0_27, %c2], %52 {strides = array<i32>} : memref<1x16x20xf32, #tpu.memory_space<vmem>>, vector<1x16x1xf32>,
    %c0_28 = arith.constant 0 : index
    %c0_29 = arith.constant 0 : index
    %c2_30 = arith.constant 2 : index
    %53 = vector.load %arg5[%c0_28, %c0_29, %c2_30] : memref<1x16x20xi32, #tpu.memory_space<vmem>>, vector<1x16x1xi32>
    %54 = vector.shape_cast %53 : vector<1x16x1xi32> to vector<16x1xi32>
    %55 = vector.shape_cast %49 : vector<16x1xi32> to vector<1x16x1xi32>
    tpu.vector_store %arg5[%c0_28, %c0_29, %c2_30], %55 {strides = array<i32>} : memref<1x16x20xi32, #tpu.memory_space<vmem>>, vector<1x16x1xi32>,
    %56 = vector.broadcast %49 : vector<16x1xi32> to vector<16x256xi32>
    %57 = arith.cmpi eq, %5, %56 : vector<16x256xi32>
    %cst_31 = arith.constant 0xFF800000 : f32
    %58 = vector.broadcast %cst_31 : f32 to vector<16x256xf32>
    %59 = arith.select %57, %58, %41 : vector<16x256xi1>, vector<16x256xf32>
    %cst_32 = arith.constant dense<0xFF800000> : vector<16xf32>
    %60 = vector.multi_reduction <maximumf>, %59, %cst_32 [1] : vector<16x256xf32> to vector<16xf32>
    %61 = vector.shape_cast %60 : vector<16xf32> to vector<16x1xf32>
    %62 = vector.broadcast %61 : vector<16x1xf32> to vector<16x256xf32>
    %63 = arith.cmpf oeq, %59, %62 : vector<16x256xf32>
    %c256_i32_33 = arith.constant 256 : i32
    %64 = vector.broadcast %c256_i32_33 : i32 to vector<16x256xi32>
    %65 = arith.select %63, %5, %64 : vector<16x256xi1>, vector<16x256xi32>
    %cst_34 = arith.constant dense<2147483647> : vector<16xi32>
    %66 = vector.multi_reduction <minsi>, %65, %cst_34 [1] : vector<16x256xi32> to vector<16xi32>
    %67 = vector.shape_cast %66 : vector<16xi32> to vector<16x1xi32>
    %c0_35 = arith.constant 0 : index
    %c0_36 = arith.constant 0 : index
    %c3 = arith.constant 3 : index
    %68 = vector.load %arg4[%c0_35, %c0_36, %c3] : memref<1x16x20xf32, #tpu.memory_space<vmem>>, vector<1x16x1xf32>
    %69 = vector.shape_cast %68 : vector<1x16x1xf32> to vector<16x1xf32>
    %70 = vector.shape_cast %61 : vector<16x1xf32> to vector<1x16x1xf32>
    tpu.vector_store %arg4[%c0_35, %c0_36, %c3], %70 {strides = array<i32>} : memref<1x16x20xf32, #tpu.memory_space<vmem>>, vector<1x16x1xf32>,
    %c0_37 = arith.constant 0 : index
    %c0_38 = arith.constant 0 : index
    %c3_39 = arith.constant 3 : index
    %71 = vector.load %arg5[%c0_37, %c0_38, %c3_39] : memref<1x16x20xi32, #tpu.memory_space<vmem>>, vector<1x16x1xi32>
    %72 = vector.shape_cast %71 : vector<1x16x1xi32> to vector<16x1xi32>
    %73 = vector.shape_cast %67 : vector<16x1xi32> to vector<1x16x1xi32>
    tpu.vector_store %arg5[%c0_37, %c0_38, %c3_39], %73 {strides = array<i32>} : memref<1x16x20xi32, #tpu.memory_space<vmem>>, vector<1x16x1xi32>,
    %74 = vector.broadcast %67 : vector<16x1xi32> to vector<16x256xi32>
    %75 = arith.cmpi eq, %5, %74 : vector<16x256xi32>
    %cst_40 = arith.constant 0xFF800000 : f32
    %76 = vector.broadcast %cst_40 : f32 to vector<16x256xf32>
    %77 = arith.select %75, %76, %59 : vector<16x256xi1>, vector<16x256xf32>
    %cst_41 = arith.constant dense<0xFF800000> : vector<16xf32>
    %78 = vector.multi_reduction <maximumf>, %77, %cst_41 [1] : vector<16x256xf32> to vector<16xf32>
    %79 = vector.shape_cast %78 : vector<16xf32> to vector<16x1xf32>
    %80 = vector.broadcast %79 : vector<16x1xf32> to vector<16x256xf32>
    %81 = arith.cmpf oeq, %77, %80 : vector<16x256xf32>
    %c256_i32_42 = arith.constant 256 : i32
    %82 = vector.broadcast %c256_i32_42 : i32 to vector<16x256xi32>
    %83 = arith.select %81, %5, %82 : vector<16x256xi1>, vector<16x256xi32>
    %cst_43 = arith.constant dense<2147483647> : vector<16xi32>
    %84 = vector.multi_reduction <minsi>, %83, %cst_43 [1] : vector<16x256xi32> to vector<16xi32>
    %85 = vector.shape_cast %84 : vector<16xi32> to vector<16x1xi32>
    %c0_44 = arith.constant 0 : index
    %c0_45 = arith.constant 0 : index
    %c4 = arith.constant 4 : index
    %86 = vector.load %arg4[%c0_44, %c0_45, %c4] : memref<1x16x20xf32, #tpu.memory_space<vmem>>, vector<1x16x1xf32>
    %87 = vector.shape_cast %86 : vector<1x16x1xf32> to vector<16x1xf32>
    %88 = vector.shape_cast %79 : vector<16x1xf32> to vector<1x16x1xf32>
    tpu.vector_store %arg4[%c0_44, %c0_45, %c4], %88 {strides = array<i32>} : memref<1x16x20xf32, #tpu.memory_space<vmem>>, vector<1x16x1xf32>,
    %c0_46 = arith.constant 0 : index
    %c0_47 = arith.constant 0 : index
    %c4_48 = arith.constant 4 : index
    %89 = vector.load %arg5[%c0_46, %c0_47, %c4_48] : memref<1x16x20xi32, #tpu.memory_space<vmem>>, vector<1x16x1xi32>
    %90 = vector.shape_cast %89 : vector<1x16x1xi32> to vector<16x1xi32>
    %91 = vector.shape_cast %85 : vector<16x1xi32> to vector<1x16x1xi32>
    tpu.vector_store %arg5[%c0_46, %c0_47, %c4_48], %91 {strides = array<i32>} : memref<1x16x20xi32, #tpu.memory_space<vmem>>, vector<1x16x1xi32>,
    %92 = vector.broadcast %85 : vector<16x1xi32> to vector<16x256xi32>
    %93 = arith.cmpi eq, %5, %92 : vector<16x256xi32>
    %cst_49 = arith.constant 0xFF800000 : f32
    %94 = vector.broadcast %cst_49 : f32 to vector<16x256xf32>
    %95 = arith.select %93, %94, %77 : vector<16x256xi1>, vector<16x256xf32>
    %cst_50 = arith.constant dense<0xFF800000> : vector<16xf32>
    %96 = vector.multi_reduction <maximumf>, %95, %cst_50 [1] : vector<16x256xf32> to vector<16xf32>
    %97 = vector.shape_cast %96 : vector<16xf32> to vector<16x1xf32>
    %98 = vector.broadcast %97 : vector<16x1xf32> to vector<16x256xf32>
    %99 = arith.cmpf oeq, %95, %98 : vector<16x256xf32>
    %c256_i32_51 = arith.constant 256 : i32
    %100 = vector.broadcast %c256_i32_51 : i32 to vector<16x256xi32>
    %101 = arith.select %99, %5, %100 : vector<16x256xi1>, vector<16x256xi32>
    %cst_52 = arith.constant dense<2147483647> : vector<16xi32>
    %102 = vector.multi_reduction <minsi>, %101, %cst_52 [1] : vector<16x256xi32> to vector<16xi32>
    %103 = vector.shape_cast %102 : vector<16xi32> to vector<16x1xi32>
    %c0_53 = arith.constant 0 : index
    %c0_54 = arith.constant 0 : index
    %c5 = arith.constant 5 : index
    %104 = vector.load %arg4[%c0_53, %c0_54, %c5] : memref<1x16x20xf32, #tpu.memory_space<vmem>>, vector<1x16x1xf32>
    %105 = vector.shape_cast %104 : vector<1x16x1xf32> to vector<16x1xf32>
    %106 = vector.shape_cast %97 : vector<16x1xf32> to vector<1x16x1xf32>
    tpu.vector_store %arg4[%c0_53, %c0_54, %c5], %106 {strides = array<i32>} : memref<1x16x20xf32, #tpu.memory_space<vmem>>, vector<1x16x1xf32>,
    %c0_55 = arith.constant 0 : index
    %c0_56 = arith.constant 0 : index
    %c5_57 = arith.constant 5 : index
    %107 = vector.load %arg5[%c0_55, %c0_56, %c5_57] : memref<1x16x20xi32, #tpu.memory_space<vmem>>, vector<1x16x1xi32>
    %108 = vector.shape_cast %107 : vector<1x16x1xi32> to vector<16x1xi32>
    %109 = vector.shape_cast %103 : vector<16x1xi32> to vector<1x16x1xi32>
    tpu.vector_store %arg5[%c0_55, %c0_56, %c5_57], %109 {strides = array<i32>} : memref<1x16x20xi32, #tpu.memory_space<vmem>>, vector<1x16x1xi32>,
    %110 = vector.broadcast %103 : vector<16x1xi32> to vector<16x256xi32>
    %111 = arith.cmpi eq, %5, %110 : vector<16x256xi32>
    %cst_58 = arith.constant 0xFF800000 : f32
    %112 = vector.broadcast %cst_58 : f32 to vector<16x256xf32>
    %113 = arith.select %111, %112, %95 : vector<16x256xi1>, vector<16x256xf32>
    %cst_59 = arith.constant dense<0xFF800000> : vector<16xf32>
    %114 = vector.multi_reduction <maximumf>, %113, %cst_59 [1] : vector<16x256xf32> to vector<16xf32>
    %115 = vector.shape_cast %114 : vector<16xf32> to vector<16x1xf32>
    %116 = vector.broadcast %115 : vector<16x1xf32> to vector<16x256xf32>
    %117 = arith.cmpf oeq, %113, %116 : vector<16x256xf32>
    %c256_i32_60 = arith.constant 256 : i32
    %118 = vector.broadcast %c256_i32_60 : i32 to vector<16x256xi32>
    %119 = arith.select %117, %5, %118 : vector<16x256xi1>, vector<16x256xi32>
    %cst_61 = arith.constant dense<2147483647> : vector<16xi32>
    %120 = vector.multi_reduction <minsi>, %119, %cst_61 [1] : vector<16x256xi32> to vector<16xi32>
    %121 = vector.shape_cast %120 : vector<16xi32> to vector<16x1xi32>
    %c0_62 = arith.constant 0 : index
    %c0_63 = arith.constant 0 : index
    %c6 = arith.constant 6 : index
    %122 = vector.load %arg4[%c0_62, %c0_63, %c6] : memref<1x16x20xf32, #tpu.memory_space<vmem>>, vector<1x16x1xf32>
    %123 = vector.shape_cast %122 : vector<1x16x1xf32> to vector<16x1xf32>
    %124 = vector.shape_cast %115 : vector<16x1xf32> to vector<1x16x1xf32>
    tpu.vector_store %arg4[%c0_62, %c0_63, %c6], %124 {strides = array<i32>} : memref<1x16x20xf32, #tpu.memory_space<vmem>>, vector<1x16x1xf32>,
    %c0_64 = arith.constant 0 : index
    %c0_65 = arith.constant 0 : index
    %c6_66 = arith.constant 6 : index
    %125 = vector.load %arg5[%c0_64, %c0_65, %c6_66] : memref<1x16x20xi32, #tpu.memory_space<vmem>>, vector<1x16x1xi32>
    %126 = vector.shape_cast %125 : vector<1x16x1xi32> to vector<16x1xi32>
    %127 = vector.shape_cast %121 : vector<16x1xi32> to vector<1x16x1xi32>
    tpu.vector_store %arg5[%c0_64, %c0_65, %c6_66], %127 {strides = array<i32>} : memref<1x16x20xi32, #tpu.memory_space<vmem>>, vector<1x16x1xi32>,
    %128 = vector.broadcast %121 : vector<16x1xi32> to vector<16x256xi32>
    %129 = arith.cmpi eq, %5, %128 : vector<16x256xi32>
    %cst_67 = arith.constant 0xFF800000 : f32
    %130 = vector.broadcast %cst_67 : f32 to vector<16x256xf32>
    %131 = arith.select %129, %130, %113 : vector<16x256xi1>, vector<16x256xf32>
    %cst_68 = arith.constant dense<0xFF800000> : vector<16xf32>
    %132 = vector.multi_reduction <maximumf>, %131, %cst_68 [1] : vector<16x256xf32> to vector<16xf32>
    %133 = vector.shape_cast %132 : vector<16xf32> to vector<16x1xf32>
    %134 = vector.broadcast %133 : vector<16x1xf32> to vector<16x256xf32>
    %135 = arith.cmpf oeq, %131, %134 : vector<16x256xf32>
    %c256_i32_69 = arith.constant 256 : i32
    %136 = vector.broadcast %c256_i32_69 : i32 to vector<16x256xi32>
    %137 = arith.select %135, %5, %136 : vector<16x256xi1>, vector<16x256xi32>
    %cst_70 = arith.constant dense<2147483647> : vector<16xi32>
    %138 = vector.multi_reduction <minsi>, %137, %cst_70 [1] : vector<16x256xi32> to vector<16xi32>
    %139 = vector.shape_cast %138 : vector<16xi32> to vector<16x1xi32>
    %c0_71 = arith.constant 0 : index
    %c0_72 = arith.constant 0 : index
    %c7 = arith.constant 7 : index
    %140 = vector.load %arg4[%c0_71, %c0_72, %c7] : memref<1x16x20xf32, #tpu.memory_space<vmem>>, vector<1x16x1xf32>
    %141 = vector.shape_cast %140 : vector<1x16x1xf32> to vector<16x1xf32>
    %142 = vector.shape_cast %133 : vector<16x1xf32> to vector<1x16x1xf32>
    tpu.vector_store %arg4[%c0_71, %c0_72, %c7], %142 {strides = array<i32>} : memref<1x16x20xf32, #tpu.memory_space<vmem>>, vector<1x16x1xf32>,
    %c0_73 = arith.constant 0 : index
    %c0_74 = arith.constant 0 : index
    %c7_75 = arith.constant 7 : index
    %143 = vector.load %arg5[%c0_73, %c0_74, %c7_75] : memref<1x16x20xi32, #tpu.memory_space<vmem>>, vector<1x16x1xi32>
    %144 = vector.shape_cast %143 : vector<1x16x1xi32> to vector<16x1xi32>
    %145 = vector.shape_cast %139 : vector<16x1xi32> to vector<1x16x1xi32>
    tpu.vector_store %arg5[%c0_73, %c0_74, %c7_75], %145 {strides = array<i32>} : memref<1x16x20xi32, #tpu.memory_space<vmem>>, vector<1x16x1xi32>,
    %146 = vector.broadcast %139 : vector<16x1xi32> to vector<16x256xi32>
    %147 = arith.cmpi eq, %5, %146 : vector<16x256xi32>
    %cst_76 = arith.constant 0xFF800000 : f32
    %148 = vector.broadcast %cst_76 : f32 to vector<16x256xf32>
    %149 = arith.select %147, %148, %131 : vector<16x256xi1>, vector<16x256xf32>
    %cst_77 = arith.constant dense<0xFF800000> : vector<16xf32>
    %150 = vector.multi_reduction <maximumf>, %149, %cst_77 [1] : vector<16x256xf32> to vector<16xf32>
    %151 = vector.shape_cast %150 : vector<16xf32> to vector<16x1xf32>
    %152 = vector.broadcast %151 : vector<16x1xf32> to vector<16x256xf32>
    %153 = arith.cmpf oeq, %149, %152 : vector<16x256xf32>
    %c256_i32_78 = arith.constant 256 : i32
    %154 = vector.broadcast %c256_i32_78 : i32 to vector<16x256xi32>
    %155 = arith.select %153, %5, %154 : vector<16x256xi1>, vector<16x256xi32>
    %cst_79 = arith.constant dense<2147483647> : vector<16xi32>
    %156 = vector.multi_reduction <minsi>, %155, %cst_79 [1] : vector<16x256xi32> to vector<16xi32>
    %157 = vector.shape_cast %156 : vector<16xi32> to vector<16x1xi32>
    %c0_80 = arith.constant 0 : index
    %c0_81 = arith.constant 0 : index
    %c8 = arith.constant 8 : index
    %158 = vector.load %arg4[%c0_80, %c0_81, %c8] : memref<1x16x20xf32, #tpu.memory_space<vmem>>, vector<1x16x1xf32>
    %159 = vector.shape_cast %158 : vector<1x16x1xf32> to vector<16x1xf32>
    %160 = vector.shape_cast %151 : vector<16x1xf32> to vector<1x16x1xf32>
    tpu.vector_store %arg4[%c0_80, %c0_81, %c8], %160 {strides = array<i32>} : memref<1x16x20xf32, #tpu.memory_space<vmem>>, vector<1x16x1xf32>,
    %c0_82 = arith.constant 0 : index
    %c0_83 = arith.constant 0 : index
    %c8_84 = arith.constant 8 : index
    %161 = vector.load %arg5[%c0_82, %c0_83, %c8_84] : memref<1x16x20xi32, #tpu.memory_space<vmem>>, vector<1x16x1xi32>
    %162 = vector.shape_cast %161 : vector<1x16x1xi32> to vector<16x1xi32>
    %163 = vector.shape_cast %157 : vector<16x1xi32> to vector<1x16x1xi32>
    tpu.vector_store %arg5[%c0_82, %c0_83, %c8_84], %163 {strides = array<i32>} : memref<1x16x20xi32, #tpu.memory_space<vmem>>, vector<1x16x1xi32>,
    %164 = vector.broadcast %157 : vector<16x1xi32> to vector<16x256xi32>
    %165 = arith.cmpi eq, %5, %164 : vector<16x256xi32>
    %cst_85 = arith.constant 0xFF800000 : f32
    %166 = vector.broadcast %cst_85 : f32 to vector<16x256xf32>
    %167 = arith.select %165, %166, %149 : vector<16x256xi1>, vector<16x256xf32>
    %cst_86 = arith.constant dense<0xFF800000> : vector<16xf32>
    %168 = vector.multi_reduction <maximumf>, %167, %cst_86 [1] : vector<16x256xf32> to vector<16xf32>
    %169 = vector.shape_cast %168 : vector<16xf32> to vector<16x1xf32>
    %170 = vector.broadcast %169 : vector<16x1xf32> to vector<16x256xf32>
    %171 = arith.cmpf oeq, %167, %170 : vector<16x256xf32>
    %c256_i32_87 = arith.constant 256 : i32
    %172 = vector.broadcast %c256_i32_87 : i32 to vector<16x256xi32>
    %173 = arith.select %171, %5, %172 : vector<16x256xi1>, vector<16x256xi32>
    %cst_88 = arith.constant dense<2147483647> : vector<16xi32>
    %174 = vector.multi_reduction <minsi>, %173, %cst_88 [1] : vector<16x256xi32> to vector<16xi32>
    %175 = vector.shape_cast %174 : vector<16xi32> to vector<16x1xi32>
    %c0_89 = arith.constant 0 : index
    %c0_90 = arith.constant 0 : index
    %c9 = arith.constant 9 : index
    %176 = vector.load %arg4[%c0_89, %c0_90, %c9] : memref<1x16x20xf32, #tpu.memory_space<vmem>>, vector<1x16x1xf32>
    %177 = vector.shape_cast %176 : vector<1x16x1xf32> to vector<16x1xf32>
    %178 = vector.shape_cast %169 : vector<16x1xf32> to vector<1x16x1xf32>
    tpu.vector_store %arg4[%c0_89, %c0_90, %c9], %178 {strides = array<i32>} : memref<1x16x20xf32, #tpu.memory_space<vmem>>, vector<1x16x1xf32>,
    %c0_91 = arith.constant 0 : index
    %c0_92 = arith.constant 0 : index
    %c9_93 = arith.constant 9 : index
    %179 = vector.load %arg5[%c0_91, %c0_92, %c9_93] : memref<1x16x20xi32, #tpu.memory_space<vmem>>, vector<1x16x1xi32>
    %180 = vector.shape_cast %179 : vector<1x16x1xi32> to vector<16x1xi32>
    %181 = vector.shape_cast %175 : vector<16x1xi32> to vector<1x16x1xi32>
    tpu.vector_store %arg5[%c0_91, %c0_92, %c9_93], %181 {strides = array<i32>} : memref<1x16x20xi32, #tpu.memory_space<vmem>>, vector<1x16x1xi32>,
    %182 = vector.broadcast %175 : vector<16x1xi32> to vector<16x256xi32>
    %183 = arith.cmpi eq, %5, %182 : vector<16x256xi32>
    %cst_94 = arith.constant 0xFF800000 : f32
    %184 = vector.broadcast %cst_94 : f32 to vector<16x256xf32>
    %185 = arith.select %183, %184, %167 : vector<16x256xi1>, vector<16x256xf32>
    %cst_95 = arith.constant dense<0xFF800000> : vector<16xf32>
    %186 = vector.multi_reduction <maximumf>, %185, %cst_95 [1] : vector<16x256xf32> to vector<16xf32>
    %187 = vector.shape_cast %186 : vector<16xf32> to vector<16x1xf32>
    %188 = vector.broadcast %187 : vector<16x1xf32> to vector<16x256xf32>
    %189 = arith.cmpf oeq, %185, %188 : vector<16x256xf32>
    %c256_i32_96 = arith.constant 256 : i32
    %190 = vector.broadcast %c256_i32_96 : i32 to vector<16x256xi32>
    %191 = arith.select %189, %5, %190 : vector<16x256xi1>, vector<16x256xi32>
    %cst_97 = arith.constant dense<2147483647> : vector<16xi32>
    %192 = vector.multi_reduction <minsi>, %191, %cst_97 [1] : vector<16x256xi32> to vector<16xi32>
    %193 = vector.shape_cast %192 : vector<16xi32> to vector<16x1xi32>
    %c0_98 = arith.constant 0 : index
    %c0_99 = arith.constant 0 : index
    %c10 = arith.constant 10 : index
    %194 = vector.load %arg4[%c0_98, %c0_99, %c10] : memref<1x16x20xf32, #tpu.memory_space<vmem>>, vector<1x16x1xf32>
    %195 = vector.shape_cast %194 : vector<1x16x1xf32> to vector<16x1xf32>
    %196 = vector.shape_cast %187 : vector<16x1xf32> to vector<1x16x1xf32>
    tpu.vector_store %arg4[%c0_98, %c0_99, %c10], %196 {strides = array<i32>} : memref<1x16x20xf32, #tpu.memory_space<vmem>>, vector<1x16x1xf32>,
    %c0_100 = arith.constant 0 : index
    %c0_101 = arith.constant 0 : index
    %c10_102 = arith.constant 10 : index
    %197 = vector.load %arg5[%c0_100, %c0_101, %c10_102] : memref<1x16x20xi32, #tpu.memory_space<vmem>>, vector<1x16x1xi32>
    %198 = vector.shape_cast %197 : vector<1x16x1xi32> to vector<16x1xi32>
    %199 = vector.shape_cast %193 : vector<16x1xi32> to vector<1x16x1xi32>
    tpu.vector_store %arg5[%c0_100, %c0_101, %c10_102], %199 {strides = array<i32>} : memref<1x16x20xi32, #tpu.memory_space<vmem>>, vector<1x16x1xi32>,
    %200 = vector.broadcast %193 : vector<16x1xi32> to vector<16x256xi32>
    %201 = arith.cmpi eq, %5, %200 : vector<16x256xi32>
    %cst_103 = arith.constant 0xFF800000 : f32
    %202 = vector.broadcast %cst_103 : f32 to vector<16x256xf32>
    %203 = arith.select %201, %202, %185 : vector<16x256xi1>, vector<16x256xf32>
    %cst_104 = arith.constant dense<0xFF800000> : vector<16xf32>
    %204 = vector.multi_reduction <maximumf>, %203, %cst_104 [1] : vector<16x256xf32> to vector<16xf32>
    %205 = vector.shape_cast %204 : vector<16xf32> to vector<16x1xf32>
    %206 = vector.broadcast %205 : vector<16x1xf32> to vector<16x256xf32>
    %207 = arith.cmpf oeq, %203, %206 : vector<16x256xf32>
    %c256_i32_105 = arith.constant 256 : i32
    %208 = vector.broadcast %c256_i32_105 : i32 to vector<16x256xi32>
    %209 = arith.select %207, %5, %208 : vector<16x256xi1>, vector<16x256xi32>
    %cst_106 = arith.constant dense<2147483647> : vector<16xi32>
    %210 = vector.multi_reduction <minsi>, %209, %cst_106 [1] : vector<16x256xi32> to vector<16xi32>
    %211 = vector.shape_cast %210 : vector<16xi32> to vector<16x1xi32>
    %c0_107 = arith.constant 0 : index
    %c0_108 = arith.constant 0 : index
    %c11 = arith.constant 11 : index
    %212 = vector.load %arg4[%c0_107, %c0_108, %c11] : memref<1x16x20xf32, #tpu.memory_space<vmem>>, vector<1x16x1xf32>
    %213 = vector.shape_cast %212 : vector<1x16x1xf32> to vector<16x1xf32>
    %214 = vector.shape_cast %205 : vector<16x1xf32> to vector<1x16x1xf32>
    tpu.vector_store %arg4[%c0_107, %c0_108, %c11], %214 {strides = array<i32>} : memref<1x16x20xf32, #tpu.memory_space<vmem>>, vector<1x16x1xf32>,
    %c0_109 = arith.constant 0 : index
    %c0_110 = arith.constant 0 : index
    %c11_111 = arith.constant 11 : index
    %215 = vector.load %arg5[%c0_109, %c0_110, %c11_111] : memref<1x16x20xi32, #tpu.memory_space<vmem>>, vector<1x16x1xi32>
    %216 = vector.shape_cast %215 : vector<1x16x1xi32> to vector<16x1xi32>
    %217 = vector.shape_cast %211 : vector<16x1xi32> to vector<1x16x1xi32>
    tpu.vector_store %arg5[%c0_109, %c0_110, %c11_111], %217 {strides = array<i32>} : memref<1x16x20xi32, #tpu.memory_space<vmem>>, vector<1x16x1xi32>,
    %218 = vector.broadcast %211 : vector<16x1xi32> to vector<16x256xi32>
    %219 = arith.cmpi eq, %5, %218 : vector<16x256xi32>
    %cst_112 = arith.constant 0xFF800000 : f32
    %220 = vector.broadcast %cst_112 : f32 to vector<16x256xf32>
    %221 = arith.select %219, %220, %203 : vector<16x256xi1>, vector<16x256xf32>
    %cst_113 = arith.constant dense<0xFF800000> : vector<16xf32>
    %222 = vector.multi_reduction <maximumf>, %221, %cst_113 [1] : vector<16x256xf32> to vector<16xf32>
    %223 = vector.shape_cast %222 : vector<16xf32> to vector<16x1xf32>
    %224 = vector.broadcast %223 : vector<16x1xf32> to vector<16x256xf32>
    %225 = arith.cmpf oeq, %221, %224 : vector<16x256xf32>
    %c256_i32_114 = arith.constant 256 : i32
    %226 = vector.broadcast %c256_i32_114 : i32 to vector<16x256xi32>
    %227 = arith.select %225, %5, %226 : vector<16x256xi1>, vector<16x256xi32>
    %cst_115 = arith.constant dense<2147483647> : vector<16xi32>
    %228 = vector.multi_reduction <minsi>, %227, %cst_115 [1] : vector<16x256xi32> to vector<16xi32>
    %229 = vector.shape_cast %228 : vector<16xi32> to vector<16x1xi32>
    %c0_116 = arith.constant 0 : index
    %c0_117 = arith.constant 0 : index
    %c12 = arith.constant 12 : index
    %230 = vector.load %arg4[%c0_116, %c0_117, %c12] : memref<1x16x20xf32, #tpu.memory_space<vmem>>, vector<1x16x1xf32>
    %231 = vector.shape_cast %230 : vector<1x16x1xf32> to vector<16x1xf32>
    %232 = vector.shape_cast %223 : vector<16x1xf32> to vector<1x16x1xf32>
    tpu.vector_store %arg4[%c0_116, %c0_117, %c12], %232 {strides = array<i32>} : memref<1x16x20xf32, #tpu.memory_space<vmem>>, vector<1x16x1xf32>,
    %c0_118 = arith.constant 0 : index
    %c0_119 = arith.constant 0 : index
    %c12_120 = arith.constant 12 : index
    %233 = vector.load %arg5[%c0_118, %c0_119, %c12_120] : memref<1x16x20xi32, #tpu.memory_space<vmem>>, vector<1x16x1xi32>
    %234 = vector.shape_cast %233 : vector<1x16x1xi32> to vector<16x1xi32>
    %235 = vector.shape_cast %229 : vector<16x1xi32> to vector<1x16x1xi32>
    tpu.vector_store %arg5[%c0_118, %c0_119, %c12_120], %235 {strides = array<i32>} : memref<1x16x20xi32, #tpu.memory_space<vmem>>, vector<1x16x1xi32>,
    %236 = vector.broadcast %229 : vector<16x1xi32> to vector<16x256xi32>
    %237 = arith.cmpi eq, %5, %236 : vector<16x256xi32>
    %cst_121 = arith.constant 0xFF800000 : f32
    %238 = vector.broadcast %cst_121 : f32 to vector<16x256xf32>
    %239 = arith.select %237, %238, %221 : vector<16x256xi1>, vector<16x256xf32>
    %cst_122 = arith.constant dense<0xFF800000> : vector<16xf32>
    %240 = vector.multi_reduction <maximumf>, %239, %cst_122 [1] : vector<16x256xf32> to vector<16xf32>
    %241 = vector.shape_cast %240 : vector<16xf32> to vector<16x1xf32>
    %242 = vector.broadcast %241 : vector<16x1xf32> to vector<16x256xf32>
    %243 = arith.cmpf oeq, %239, %242 : vector<16x256xf32>
    %c256_i32_123 = arith.constant 256 : i32
    %244 = vector.broadcast %c256_i32_123 : i32 to vector<16x256xi32>
    %245 = arith.select %243, %5, %244 : vector<16x256xi1>, vector<16x256xi32>
    %cst_124 = arith.constant dense<2147483647> : vector<16xi32>
    %246 = vector.multi_reduction <minsi>, %245, %cst_124 [1] : vector<16x256xi32> to vector<16xi32>
    %247 = vector.shape_cast %246 : vector<16xi32> to vector<16x1xi32>
    %c0_125 = arith.constant 0 : index
    %c0_126 = arith.constant 0 : index
    %c13 = arith.constant 13 : index
    %248 = vector.load %arg4[%c0_125, %c0_126, %c13] : memref<1x16x20xf32, #tpu.memory_space<vmem>>, vector<1x16x1xf32>
    %249 = vector.shape_cast %248 : vector<1x16x1xf32> to vector<16x1xf32>
    %250 = vector.shape_cast %241 : vector<16x1xf32> to vector<1x16x1xf32>
    tpu.vector_store %arg4[%c0_125, %c0_126, %c13], %250 {strides = array<i32>} : memref<1x16x20xf32, #tpu.memory_space<vmem>>, vector<1x16x1xf32>,
    %c0_127 = arith.constant 0 : index
    %c0_128 = arith.constant 0 : index
    %c13_129 = arith.constant 13 : index
    %251 = vector.load %arg5[%c0_127, %c0_128, %c13_129] : memref<1x16x20xi32, #tpu.memory_space<vmem>>, vector<1x16x1xi32>
    %252 = vector.shape_cast %251 : vector<1x16x1xi32> to vector<16x1xi32>
    %253 = vector.shape_cast %247 : vector<16x1xi32> to vector<1x16x1xi32>
    tpu.vector_store %arg5[%c0_127, %c0_128, %c13_129], %253 {strides = array<i32>} : memref<1x16x20xi32, #tpu.memory_space<vmem>>, vector<1x16x1xi32>,
    %254 = vector.broadcast %247 : vector<16x1xi32> to vector<16x256xi32>
    %255 = arith.cmpi eq, %5, %254 : vector<16x256xi32>
    %cst_130 = arith.constant 0xFF800000 : f32
    %256 = vector.broadcast %cst_130 : f32 to vector<16x256xf32>
    %257 = arith.select %255, %256, %239 : vector<16x256xi1>, vector<16x256xf32>
    %cst_131 = arith.constant dense<0xFF800000> : vector<16xf32>
    %258 = vector.multi_reduction <maximumf>, %257, %cst_131 [1] : vector<16x256xf32> to vector<16xf32>
    %259 = vector.shape_cast %258 : vector<16xf32> to vector<16x1xf32>
    %260 = vector.broadcast %259 : vector<16x1xf32> to vector<16x256xf32>
    %261 = arith.cmpf oeq, %257, %260 : vector<16x256xf32>
    %c256_i32_132 = arith.constant 256 : i32
    %262 = vector.broadcast %c256_i32_132 : i32 to vector<16x256xi32>
    %263 = arith.select %261, %5, %262 : vector<16x256xi1>, vector<16x256xi32>
    %cst_133 = arith.constant dense<2147483647> : vector<16xi32>
    %264 = vector.multi_reduction <minsi>, %263, %cst_133 [1] : vector<16x256xi32> to vector<16xi32>
    %265 = vector.shape_cast %264 : vector<16xi32> to vector<16x1xi32>
    %c0_134 = arith.constant 0 : index
    %c0_135 = arith.constant 0 : index
    %c14 = arith.constant 14 : index
    %266 = vector.load %arg4[%c0_134, %c0_135, %c14] : memref<1x16x20xf32, #tpu.memory_space<vmem>>, vector<1x16x1xf32>
    %267 = vector.shape_cast %266 : vector<1x16x1xf32> to vector<16x1xf32>
    %268 = vector.shape_cast %259 : vector<16x1xf32> to vector<1x16x1xf32>
    tpu.vector_store %arg4[%c0_134, %c0_135, %c14], %268 {strides = array<i32>} : memref<1x16x20xf32, #tpu.memory_space<vmem>>, vector<1x16x1xf32>,
    %c0_136 = arith.constant 0 : index
    %c0_137 = arith.constant 0 : index
    %c14_138 = arith.constant 14 : index
    %269 = vector.load %arg5[%c0_136, %c0_137, %c14_138] : memref<1x16x20xi32, #tpu.memory_space<vmem>>, vector<1x16x1xi32>
    %270 = vector.shape_cast %269 : vector<1x16x1xi32> to vector<16x1xi32>
    %271 = vector.shape_cast %265 : vector<16x1xi32> to vector<1x16x1xi32>
    tpu.vector_store %arg5[%c0_136, %c0_137, %c14_138], %271 {strides = array<i32>} : memref<1x16x20xi32, #tpu.memory_space<vmem>>, vector<1x16x1xi32>,
    %272 = vector.broadcast %265 : vector<16x1xi32> to vector<16x256xi32>
    %273 = arith.cmpi eq, %5, %272 : vector<16x256xi32>
    %cst_139 = arith.constant 0xFF800000 : f32
    %274 = vector.broadcast %cst_139 : f32 to vector<16x256xf32>
    %275 = arith.select %273, %274, %257 : vector<16x256xi1>, vector<16x256xf32>
    %cst_140 = arith.constant dense<0xFF800000> : vector<16xf32>
    %276 = vector.multi_reduction <maximumf>, %275, %cst_140 [1] : vector<16x256xf32> to vector<16xf32>
    %277 = vector.shape_cast %276 : vector<16xf32> to vector<16x1xf32>
    %278 = vector.broadcast %277 : vector<16x1xf32> to vector<16x256xf32>
    %279 = arith.cmpf oeq, %275, %278 : vector<16x256xf32>
    %c256_i32_141 = arith.constant 256 : i32
    %280 = vector.broadcast %c256_i32_141 : i32 to vector<16x256xi32>
    %281 = arith.select %279, %5, %280 : vector<16x256xi1>, vector<16x256xi32>
    %cst_142 = arith.constant dense<2147483647> : vector<16xi32>
    %282 = vector.multi_reduction <minsi>, %281, %cst_142 [1] : vector<16x256xi32> to vector<16xi32>
    %283 = vector.shape_cast %282 : vector<16xi32> to vector<16x1xi32>
    %c0_143 = arith.constant 0 : index
    %c0_144 = arith.constant 0 : index
    %c15 = arith.constant 15 : index
    %284 = vector.load %arg4[%c0_143, %c0_144, %c15] : memref<1x16x20xf32, #tpu.memory_space<vmem>>, vector<1x16x1xf32>
    %285 = vector.shape_cast %284 : vector<1x16x1xf32> to vector<16x1xf32>
    %286 = vector.shape_cast %277 : vector<16x1xf32> to vector<1x16x1xf32>
    tpu.vector_store %arg4[%c0_143, %c0_144, %c15], %286 {strides = array<i32>} : memref<1x16x20xf32, #tpu.memory_space<vmem>>, vector<1x16x1xf32>,
    %c0_145 = arith.constant 0 : index
    %c0_146 = arith.constant 0 : index
    %c15_147 = arith.constant 15 : index
    %287 = vector.load %arg5[%c0_145, %c0_146, %c15_147] : memref<1x16x20xi32, #tpu.memory_space<vmem>>, vector<1x16x1xi32>
    %288 = vector.shape_cast %287 : vector<1x16x1xi32> to vector<16x1xi32>
    %289 = vector.shape_cast %283 : vector<16x1xi32> to vector<1x16x1xi32>
    tpu.vector_store %arg5[%c0_145, %c0_146, %c15_147], %289 {strides = array<i32>} : memref<1x16x20xi32, #tpu.memory_space<vmem>>, vector<1x16x1xi32>,
    %290 = vector.broadcast %283 : vector<16x1xi32> to vector<16x256xi32>
    %291 = arith.cmpi eq, %5, %290 : vector<16x256xi32>
    %cst_148 = arith.constant 0xFF800000 : f32
    %292 = vector.broadcast %cst_148 : f32 to vector<16x256xf32>
    %293 = arith.select %291, %292, %275 : vector<16x256xi1>, vector<16x256xf32>
    %cst_149 = arith.constant dense<0xFF800000> : vector<16xf32>
    %294 = vector.multi_reduction <maximumf>, %293, %cst_149 [1] : vector<16x256xf32> to vector<16xf32>
    %295 = vector.shape_cast %294 : vector<16xf32> to vector<16x1xf32>
    %296 = vector.broadcast %295 : vector<16x1xf32> to vector<16x256xf32>
    %297 = arith.cmpf oeq, %293, %296 : vector<16x256xf32>
    %c256_i32_150 = arith.constant 256 : i32
    %298 = vector.broadcast %c256_i32_150 : i32 to vector<16x256xi32>
    %299 = arith.select %297, %5, %298 : vector<16x256xi1>, vector<16x256xi32>
    %cst_151 = arith.constant dense<2147483647> : vector<16xi32>
    %300 = vector.multi_reduction <minsi>, %299, %cst_151 [1] : vector<16x256xi32> to vector<16xi32>
    %301 = vector.shape_cast %300 : vector<16xi32> to vector<16x1xi32>
    %c0_152 = arith.constant 0 : index
    %c0_153 = arith.constant 0 : index
    %c16 = arith.constant 16 : index
    %302 = vector.load %arg4[%c0_152, %c0_153, %c16] : memref<1x16x20xf32, #tpu.memory_space<vmem>>, vector<1x16x1xf32>
    %303 = vector.shape_cast %302 : vector<1x16x1xf32> to vector<16x1xf32>
    %304 = vector.shape_cast %295 : vector<16x1xf32> to vector<1x16x1xf32>
    tpu.vector_store %arg4[%c0_152, %c0_153, %c16], %304 {strides = array<i32>} : memref<1x16x20xf32, #tpu.memory_space<vmem>>, vector<1x16x1xf32>,
    %c0_154 = arith.constant 0 : index
    %c0_155 = arith.constant 0 : index
    %c16_156 = arith.constant 16 : index
    %305 = vector.load %arg5[%c0_154, %c0_155, %c16_156] : memref<1x16x20xi32, #tpu.memory_space<vmem>>, vector<1x16x1xi32>
    %306 = vector.shape_cast %305 : vector<1x16x1xi32> to vector<16x1xi32>
    %307 = vector.shape_cast %301 : vector<16x1xi32> to vector<1x16x1xi32>
    tpu.vector_store %arg5[%c0_154, %c0_155, %c16_156], %307 {strides = array<i32>} : memref<1x16x20xi32, #tpu.memory_space<vmem>>, vector<1x16x1xi32>,
    %308 = vector.broadcast %301 : vector<16x1xi32> to vector<16x256xi32>
    %309 = arith.cmpi eq, %5, %308 : vector<16x256xi32>
    %cst_157 = arith.constant 0xFF800000 : f32
    %310 = vector.broadcast %cst_157 : f32 to vector<16x256xf32>
    %311 = arith.select %309, %310, %293 : vector<16x256xi1>, vector<16x256xf32>
    %cst_158 = arith.constant dense<0xFF800000> : vector<16xf32>
    %312 = vector.multi_reduction <maximumf>, %311, %cst_158 [1] : vector<16x256xf32> to vector<16xf32>
    %313 = vector.shape_cast %312 : vector<16xf32> to vector<16x1xf32>
    %314 = vector.broadcast %313 : vector<16x1xf32> to vector<16x256xf32>
    %315 = arith.cmpf oeq, %311, %314 : vector<16x256xf32>
    %c256_i32_159 = arith.constant 256 : i32
    %316 = vector.broadcast %c256_i32_159 : i32 to vector<16x256xi32>
    %317 = arith.select %315, %5, %316 : vector<16x256xi1>, vector<16x256xi32>
    %cst_160 = arith.constant dense<2147483647> : vector<16xi32>
    %318 = vector.multi_reduction <minsi>, %317, %cst_160 [1] : vector<16x256xi32> to vector<16xi32>
    %319 = vector.shape_cast %318 : vector<16xi32> to vector<16x1xi32>
    %c0_161 = arith.constant 0 : index
    %c0_162 = arith.constant 0 : index
    %c17 = arith.constant 17 : index
    %320 = vector.load %arg4[%c0_161, %c0_162, %c17] : memref<1x16x20xf32, #tpu.memory_space<vmem>>, vector<1x16x1xf32>
    %321 = vector.shape_cast %320 : vector<1x16x1xf32> to vector<16x1xf32>
    %322 = vector.shape_cast %313 : vector<16x1xf32> to vector<1x16x1xf32>
    tpu.vector_store %arg4[%c0_161, %c0_162, %c17], %322 {strides = array<i32>} : memref<1x16x20xf32, #tpu.memory_space<vmem>>, vector<1x16x1xf32>,
    %c0_163 = arith.constant 0 : index
    %c0_164 = arith.constant 0 : index
    %c17_165 = arith.constant 17 : index
    %323 = vector.load %arg5[%c0_163, %c0_164, %c17_165] : memref<1x16x20xi32, #tpu.memory_space<vmem>>, vector<1x16x1xi32>
    %324 = vector.shape_cast %323 : vector<1x16x1xi32> to vector<16x1xi32>
    %325 = vector.shape_cast %319 : vector<16x1xi32> to vector<1x16x1xi32>
    tpu.vector_store %arg5[%c0_163, %c0_164, %c17_165], %325 {strides = array<i32>} : memref<1x16x20xi32, #tpu.memory_space<vmem>>, vector<1x16x1xi32>,
    %326 = vector.broadcast %319 : vector<16x1xi32> to vector<16x256xi32>
    %327 = arith.cmpi eq, %5, %326 : vector<16x256xi32>
    %cst_166 = arith.constant 0xFF800000 : f32
    %328 = vector.broadcast %cst_166 : f32 to vector<16x256xf32>
    %329 = arith.select %327, %328, %311 : vector<16x256xi1>, vector<16x256xf32>
    %cst_167 = arith.constant dense<0xFF800000> : vector<16xf32>
    %330 = vector.multi_reduction <maximumf>, %329, %cst_167 [1] : vector<16x256xf32> to vector<16xf32>
    %331 = vector.shape_cast %330 : vector<16xf32> to vector<16x1xf32>
    %332 = vector.broadcast %331 : vector<16x1xf32> to vector<16x256xf32>
    %333 = arith.cmpf oeq, %329, %332 : vector<16x256xf32>
    %c256_i32_168 = arith.constant 256 : i32
    %334 = vector.broadcast %c256_i32_168 : i32 to vector<16x256xi32>
    %335 = arith.select %333, %5, %334 : vector<16x256xi1>, vector<16x256xi32>
    %cst_169 = arith.constant dense<2147483647> : vector<16xi32>
    %336 = vector.multi_reduction <minsi>, %335, %cst_169 [1] : vector<16x256xi32> to vector<16xi32>
    %337 = vector.shape_cast %336 : vector<16xi32> to vector<16x1xi32>
    %c0_170 = arith.constant 0 : index
    %c0_171 = arith.constant 0 : index
    %c18 = arith.constant 18 : index
    %338 = vector.load %arg4[%c0_170, %c0_171, %c18] : memref<1x16x20xf32, #tpu.memory_space<vmem>>, vector<1x16x1xf32>
    %339 = vector.shape_cast %338 : vector<1x16x1xf32> to vector<16x1xf32>
    %340 = vector.shape_cast %331 : vector<16x1xf32> to vector<1x16x1xf32>
    tpu.vector_store %arg4[%c0_170, %c0_171, %c18], %340 {strides = array<i32>} : memref<1x16x20xf32, #tpu.memory_space<vmem>>, vector<1x16x1xf32>,
    %c0_172 = arith.constant 0 : index
    %c0_173 = arith.constant 0 : index
    %c18_174 = arith.constant 18 : index
    %341 = vector.load %arg5[%c0_172, %c0_173, %c18_174] : memref<1x16x20xi32, #tpu.memory_space<vmem>>, vector<1x16x1xi32>
    %342 = vector.shape_cast %341 : vector<1x16x1xi32> to vector<16x1xi32>
    %343 = vector.shape_cast %337 : vector<16x1xi32> to vector<1x16x1xi32>
    tpu.vector_store %arg5[%c0_172, %c0_173, %c18_174], %343 {strides = array<i32>} : memref<1x16x20xi32, #tpu.memory_space<vmem>>, vector<1x16x1xi32>,
    %344 = vector.broadcast %337 : vector<16x1xi32> to vector<16x256xi32>
    %345 = arith.cmpi eq, %5, %344 : vector<16x256xi32>
    %cst_175 = arith.constant 0xFF800000 : f32
    %346 = vector.broadcast %cst_175 : f32 to vector<16x256xf32>
    %347 = arith.select %345, %346, %329 : vector<16x256xi1>, vector<16x256xf32>
    %cst_176 = arith.constant dense<0xFF800000> : vector<16xf32>
    %348 = vector.multi_reduction <maximumf>, %347, %cst_176 [1] : vector<16x256xf32> to vector<16xf32>
    %349 = vector.shape_cast %348 : vector<16xf32> to vector<16x1xf32>
    %350 = vector.broadcast %349 : vector<16x1xf32> to vector<16x256xf32>
    %351 = arith.cmpf oeq, %347, %350 : vector<16x256xf32>
    %c256_i32_177 = arith.constant 256 : i32
    %352 = vector.broadcast %c256_i32_177 : i32 to vector<16x256xi32>
    %353 = arith.select %351, %5, %352 : vector<16x256xi1>, vector<16x256xi32>
    %cst_178 = arith.constant dense<2147483647> : vector<16xi32>
    %354 = vector.multi_reduction <minsi>, %353, %cst_178 [1] : vector<16x256xi32> to vector<16xi32>
    %355 = vector.shape_cast %354 : vector<16xi32> to vector<16x1xi32>
    %c0_179 = arith.constant 0 : index
    %c0_180 = arith.constant 0 : index
    %c19 = arith.constant 19 : index
    %356 = vector.load %arg4[%c0_179, %c0_180, %c19] : memref<1x16x20xf32, #tpu.memory_space<vmem>>, vector<1x16x1xf32>
    %357 = vector.shape_cast %356 : vector<1x16x1xf32> to vector<16x1xf32>
    %358 = vector.shape_cast %349 : vector<16x1xf32> to vector<1x16x1xf32>
    tpu.vector_store %arg4[%c0_179, %c0_180, %c19], %358 {strides = array<i32>} : memref<1x16x20xf32, #tpu.memory_space<vmem>>, vector<1x16x1xf32>,
    %c0_181 = arith.constant 0 : index
    %c0_182 = arith.constant 0 : index
    %c19_183 = arith.constant 19 : index
    %359 = vector.load %arg5[%c0_181, %c0_182, %c19_183] : memref<1x16x20xi32, #tpu.memory_space<vmem>>, vector<1x16x1xi32>
    %360 = vector.shape_cast %359 : vector<1x16x1xi32> to vector<16x1xi32>
    %361 = vector.shape_cast %355 : vector<16x1xi32> to vector<1x16x1xi32>
    tpu.vector_store %arg5[%c0_181, %c0_182, %c19_183], %361 {strides = array<i32>} : memref<1x16x20xi32, #tpu.memory_space<vmem>>, vector<1x16x1xi32>,
    %362 = vector.broadcast %7 : vector<16x1xf32> to vector<16x256xf32>
    %363 = arith.subf %4, %362 : vector<16x256xf32>
    %364 = math.exp %363 : vector<16x256xf32>
    %cst_184 = arith.constant dense<0.000000e+00> : vector<16xf32>
    %365 = vector.multi_reduction <add>, %364, %cst_184 [1] : vector<16x256xf32> to vector<16xf32>
    %366 = vector.shape_cast %365 : vector<16xf32> to vector<16x1xf32>
    %367 = tpu.reciprocal %366 {approx = true} : vector<16x1xf32> -> vector<16x1xf32>
    %c0_185 = arith.constant 0 : index
    %c0_186 = arith.constant 0 : index
    %c0_187 = arith.constant 0 : index
    %368 = vector.load %arg4[%c0_185, %c0_186, %c0_187] : memref<1x16x20xf32, #tpu.memory_space<vmem>>, vector<1x16x20xf32>
    %369 = vector.shape_cast %368 : vector<1x16x20xf32> to vector<16x20xf32>
    %370 = vector.broadcast %7 : vector<16x1xf32> to vector<16x20xf32>
    %371 = arith.subf %369, %370 : vector<16x20xf32>
    %372 = math.exp %371 : vector<16x20xf32>
    %373 = vector.broadcast %367 : vector<16x1xf32> to vector<16x20xf32>
    %374 = arith.mulf %372, %373 : vector<16x20xf32>
    %c0_188 = arith.constant 0 : index
    %c0_189 = arith.constant 0 : index
    %c0_190 = arith.constant 0 : index
    %375 = vector.load %arg4[%c0_188, %c0_189, %c0_190] : memref<1x16x20xf32, #tpu.memory_space<vmem>>, vector<1x16x20xf32>
    %376 = vector.shape_cast %375 : vector<1x16x20xf32> to vector<16x20xf32>
    %377 = vector.shape_cast %374 : vector<16x20xf32> to vector<1x16x20xf32>
    tpu.vector_store %arg4[%c0_188, %c0_189, %c0_190], %377 {strides = array<i32>} : memref<1x16x20xf32, #tpu.memory_space<vmem>>, vector<1x16x20xf32>,
    return
  }
  func.func @transform_0(%arg0: i32, %arg1: i32) -> (i32, i32, i32) {
    %c0_i32 = arith.constant 0 : i32
    %c0_i32_0 = arith.constant 0 : i32
    return %arg0, %arg1, %c0_i32 : i32, i32, i32
  }
  func.func @transform_1(%arg0: i32, %arg1: i32) -> (i32, i32, i32) {
    %c0_i32 = arith.constant 0 : i32
    %c0_i32_0 = arith.constant 0 : i32
    %c0_i32_1 = arith.constant 0 : i32
    return %arg0, %c0_i32, %c0_i32_0 : i32, i32, i32
  }
  func.func @transform_2(%arg0: i32, %arg1: i32) -> (i32, i32, i32) {
    %c0_i32 = arith.constant 0 : i32
    %c0_i32_0 = arith.constant 0 : i32
    return %arg0, %arg1, %c0_i32 : i32, i32, i32
  }
  func.func @transform_3(%arg0: i32, %arg1: i32) -> (i32, i32, i32) {
    %c0_i32 = arith.constant 0 : i32
    %c0_i32_0 = arith.constant 0 : i32
    return %arg0, %arg1, %c0_i32 : i32, i32, i32
  }
}

</mosaic_0001>

<bundles_post_ra>
// kernel: tpu_custom_call.1
= control target key start
LH: loop header
LB: loop body
LE: loop exit
PB: predicated region body
PF: predicated region fallthrough
CT: control target
= control target key end

     0   :  { %s2781_s0 = inlined_call_operand.hbm [shape: bf16[2,16,128], index: 0, kind: input, shape index: {}]   ;;  %s2782_s1 = inlined_call_operand.hbm [shape: bf16[2,128,256], index: 1, kind: input, shape index: {}]   ;;  %s2783_s2 = inlined_call_operand.hbm [shape: f32[2,16,20], index: 2, kind: output, shape index: {0}]   ;;  %s2784_s3 = inlined_call_operand.hbm [shape: s32[2,16,20], index: 3, kind: output, shape index: {1}]  }
   0x1   :  { %2785 = sst [smem:[#allocation14_spill]] %s2781_s0 }
   0x2   :  { %9 = vsyncpa [#allocation3], 0 }
   0x3   :  { %11 = vsyncpa [#allocation3 + $0x1], 0 }
   0x4   :  { %12 = vsyncpa [#allocation6], 0 }
   0x5   :  { %14 = vsyncpa [#allocation6 + $0x1], 0 }
   0x6   :  { %15 = vsyncpa [#allocation4], 0 }
   0x7   :  { %17 = vsyncpa [#allocation4 + $0x1], 0 }
   0x8   :  { %18 = vsyncpa [#allocation9], 0 }
   0x9   :  { %20 = vsyncpa [#allocation9 + $0x1], 0  ;;  %s2170_s12 = smov 0   ;;  %s2172_s13 = smov 0  }
   0xa   :  { %s2174_s14 = smov 0   ;;  %s2176_s15 = smov 0  }
   0xb   :  { %s2178_s16 = smov 0   ;;  %s2180_s17 = smov 0  }
   0xc LB: > { %s1803_s18 = sadd.s32 4294967295, %s2137_s17   ;;  %s1804_s19 = sadd.s32 4294967294, %s2137_s17   ;;  %s2137_s17 = sphi %s2180_s17, %s26_s17   ;;  %s2133_s16 = sphi %s2178_s16, %s2797_s16   ;;  %s2129_s15 = sphi %s2176_s15, %s2796_s15   ;;  %s2125_s14 = sphi %s2174_s14, %s2795_s14   ;;  %s2121_s13 = sphi %s2172_s13, %s2794_s13   ;;  %s2117_s12 = sphi %s2170_s12, %s2793_s12  }
   0xd   : > { %s38_s20 = sadd.s32 1, %s2133_s16  ;;  %s47_s21 = sadd.s32 1, %s2125_s14 }
   0xe   : > { %p40_p0 = scmp.ge.s32.totalorder %s38_s20, 2  ;;  %p54_p1 = scmp.ne.s32.totalorder %s2125_s14, %s2121_s13 }
   0xf   : > { %p55_p2 = scmp.eq.s32.totalorder %s2137_s17, 0  ;;  %p60_p3 = scmp.ne.s32.totalorder %s2121_s13, %s2117_s12 }
  0x10   : > { %s2799_s20 = smov (%p40_p0, %s38_s20), 0  ;;  %p61_p5 = scmp.eq.s32.totalorder %s1803_s18, 0 }
  0x11   : > { %p2211_p4 = por %p55_p2, %p54_p1  ;;  %s42_s23 = ssub.s32 %s2133_s16, %s2799_s20 }
  0x12   : > { %p112_p6 = scmp.eq.s32.totalorder %s1803_s18, 1  ;;  %p45_p7 = scmp.eq.s32.totalorder %s42_s23, 0 }
  0x13   : > { %p2217_p8 = por %p61_p5, %p60_p3  ;;  %p118_p10 = scmp.eq.s32.totalorder %s1804_s19, 1 }
  0x14   : > { %p2221_p9 = por %p112_p6, %p54_p1  ;;  %p1806_p12 = scmp.ge.s32.totalorder %s2137_s17, 2 }
  0x15   : > { %s2226_s26 = scalar_select %p45_p7, %s2125_s14, %s47_s21  }
  0x16   : > { %p2228_p11 = por %p118_p10, %p60_p3  ;;  %p1869_p13 = scmp.lt.s32.totalorder %s2137_s17, 2 }
  0x17   : > { %s2235_s28 = sand.u32 1, %s2125_s14   ;;  %s1843_s30 = sshll.u32 %s2133_s16, 7 }
  0x18   : > { %s1807_s29 = sshll.u32 %s2235_s28, 3  ;;  %s2790_s0 = sld [smem:[#allocation14_spill]] }
  0x19   : > { %s170_s7 = scalar_lea.vmem [#allocation2], %s1807_s29  ;;  %p2244_p0 = pnand %p1869_p13, %p2211_p4 }
  0x1a   : > { %s179_s8 = sshll.u32 %s170_s7, 4  ;;  %p1813_p1 = scmp.ge.s32.totalorder %s2137_s17, 1  ;;  %s180_s8 = int_to_ptr.vmem [resolvable:$true] %s179_s8 }
  0x1b   : > { %s167_s10 = scalar_lea.sflag [#allocation3], %s2235_s28  ;;  %p1969_p2 = pneg %p2244_p0 }
  0x1c   : > { %s1980_s11 = scalar_lea.vmem %s180_s8, 128  ;;  %s2139_s18 = smov [#allocation2]  }
  0x1d   : > { %p1981_p3 = scmp.ne.s32.totalorder %s180_s8, %s1980_s11  ;;  %s1985_s19 = sshll.u32 %s2139_s18, 4  ;;  %s1986_s19 = int_to_ptr.vmem [resolvable:$false] %s1985_s19 }
  0x1e   : > { %s178_s6 = scalar_lea.hbm %s2790_s0, %s1843_s30  ;;  %s1987_s21 = scalar_lea.vmem %s1986_s19, 256 }
  0x1f   : > { %p1983_p5 = pnand %p1981_p3, %p1969_p2  ;;  %p1988_p4 = scmp.lt.s32.totalorder %s180_s8, %s1986_s19 }
  0x20   : > { %p1989_p7 = scmp.lt.s32.totalorder %s1987_s21, %s1980_s11 }
  0x21   : > { %p1984_p6 = pneg %p1983_p5 }
  0x22   : > { %p1990_p10 = por %p1989_p7, %p1988_p4 }
  0x24   : > { %p1991_p13 = pnand %p1990_p10, %p1984_p6 }
  0x26   : > { %1994 = shalt.err (!%p1991_p13)
}
  0x27   : > { %s2140_s22 = smov 64   ;;  %s2141_s23 = smov 4  }
  0x28   : > { %1858 = dma.hbm_to_vmem [thread:$0]  (!%p2244_p0), %s178_s6, 128, %s180_s8, %s167_s10, %s2140_s22, %s2140_s22, %s2141_s23  }
  0x29   : > { %p208_p3 = scmp.lt.s32.totalorder %s2137_s17, 3  ;;  %s1810_s29 = sshll.u32 %s2235_s28, 7 }
  0x2a   : > { %s1844_s30 = sshll.u32 %s2133_s16, 11  ;;  %s193_s18 = scalar_lea.vmem [#allocation5], %s1810_s29 }
  0x2b   : > { %p2262_p5 = pnand %p1813_p1, %p208_p3  ;;  %s199_s11 = scalar_lea.hbm %s2782_s1, %s1844_s30 }
  0x2c   : > { %s200_s19 = sshll.u32 %s193_s18, 4  ;;  %s190_s21 = scalar_lea.sflag [#allocation6], %s2235_s28  ;;  %s201_s19 = int_to_ptr.vmem [resolvable:$true] %s200_s19 }
  0x2d   : > { %s2008_s0 = scalar_lea.vmem %s201_s19, 2048  ;;  %s2142_s6 = smov [#allocation5]  }
  0x2e   : > { %p2009_p6 = scmp.ne.s32.totalorder %s201_s19, %s2008_s0  ;;  %s2013_s8 = sshll.u32 %s2142_s6, 4  ;;  %s2014_s8 = int_to_ptr.vmem [resolvable:$false] %s2013_s8 }
  0x2f   : > { %s2015_s10 = scalar_lea.vmem %s2014_s8, 4096  ;;  %p2016_p1 = scmp.lt.s32.totalorder %s201_s19, %s2014_s8 }
  0x30   : > { %p2011_p4 = pnand %p2009_p6, %p1969_p2  ;;  %p2017_p10 = scmp.lt.s32.totalorder %s2015_s10, %s2008_s0 }
  0x32   : > { %p2012_p7 = pneg %p2011_p4  ;;  %p2018_p13 = por %p2017_p10, %p2016_p1 }
  0x34   : > { %p2019_p3 = pnand %p2018_p13, %p2012_p7 }
  0x36   : > { %2022 = shalt.err (!%p2019_p3)
}
  0x37   : > { %s2143_s22 = smov 128   ;;  %s2144_s23 = smov 8  }
  0x38   : > { %1861 = dma.hbm_to_vmem [thread:$0]  (!%p2244_p0), %s199_s11, 2048, %s201_s19, %s190_s21, %s2143_s22, %s2143_s22, %s2144_s23  }
  0x39   : > { %212 = sbr.rel (%p2262_p5) target bundleno = 8949 (0x22f5), region = 28  ;;  %s2278_s28 = sand.u32 (!%p2262_p5), 1, %s2121_s13  }
  0x3a   : > { %s1814_s29 = sshll.u32 (!%p2262_p5), %s2278_s28, 3  ;;  %s215_s30 = scalar_lea.sflag (!%p2262_p5), [#allocation3], %s2278_s28 }
  0x3b   : > { %s2282_s0 = scalar_lea.vmem (!%p2262_p5), [#allocation2], %s1814_s29 }
  0x3e   : > { %2100 = dma.done.wait (%p2217_p8), %s215_s30, 128  }
  0x3f   : > { %2102 = vsyncadd (%p2217_p8), %s215_s30, 4294967168  ;;  %s1815_s9 = sshll.u32 %s2278_s28, 7  ;;  %s224_s4 = scalar_lea.sflag [#allocation6], %s2278_s28 }
  0x40   : > { %s2290_s5 = scalar_lea.vmem [#allocation5], %s1815_s9 }
  0x41   : > { %2104 = dma.done.wait (%p2217_p8), %s224_s4, 2048  }
  0x42   : > { %2106 = vsyncadd (%p2217_p8), %s224_s4, 4294965248  ;;  %v2145_v0 = vmov 0   ;;  %v1926_v1 = vld [vmem:[%s2290_s5 + $0x74] ss:$8 sps:$4 sm:$0xff]   ;;  %v1928_v2 = vld [vmem:[%s2290_s5 + $0x70] ss:$8 sps:$4 sm:$0xff]   ;;  %v411_v24 = vlaneseq }
  0x43   : > { %400 = vmatprep.mubr.bf16.mxu0 %v2145_v0  ;;  %368 = vmatprep.subr.bf16.mxu0 %v1926_v1  ;;  %v1929_v3 = vld [vmem:[%s2290_s5 + $0x64] ss:$8 sps:$4 sm:$0xff]   ;;  %v1931_v4 = vld [vmem:[%s2290_s5 + $0x60] ss:$8 sps:$4 sm:$0xff]   ;;  %v1932_v5 = vld [vmem:[%s2290_s5 + $0x54] ss:$8 sps:$4 sm:$0xff]  }
  0x44   : > { %369 = vmatpush1.bf16.msra.mxu0 %v1928_v2  ;;  %v1934_v6 = vld [vmem:[%s2290_s5 + $0x50] ss:$8 sps:$4 sm:$0xff]   ;;  %v1935_v7 = vld [vmem:[%s2290_s5 + $0x44] ss:$8 sps:$4 sm:$0xff]   ;;  %v1937_v8 = vld [vmem:[%s2290_s5 + $0x40] ss:$8 sps:$4 sm:$0xff]  }
  0x45   : > { %370 = vmatprep.subr.bf16.mxu0 %v1929_v3  ;;  %v1938_v9 = vld [vmem:[%s2290_s5 + $0x34] ss:$8 sps:$4 sm:$0xff]   ;;  %v1940_v10 = vld [vmem:[%s2290_s5 + $0x30] ss:$8 sps:$4 sm:$0xff]   ;;  %v1941_v11 = vld [vmem:[%s2290_s5 + $0x24] ss:$8 sps:$4 sm:$0xff]  }
  0x46   : > { %v1943_v12 = vld [vmem:[%s2290_s5 + $0x20] ss:$8 sps:$4 sm:$0xff]   ;;  %v1944_v13 = vld [vmem:[%s2290_s5 + $0x14] ss:$8 sps:$4 sm:$0xff]   ;;  %v1946_v14 = vld [vmem:[%s2290_s5 + $0x10] ss:$8 sps:$4 sm:$0xff]  }
  0x47   : > { %v1947_v15 = vld [vmem:[%s2290_s5 + $0x4] ss:$8 sps:$4 sm:$0xff]   ;;  %v1949_v16 = vld [vmem:[%s2290_s5] ss:$8 sps:$4 sm:$0xff]   ;;  %v1950_v17 = vld [vmem:[%s2282_s0] sm:$0xff]   ;;  %v2325_v25 = vand.u32 127, %v411_v24 }
  0x48   : > { %371 = vmatpush1.bf16.msra.mxu0 %v1931_v4  ;;  %s1816_s24 = sshll.u32 %s2278_s28, 4  ;;  %vm460_vm0 = vcmask 7168   ;;  %vm519_vm13 = vcmask 15368   ;;  %s1845_s18 = sshll.u32 %s2129_s15, 8 }
  0x49   : > { %372 = vmatprep.subr.bf16.mxu0 %v1932_v5  ;;  %v2329_v26 = vadd.s32 128, %v2325_v25  ;;  %s2339_s7 = scalar_lea.vmem [#allocation7], %s1816_s24  ;;  %s2359_s11 = scalar_lea.vmem [#allocation8], %s1816_s24 }
  0x4a   : > { %s1640_s19 = sshll.u32 %s2339_s7, 4  ;;  %s2689_s8 = scalar_lea.hbm %s2783_s2, %s1845_s18  ;;  %s2691_s19 = int_to_ptr.vmem [resolvable:$true] %s1640_s19 }
  0x4b   : > { %s1620_s10 = scalar_lea.sflag [#allocation4], %s2278_s28  ;;  %s2023_s22 = scalar_lea.vmem %s2691_s19, 256 }
  0x4c   : > { %373 = vmatpush1.bf16.msra.mxu0 %v1934_v6  ;;  %p2024_p8 = scmp.ne.s32.totalorder %s2691_s19, %s2023_s22  ;;  %s2146_s23 = smov [#allocation7]  }
  0x4d   : > { %374 = vmatprep.subr.bf16.mxu0 %v1935_v7  ;;  %s2027_s29 = sshll.u32 %s2146_s23, 4  ;;  %s2028_s29 = int_to_ptr.vmem [resolvable:$false] %s2027_s29 }
  0x4e   : > { %p2025_p0 = pnand %p2024_p8, %p2221_p9  ;;  %s2029_s30 = scalar_lea.vmem %s2028_s29, 512 }
  0x4f   : > { %p2030_p5 = scmp.lt.s32.totalorder %s2691_s19, %s2028_s29  ;;  %p2031_p6 = scmp.lt.s32.totalorder %s2029_s30, %s2023_s22 }
  0x50   : > { %375 = vmatpush1.bf16.msra.mxu0 %v1937_v8  ;;  %p2026_p2 = pneg %p2025_p0 }
  0x51   : > { %376 = vmatprep.subr.bf16.mxu0 %v1938_v9  ;;  %p2032_p4 = por %p2031_p6, %p2030_p5 }
  0x53   : > { %p2033_p7 = pnand %p2032_p4, %p2026_p2 }
  0x54   : > { %377 = vmatpush1.bf16.msra.mxu0 %v1940_v10 }
  0x55   : > { %378 = vmatprep.subr.bf16.mxu0 %v1941_v11 }
  0x58   : > { %379 = vmatpush1.bf16.msra.mxu0 %v1943_v12 }
  0x59   : > { %380 = vmatprep.subr.bf16.mxu0 %v1944_v13 }
  0x5c   : > { %381 = vmatpush1.bf16.msra.mxu0 %v1946_v14 }
  0x5d   : > { %382 = vmatprep.subr.bf16.mxu0 %v1947_v15 }
  0x60   : > { %383 = vmatpush1.bf16.msra.mxu0 %v1949_v16 }
  0x63   : > { %401 = vmatmul.mubr.bf16.vlgmr.msra.gmra.mxu0 %v1950_v17 }
 0x123   : > { %v2313_v18 = vpop.f32.mrf.mxu0 }
 0x125   : > { %v2315_v19 = vpop.f32.mrf.mxu0 }
 0x126   : > { %v414_v20 = vmax.f32 %v2313_v18, %v2315_v19 }
 0x127   : > { %v2319_v21 = vpop.f32.mrf.mxu0 }
 0x128   : > { %415 = vmax.xlane.f32.xlu0 %v414_v20 }
 0x129   : > { %v2321_v22 = vpop.f32.mrf.mxu0 }
 0x12a   : > { %v417_v23 = vmax.f32 %v2319_v21, %v2321_v22 }
 0x12c   : > { %418 = vmax.xlane.f32.xlu0 %v417_v23 }
 0x1b1   : > { %v2331_v27 = vpop.xlane.xlu0 %415 }
 0x1b2   : > { %vm420_vm1 = vcmp.eq.f32.partialorder %v2313_v18, %v2331_v27  ;;  %vm421_vm2 = vcmp.eq.f32.partialorder %v2315_v19, %v2331_v27  ;;  %461 = vst.msk [vmem:[%s2339_s7] sm:$0xff] %vm460_vm0, %v2331_v27 }
 0x1b3   : > { %v424_v28 = vsel %vm420_vm1, %v2325_v25, 256  ;;  %v425_v29 = vsel %vm421_vm2, %v2329_v26, 256 }
 0x1b4   : > { %vm428_vm3 = vcmp.lt.s32.totalorder %v424_v28, %v425_v29 }
 0x1b5   : > { %v2346_v30 = vpop.xlane.xlu0 %418  ;;  %v429_v31 = vsel %vm428_vm3, %v424_v28, %v425_v29 }
 0x1b6   : > { %v431_v32 = vshra.s32 %v429_v31, 16  ;;  %462 = vst.msk [vmem:[%s2339_s7 + $0x8] sm:$0xff] %vm460_vm0, %v2346_v30  ;;  %vm422_vm4 = vcmp.eq.f32.partialorder %v2319_v21, %v2346_v30  ;;  %vm423_vm5 = vcmp.eq.f32.partialorder %v2321_v22, %v2346_v30  ;;  %v430_v39 = vand.u32 65535, %v429_v31 }
 0x1b7   : > { %v426_v34 = vsel %vm422_vm4, %v2325_v25, 256  ;;  %v427_v35 = vsel %vm423_vm5, %v2329_v26, 256 }
 0x1b8   : > { %v433_v33 = vcvt.s32.f32 %v431_v32  ;;  %vm444_vm6 = vcmp.lt.s32.totalorder %v426_v34, %v427_v35  ;;  %v432_v41 = vcvt.s32.f32 %v430_v39 }
 0x1b9   : > { %v445_v36 = vsel %vm444_vm6, %v426_v34, %v427_v35 }
 0x1ba   : > { %434 = vmin.xlane.f32.xlu1 %v433_v33  ;;  %v447_v37 = vshra.s32 %v445_v36, 16  ;;  %v446_v43 = vand.u32 65535, %v445_v36 }
 0x1bc   : > { %v449_v38 = vcvt.s32.f32 %v447_v37  ;;  %v448_v45 = vcvt.s32.f32 %v446_v43 }
 0x1be   : > { %450 = vmin.xlane.f32.xlu1 %v449_v38 }
 0x243   : > { %v435_v40 = vpop.xlane.xlu1 %434 }
 0x244   : > { %vm436_vm7 = vcmp.eq.f32.partialorder %v433_v33, %v435_v40  ;;  %v441_v47 = vcvt.f32.s32 %v435_v40 }
 0x245   : > { %v437_v42 = vsel %vm436_vm7, %v432_v41, inf }
 0x246   : > { %438 = vmin.xlane.f32.xlu0 %v437_v42  ;;  %v442_v49 = vshll.u32 %v441_v47, 16 }
 0x247   : > { %v451_v44 = vpop.xlane.xlu1 %450 }
 0x248   : > { %vm452_vm8 = vcmp.eq.f32.partialorder %v449_v38, %v451_v44  ;;  %v457_v51 = vcvt.f32.s32 %v451_v44 }
 0x249   : > { %v453_v46 = vsel %vm452_vm8, %v448_v45, inf }
 0x24a   : > { %454 = vmin.xlane.f32.xlu1 %v453_v46  ;;  %v458_v56 = vshll.u32 %v457_v51, 16 }
 0x2cf   : > { %v439_v48 = vpop.xlane.xlu0 %438 }
 0x2d0   : > { %v440_v50 = vcvt.f32.s32 %v439_v48 }
 0x2d2   : > { %v443_v52 = vadd.s32 %v442_v49, %v440_v50 }
 0x2d3   : > { %v455_v53 = vpop.xlane.xlu1 %454 }
 0x2d4   : > { %463 = vst.msk [vmem:[%s2359_s11] sm:$0xff] %vm460_vm0, %v443_v52  ;;  %vm465_vm9 = vcmp.eq.s32.totalorder %v2325_v25, %v443_v52  ;;  %vm466_vm10 = vcmp.eq.s32.totalorder %v2329_v26, %v443_v52  ;;  %v456_v57 = vcvt.f32.s32 %v455_v53 }
 0x2d5   : > { %v469_v54 = vsel %vm465_vm9, -inf, %v2313_v18  ;;  %v470_v55 = vsel %vm466_vm10, -inf, %v2315_v19  ;;  %vm578_vm10 = vcmask 23568  }
 0x2d6   : > { %v473_v58 = vmax.f32 %v469_v54, %v470_v55  ;;  %v459_v59 = vadd.s32 %v458_v56, %v456_v57 }
 0x2d8   : > { %474 = vmax.xlane.f32.xlu0 %v473_v58  ;;  %464 = vst.msk [vmem:[%s2359_s11 + $0x8] sm:$0xff] %vm460_vm0, %v459_v59  ;;  %vm467_vm11 = vcmp.eq.s32.totalorder %v2325_v25, %v459_v59  ;;  %vm468_vm12 = vcmp.eq.s32.totalorder %v2329_v26, %v459_v59 }
 0x2d9   : > { %v471_v60 = vsel %vm467_vm11, -inf, %v2319_v21  ;;  %v472_v61 = vsel %vm468_vm12, -inf, %v2321_v22 }
 0x2da   : > { %v476_v62 = vmax.f32 %v471_v60, %v472_v61 }
 0x2dc   : > { %477 = vmax.xlane.f32.xlu1 %v476_v62 }
 0x361   : > { %v475_v63 = vpop.xlane.xlu0 %474 }
 0x362   : > { %vm479_vm14 = vcmp.eq.f32.partialorder %v469_v54, %v475_v63  ;;  %vm480_vm15 = vcmp.eq.f32.partialorder %v470_v55, %v475_v63  ;;  %520 = vst.msk [vmem:[%s2339_s7] sm:$0xff] %vm519_vm13, %v475_v63 }
 0x363   : > { %v483_v0 = vsel %vm479_vm14, %v2325_v25, 256  ;;  %v484_v1 = vsel %vm480_vm15, %v2329_v26, 256 }
 0x364   : > { %vm487_vm0 = vcmp.lt.s32.totalorder %v483_v0, %v484_v1 }
 0x365   : > { %v488_v2 = vsel %vm487_vm0, %v483_v0, %v484_v1  ;;  %v478_v4 = vpop.xlane.xlu1 %477 }
 0x366   : > { %v490_v3 = vshra.s32 %v488_v2, 16  ;;  %vm481_vm1 = vcmp.eq.f32.partialorder %v471_v60, %v478_v4  ;;  %vm482_vm2 = vcmp.eq.f32.partialorder %v472_v61, %v478_v4  ;;  %521 = vst.msk [vmem:[%s2339_s7 + $0x8] sm:$0xff] %vm519_vm13, %v478_v4  ;;  %v489_v11 = vand.u32 65535, %v488_v2 }
 0x367   : > { %v485_v6 = vsel %vm481_vm1, %v2325_v25, 256  ;;  %v486_v7 = vsel %vm482_vm2, %v2329_v26, 256 }
 0x368   : > { %v492_v5 = vcvt.s32.f32 %v490_v3  ;;  %vm503_vm3 = vcmp.lt.s32.totalorder %v485_v6, %v486_v7  ;;  %v491_v13 = vcvt.s32.f32 %v489_v11 }
 0x369   : > { %v504_v8 = vsel %vm503_vm3, %v485_v6, %v486_v7 }
 0x36a   : > { %493 = vmin.xlane.f32.xlu0 %v492_v5  ;;  %v506_v9 = vshra.s32 %v504_v8, 16  ;;  %v505_v15 = vand.u32 65535, %v504_v8 }
 0x36c   : > { %v508_v10 = vcvt.s32.f32 %v506_v9  ;;  %v507_v17 = vcvt.s32.f32 %v505_v15 }
 0x36e   : > { %509 = vmin.xlane.f32.xlu1 %v508_v10 }
 0x3f3   : > { %v494_v12 = vpop.xlane.xlu0 %493 }
 0x3f4   : > { %vm495_vm4 = vcmp.eq.f32.partialorder %v492_v5, %v494_v12  ;;  %v500_v23 = vcvt.f32.s32 %v494_v12 }
 0x3f5   : > { %v496_v14 = vsel %vm495_vm4, %v491_v13, inf }
 0x3f6   : > { %497 = vmin.xlane.f32.xlu0 %v496_v14  ;;  %v501_v28 = vshll.u32 %v500_v23, 16 }
 0x3f7   : > { %v510_v16 = vpop.xlane.xlu1 %509 }
 0x3f8   : > { %vm511_vm5 = vcmp.eq.f32.partialorder %v508_v10, %v510_v16  ;;  %v516_v31 = vcvt.f32.s32 %v510_v16 }
 0x3f9   : > { %v512_v20 = vsel %vm511_vm5, %v507_v17, inf }
 0x3fa   : > { %513 = vmin.xlane.f32.xlu1 %v512_v20  ;;  %v517_v36 = vshll.u32 %v516_v31, 16 }
 0x47f   : > { %v498_v24 = vpop.xlane.xlu0 %497 }
 0x480   : > { %v499_v29 = vcvt.f32.s32 %v498_v24 }
 0x482   : > { %v502_v32 = vadd.s32 %v501_v28, %v499_v29 }
 0x483   : > { %v514_v33 = vpop.xlane.xlu1 %513 }
 0x484   : > { %522 = vst.msk [vmem:[%s2359_s11] sm:$0xff] %vm519_vm13, %v502_v32  ;;  %vm524_vm6 = vcmp.eq.s32.totalorder %v2325_v25, %v502_v32  ;;  %vm525_vm7 = vcmp.eq.s32.totalorder %v2329_v26, %v502_v32  ;;  %v515_v37 = vcvt.f32.s32 %v514_v33 }
 0x485   : > { %v528_v34 = vsel %vm524_vm6, -inf, %v469_v54  ;;  %v529_v35 = vsel %vm525_vm7, -inf, %v470_v55  ;;  %vm637_vm7 = vcmask 31768  }
 0x486   : > { %v532_v38 = vmax.f32 %v528_v34, %v529_v35  ;;  %v518_v39 = vadd.s32 %v517_v36, %v515_v37 }
 0x488   : > { %533 = vmax.xlane.f32.xlu0 %v532_v38  ;;  %523 = vst.msk [vmem:[%s2359_s11 + $0x8] sm:$0xff] %vm519_vm13, %v518_v39  ;;  %vm526_vm8 = vcmp.eq.s32.totalorder %v2325_v25, %v518_v39  ;;  %vm527_vm9 = vcmp.eq.s32.totalorder %v2329_v26, %v518_v39 }
 0x489   : > { %v530_v40 = vsel %vm526_vm8, -inf, %v471_v60  ;;  %v531_v41 = vsel %vm527_vm9, -inf, %v472_v61 }
 0x48a   : > { %v535_v42 = vmax.f32 %v530_v40, %v531_v41 }
 0x48c   : > { %536 = vmax.xlane.f32.xlu1 %v535_v42 }
 0x511   : > { %v534_v43 = vpop.xlane.xlu0 %533 }
 0x512   : > { %vm538_vm11 = vcmp.eq.f32.partialorder %v528_v34, %v534_v43  ;;  %vm539_vm12 = vcmp.eq.f32.partialorder %v529_v35, %v534_v43  ;;  %579 = vst.msk [vmem:[%s2339_s7] sm:$0xff] %vm578_vm10, %v534_v43 }
 0x513   : > { %v542_v44 = vsel %vm538_vm11, %v2325_v25, 256  ;;  %v543_v45 = vsel %vm539_vm12, %v2329_v26, 256 }
 0x514   : > { %vm546_vm13 = vcmp.lt.s32.totalorder %v542_v44, %v543_v45 }
 0x515   : > { %v547_v46 = vsel %vm546_vm13, %v542_v44, %v543_v45  ;;  %v537_v48 = vpop.xlane.xlu1 %536 }
 0x516   : > { %v549_v47 = vshra.s32 %v547_v46, 16  ;;  %vm540_vm14 = vcmp.eq.f32.partialorder %v530_v40, %v537_v48  ;;  %vm541_vm15 = vcmp.eq.f32.partialorder %v531_v41, %v537_v48  ;;  %580 = vst.msk [vmem:[%s2339_s7 + $0x8] sm:$0xff] %vm578_vm10, %v537_v48  ;;  %v548_v55 = vand.u32 65535, %v547_v46 }
 0x517   : > { %v544_v50 = vsel %vm540_vm14, %v2325_v25, 256  ;;  %v545_v51 = vsel %vm541_vm15, %v2329_v26, 256 }
 0x518   : > { %v551_v49 = vcvt.s32.f32 %v549_v47  ;;  %vm562_vm0 = vcmp.lt.s32.totalorder %v544_v50, %v545_v51  ;;  %v550_v57 = vcvt.s32.f32 %v548_v55 }
 0x519   : > { %v563_v52 = vsel %vm562_vm0, %v544_v50, %v545_v51 }
 0x51a   : > { %552 = vmin.xlane.f32.xlu0 %v551_v49  ;;  %v565_v53 = vshra.s32 %v563_v52, 16  ;;  %v564_v59 = vand.u32 65535, %v563_v52 }
 0x51c   : > { %v567_v54 = vcvt.s32.f32 %v565_v53  ;;  %v566_v61 = vcvt.s32.f32 %v564_v59 }
 0x51e   : > { %568 = vmin.xlane.f32.xlu1 %v567_v54 }
 0x5a3   : > { %v553_v56 = vpop.xlane.xlu0 %552 }
 0x5a4   : > { %vm554_vm1 = vcmp.eq.f32.partialorder %v551_v49, %v553_v56  ;;  %v559_v63 = vcvt.f32.s32 %v553_v56 }
 0x5a5   : > { %v555_v58 = vsel %vm554_vm1, %v550_v57, inf }
 0x5a6   : > { %556 = vmin.xlane.f32.xlu0 %v555_v58  ;;  %v560_v1 = vshll.u32 %v559_v63, 16 }
 0x5a7   : > { %v569_v60 = vpop.xlane.xlu1 %568 }
 0x5a8   : > { %vm570_vm2 = vcmp.eq.f32.partialorder %v567_v54, %v569_v60  ;;  %v575_v3 = vcvt.f32.s32 %v569_v60 }
 0x5a9   : > { %v571_v62 = vsel %vm570_vm2, %v566_v61, inf }
 0x5aa   : > { %572 = vmin.xlane.f32.xlu1 %v571_v62  ;;  %v576_v8 = vshll.u32 %v575_v3, 16 }
 0x62f   : > { %v557_v0 = vpop.xlane.xlu0 %556 }
 0x630   : > { %v558_v2 = vcvt.f32.s32 %v557_v0 }
 0x632   : > { %v561_v4 = vadd.s32 %v560_v1, %v558_v2 }
 0x633   : > { %v573_v5 = vpop.xlane.xlu1 %572 }
 0x634   : > { %581 = vst.msk [vmem:[%s2359_s11] sm:$0xff] %vm578_vm10, %v561_v4  ;;  %vm583_vm3 = vcmp.eq.s32.totalorder %v2325_v25, %v561_v4  ;;  %vm584_vm4 = vcmp.eq.s32.totalorder %v2329_v26, %v561_v4  ;;  %v574_v9 = vcvt.f32.s32 %v573_v5 }
 0x635   : > { %v587_v6 = vsel %vm583_vm3, -inf, %v528_v34  ;;  %v588_v7 = vsel %vm584_vm4, -inf, %v529_v35  ;;  %vm696_vm4 = vcmask 39968  }
 0x636   : > { %v591_v10 = vmax.f32 %v587_v6, %v588_v7  ;;  %v577_v11 = vadd.s32 %v576_v8, %v574_v9 }
 0x638   : > { %592 = vmax.xlane.f32.xlu0 %v591_v10  ;;  %582 = vst.msk [vmem:[%s2359_s11 + $0x8] sm:$0xff] %vm578_vm10, %v577_v11  ;;  %vm585_vm5 = vcmp.eq.s32.totalorder %v2325_v25, %v577_v11  ;;  %vm586_vm6 = vcmp.eq.s32.totalorder %v2329_v26, %v577_v11 }
 0x639   : > { %v589_v12 = vsel %vm585_vm5, -inf, %v530_v40  ;;  %v590_v13 = vsel %vm586_vm6, -inf, %v531_v41 }
 0x63a   : > { %v594_v14 = vmax.f32 %v589_v12, %v590_v13 }
 0x63c   : > { %595 = vmax.xlane.f32.xlu1 %v594_v14 }
 0x6c1   : > { %v593_v15 = vpop.xlane.xlu0 %592 }
 0x6c2   : > { %vm597_vm8 = vcmp.eq.f32.partialorder %v587_v6, %v593_v15  ;;  %vm598_vm9 = vcmp.eq.f32.partialorder %v588_v7, %v593_v15  ;;  %638 = vst.msk [vmem:[%s2339_s7] sm:$0xff] %vm637_vm7, %v593_v15 }
 0x6c3   : > { %v601_v16 = vsel %vm597_vm8, %v2325_v25, 256  ;;  %v602_v17 = vsel %vm598_vm9, %v2329_v26, 256 }
 0x6c4   : > { %vm605_vm10 = vcmp.lt.s32.totalorder %v601_v16, %v602_v17 }
 0x6c5   : > { %v606_v20 = vsel %vm605_vm10, %v601_v16, %v602_v17  ;;  %v596_v24 = vpop.xlane.xlu1 %595 }
 0x6c6   : > { %v608_v23 = vshra.s32 %v606_v20, 16  ;;  %vm599_vm11 = vcmp.eq.f32.partialorder %v589_v12, %v596_v24  ;;  %vm600_vm12 = vcmp.eq.f32.partialorder %v590_v13, %v596_v24  ;;  %639 = vst.msk [vmem:[%s2339_s7 + $0x8] sm:$0xff] %vm637_vm7, %v596_v24  ;;  %v607_v35 = vand.u32 65535, %v606_v20 }
 0x6c7   : > { %v603_v29 = vsel %vm599_vm11, %v2325_v25, 256  ;;  %v604_v31 = vsel %vm600_vm12, %v2329_v26, 256 }
 0x6c8   : > { %v610_v28 = vcvt.s32.f32 %v608_v23  ;;  %vm621_vm13 = vcmp.lt.s32.totalorder %v603_v29, %v604_v31  ;;  %v609_v37 = vcvt.s32.f32 %v607_v35 }
 0x6c9   : > { %v622_v32 = vsel %vm621_vm13, %v603_v29, %v604_v31 }
 0x6ca   : > { %611 = vmin.xlane.f32.xlu0 %v610_v28  ;;  %v624_v33 = vshra.s32 %v622_v32, 16  ;;  %v623_v39 = vand.u32 65535, %v622_v32 }
 0x6cc   : > { %v626_v34 = vcvt.s32.f32 %v624_v33  ;;  %v625_v41 = vcvt.s32.f32 %v623_v39 }
 0x6ce   : > { %627 = vmin.xlane.f32.xlu1 %v626_v34 }
 0x753   : > { %v612_v36 = vpop.xlane.xlu0 %611 }
 0x754   : > { %vm613_vm14 = vcmp.eq.f32.partialorder %v610_v28, %v612_v36  ;;  %v618_v43 = vcvt.f32.s32 %v612_v36 }
 0x755   : > { %v614_v38 = vsel %vm613_vm14, %v609_v37, inf }
 0x756   : > { %615 = vmin.xlane.f32.xlu0 %v614_v38  ;;  %v619_v45 = vshll.u32 %v618_v43, 16 }
 0x757   : > { %v628_v40 = vpop.xlane.xlu1 %627 }
 0x758   : > { %vm629_vm15 = vcmp.eq.f32.partialorder %v626_v34, %v628_v40  ;;  %v634_v47 = vcvt.f32.s32 %v628_v40 }
 0x759   : > { %v630_v42 = vsel %vm629_vm15, %v625_v41, inf }
 0x75a   : > { %631 = vmin.xlane.f32.xlu1 %v630_v42  ;;  %v635_v52 = vshll.u32 %v634_v47, 16 }
 0x7df   : > { %v616_v44 = vpop.xlane.xlu0 %615 }
 0x7e0   : > { %v617_v46 = vcvt.f32.s32 %v616_v44 }
 0x7e2   : > { %v620_v48 = vadd.s32 %v619_v45, %v617_v46 }
 0x7e3   : > { %v632_v49 = vpop.xlane.xlu1 %631 }
 0x7e4   : > { %640 = vst.msk [vmem:[%s2359_s11] sm:$0xff] %vm637_vm7, %v620_v48  ;;  %vm642_vm0 = vcmp.eq.s32.totalorder %v2325_v25, %v620_v48  ;;  %vm643_vm1 = vcmp.eq.s32.totalorder %v2329_v26, %v620_v48  ;;  %v633_v53 = vcvt.f32.s32 %v632_v49 }
 0x7e5   : > { %v646_v50 = vsel %vm642_vm0, -inf, %v587_v6  ;;  %v647_v51 = vsel %vm643_vm1, -inf, %v588_v7  ;;  %vm755_vm1 = vcmask 48168  }
 0x7e6   : > { %v650_v54 = vmax.f32 %v646_v50, %v647_v51  ;;  %v636_v55 = vadd.s32 %v635_v52, %v633_v53 }
 0x7e8   : > { %651 = vmax.xlane.f32.xlu0 %v650_v54  ;;  %641 = vst.msk [vmem:[%s2359_s11 + $0x8] sm:$0xff] %vm637_vm7, %v636_v55  ;;  %vm644_vm2 = vcmp.eq.s32.totalorder %v2325_v25, %v636_v55  ;;  %vm645_vm3 = vcmp.eq.s32.totalorder %v2329_v26, %v636_v55 }
 0x7e9   : > { %v648_v56 = vsel %vm644_vm2, -inf, %v589_v12  ;;  %v649_v57 = vsel %vm645_vm3, -inf, %v590_v13 }
 0x7ea   : > { %v653_v58 = vmax.f32 %v648_v56, %v649_v57 }
 0x7ec   : > { %654 = vmax.xlane.f32.xlu1 %v653_v58 }
 0x871   : > { %v652_v59 = vpop.xlane.xlu0 %651 }
 0x872   : > { %vm656_vm5 = vcmp.eq.f32.partialorder %v646_v50, %v652_v59  ;;  %vm657_vm6 = vcmp.eq.f32.partialorder %v647_v51, %v652_v59  ;;  %697 = vst.msk [vmem:[%s2339_s7] sm:$0xff] %vm696_vm4, %v652_v59 }
 0x873   : > { %v660_v60 = vsel %vm656_vm5, %v2325_v25, 256  ;;  %v661_v61 = vsel %vm657_vm6, %v2329_v26, 256 }
 0x874   : > { %vm664_vm7 = vcmp.lt.s32.totalorder %v660_v60, %v661_v61 }
 0x875   : > { %v665_v62 = vsel %vm664_vm7, %v660_v60, %v661_v61  ;;  %v655_v0 = vpop.xlane.xlu1 %654 }
 0x876   : > { %v667_v63 = vshra.s32 %v665_v62, 16  ;;  %vm658_vm8 = vcmp.eq.f32.partialorder %v648_v56, %v655_v0  ;;  %vm659_vm9 = vcmp.eq.f32.partialorder %v649_v57, %v655_v0  ;;  %698 = vst.msk [vmem:[%s2339_s7 + $0x8] sm:$0xff] %vm696_vm4, %v655_v0  ;;  %v666_v7 = vand.u32 65535, %v665_v62 }
 0x877   : > { %v662_v2 = vsel %vm658_vm8, %v2325_v25, 256  ;;  %v663_v3 = vsel %vm659_vm9, %v2329_v26, 256 }
 0x878   : > { %v669_v1 = vcvt.s32.f32 %v667_v63  ;;  %vm680_vm10 = vcmp.lt.s32.totalorder %v662_v2, %v663_v3  ;;  %v668_v9 = vcvt.s32.f32 %v666_v7 }
 0x879   : > { %v681_v4 = vsel %vm680_vm10, %v662_v2, %v663_v3 }
 0x87a   : > { %670 = vmin.xlane.f32.xlu0 %v669_v1  ;;  %v683_v5 = vshra.s32 %v681_v4, 16  ;;  %v682_v11 = vand.u32 65535, %v681_v4 }
 0x87c   : > { %v685_v6 = vcvt.s32.f32 %v683_v5  ;;  %v684_v13 = vcvt.s32.f32 %v682_v11 }
 0x87e   : > { %686 = vmin.xlane.f32.xlu1 %v685_v6 }
 0x903   : > { %v671_v8 = vpop.xlane.xlu0 %670 }
 0x904   : > { %vm672_vm11 = vcmp.eq.f32.partialorder %v669_v1, %v671_v8  ;;  %v677_v15 = vcvt.f32.s32 %v671_v8 }
 0x905   : > { %v673_v10 = vsel %vm672_vm11, %v668_v9, inf }
 0x906   : > { %674 = vmin.xlane.f32.xlu0 %v673_v10  ;;  %v678_v17 = vshll.u32 %v677_v15, 16 }
 0x907   : > { %v687_v12 = vpop.xlane.xlu1 %686 }
 0x908   : > { %vm688_vm12 = vcmp.eq.f32.partialorder %v685_v6, %v687_v12  ;;  %v693_v23 = vcvt.f32.s32 %v687_v12 }
 0x909   : > { %v689_v14 = vsel %vm688_vm12, %v684_v13, inf }
 0x90a   : > { %690 = vmin.xlane.f32.xlu1 %v689_v14  ;;  %v694_v32 = vshll.u32 %v693_v23, 16 }
 0x98f   : > { %v675_v16 = vpop.xlane.xlu0 %674 }
 0x990   : > { %v676_v20 = vcvt.f32.s32 %v675_v16 }
 0x992   : > { %v679_v24 = vadd.s32 %v678_v17, %v676_v20 }
 0x993   : > { %v691_v28 = vpop.xlane.xlu1 %690 }
 0x994   : > { %699 = vst.msk [vmem:[%s2359_s11] sm:$0xff] %vm696_vm4, %v679_v24  ;;  %vm701_vm13 = vcmp.eq.s32.totalorder %v2325_v25, %v679_v24  ;;  %vm702_vm14 = vcmp.eq.s32.totalorder %v2329_v26, %v679_v24  ;;  %v692_v33 = vcvt.f32.s32 %v691_v28 }
 0x995   : > { %v705_v29 = vsel %vm701_vm13, -inf, %v646_v50  ;;  %v706_v31 = vsel %vm702_vm14, -inf, %v647_v51  ;;  %vm814_vm14 = vcmask 56368  }
 0x996   : > { %v709_v34 = vmax.f32 %v705_v29, %v706_v31  ;;  %v695_v35 = vadd.s32 %v694_v32, %v692_v33 }
 0x998   : > { %710 = vmax.xlane.f32.xlu0 %v709_v34  ;;  %700 = vst.msk [vmem:[%s2359_s11 + $0x8] sm:$0xff] %vm696_vm4, %v695_v35  ;;  %vm703_vm15 = vcmp.eq.s32.totalorder %v2325_v25, %v695_v35  ;;  %vm704_vm0 = vcmp.eq.s32.totalorder %v2329_v26, %v695_v35 }
 0x999   : > { %v707_v36 = vsel %vm703_vm15, -inf, %v648_v56  ;;  %v708_v37 = vsel %vm704_vm0, -inf, %v649_v57 }
 0x99a   : > { %v712_v38 = vmax.f32 %v707_v36, %v708_v37 }
 0x99c   : > { %713 = vmax.xlane.f32.xlu1 %v712_v38 }
 0xa21   : > { %v711_v39 = vpop.xlane.xlu0 %710 }
 0xa22   : > { %vm715_vm2 = vcmp.eq.f32.partialorder %v705_v29, %v711_v39  ;;  %vm716_vm3 = vcmp.eq.f32.partialorder %v706_v31, %v711_v39  ;;  %756 = vst.msk [vmem:[%s2339_s7] sm:$0xff] %vm755_vm1, %v711_v39 }
 0xa23   : > { %v719_v40 = vsel %vm715_vm2, %v2325_v25, 256  ;;  %v720_v41 = vsel %vm716_vm3, %v2329_v26, 256 }
 0xa24   : > { %vm723_vm4 = vcmp.lt.s32.totalorder %v719_v40, %v720_v41 }
 0xa25   : > { %v724_v42 = vsel %vm723_vm4, %v719_v40, %v720_v41  ;;  %v714_v44 = vpop.xlane.xlu1 %713 }
 0xa26   : > { %v726_v43 = vshra.s32 %v724_v42, 16  ;;  %vm717_vm5 = vcmp.eq.f32.partialorder %v707_v36, %v714_v44  ;;  %vm718_vm6 = vcmp.eq.f32.partialorder %v708_v37, %v714_v44  ;;  %757 = vst.msk [vmem:[%s2339_s7 + $0x8] sm:$0xff] %vm755_vm1, %v714_v44  ;;  %v725_v51 = vand.u32 65535, %v724_v42 }
 0xa27   : > { %v721_v46 = vsel %vm717_vm5, %v2325_v25, 256  ;;  %v722_v47 = vsel %vm718_vm6, %v2329_v26, 256 }
 0xa28   : > { %v728_v45 = vcvt.s32.f32 %v726_v43  ;;  %vm739_vm7 = vcmp.lt.s32.totalorder %v721_v46, %v722_v47  ;;  %v727_v53 = vcvt.s32.f32 %v725_v51 }
 0xa29   : > { %v740_v48 = vsel %vm739_vm7, %v721_v46, %v722_v47 }
 0xa2a   : > { %729 = vmin.xlane.f32.xlu0 %v728_v45  ;;  %v742_v49 = vshra.s32 %v740_v48, 16  ;;  %v741_v55 = vand.u32 65535, %v740_v48 }
 0xa2c   : > { %v744_v50 = vcvt.s32.f32 %v742_v49  ;;  %v743_v57 = vcvt.s32.f32 %v741_v55 }
 0xa2e   : > { %745 = vmin.xlane.f32.xlu1 %v744_v50 }
 0xab3   : > { %v730_v52 = vpop.xlane.xlu0 %729 }
 0xab4   : > { %vm731_vm8 = vcmp.eq.f32.partialorder %v728_v45, %v730_v52  ;;  %v736_v59 = vcvt.f32.s32 %v730_v52 }
 0xab5   : > { %v732_v54 = vsel %vm731_vm8, %v727_v53, inf }
 0xab6   : > { %733 = vmin.xlane.f32.xlu0 %v732_v54  ;;  %v737_v61 = vshll.u32 %v736_v59, 16 }
 0xab7   : > { %v746_v56 = vpop.xlane.xlu1 %745 }
 0xab8   : > { %vm747_vm9 = vcmp.eq.f32.partialorder %v744_v50, %v746_v56  ;;  %v752_v63 = vcvt.f32.s32 %v746_v56 }
 0xab9   : > { %v748_v58 = vsel %vm747_vm9, %v743_v57, inf }
 0xaba   : > { %749 = vmin.xlane.f32.xlu1 %v748_v58  ;;  %v753_v4 = vshll.u32 %v752_v63, 16 }
 0xb3f   : > { %v734_v60 = vpop.xlane.xlu0 %733 }
 0xb40   : > { %v735_v62 = vcvt.f32.s32 %v734_v60 }
 0xb42   : > { %v738_v0 = vadd.s32 %v737_v61, %v735_v62 }
 0xb43   : > { %v750_v1 = vpop.xlane.xlu1 %749 }
 0xb44   : > { %758 = vst.msk [vmem:[%s2359_s11] sm:$0xff] %vm755_vm1, %v738_v0  ;;  %vm760_vm10 = vcmp.eq.s32.totalorder %v2325_v25, %v738_v0  ;;  %vm761_vm11 = vcmp.eq.s32.totalorder %v2329_v26, %v738_v0  ;;  %v751_v5 = vcvt.f32.s32 %v750_v1 }
 0xb45   : > { %v764_v2 = vsel %vm760_vm10, -inf, %v705_v29  ;;  %v765_v3 = vsel %vm761_vm11, -inf, %v706_v31  ;;  %vm873_vm11 = vcmask 64568  }
 0xb46   : > { %v768_v6 = vmax.f32 %v764_v2, %v765_v3  ;;  %v754_v7 = vadd.s32 %v753_v4, %v751_v5 }
 0xb48   : > { %769 = vmax.xlane.f32.xlu0 %v768_v6  ;;  %759 = vst.msk [vmem:[%s2359_s11 + $0x8] sm:$0xff] %vm755_vm1, %v754_v7  ;;  %vm762_vm12 = vcmp.eq.s32.totalorder %v2325_v25, %v754_v7  ;;  %vm763_vm13 = vcmp.eq.s32.totalorder %v2329_v26, %v754_v7 }
 0xb49   : > { %v766_v8 = vsel %vm762_vm12, -inf, %v707_v36  ;;  %v767_v9 = vsel %vm763_vm13, -inf, %v708_v37 }
 0xb4a   : > { %v771_v10 = vmax.f32 %v766_v8, %v767_v9 }
 0xb4c   : > { %772 = vmax.xlane.f32.xlu1 %v771_v10 }
 0xbd1   : > { %v770_v11 = vpop.xlane.xlu0 %769 }
 0xbd2   : > { %vm774_vm15 = vcmp.eq.f32.partialorder %v764_v2, %v770_v11  ;;  %vm775_vm0 = vcmp.eq.f32.partialorder %v765_v3, %v770_v11  ;;  %815 = vst.msk [vmem:[%s2339_s7] sm:$0xff] %vm814_vm14, %v770_v11 }
 0xbd3   : > { %v778_v12 = vsel %vm774_vm15, %v2325_v25, 256  ;;  %v779_v13 = vsel %vm775_vm0, %v2329_v26, 256 }
 0xbd4   : > { %vm782_vm1 = vcmp.lt.s32.totalorder %v778_v12, %v779_v13 }
 0xbd5   : > { %v783_v14 = vsel %vm782_vm1, %v778_v12, %v779_v13  ;;  %v773_v16 = vpop.xlane.xlu1 %772 }
 0xbd6   : > { %v785_v15 = vshra.s32 %v783_v14, 16  ;;  %vm776_vm2 = vcmp.eq.f32.partialorder %v766_v8, %v773_v16  ;;  %vm777_vm3 = vcmp.eq.f32.partialorder %v767_v9, %v773_v16  ;;  %816 = vst.msk [vmem:[%s2339_s7 + $0x8] sm:$0xff] %vm814_vm14, %v773_v16  ;;  %v784_v31 = vand.u32 65535, %v783_v14 }
 0xbd7   : > { %v780_v20 = vsel %vm776_vm2, %v2325_v25, 256  ;;  %v781_v23 = vsel %vm777_vm3, %v2329_v26, 256 }
 0xbd8   : > { %v787_v17 = vcvt.s32.f32 %v785_v15  ;;  %vm798_vm4 = vcmp.lt.s32.totalorder %v780_v20, %v781_v23  ;;  %v786_v33 = vcvt.s32.f32 %v784_v31 }
 0xbd9   : > { %v799_v24 = vsel %vm798_vm4, %v780_v20, %v781_v23 }
 0xbda   : > { %788 = vmin.xlane.f32.xlu0 %v787_v17  ;;  %v801_v28 = vshra.s32 %v799_v24, 16  ;;  %v800_v35 = vand.u32 65535, %v799_v24 }
 0xbdc   : > { %v803_v29 = vcvt.s32.f32 %v801_v28  ;;  %v802_v37 = vcvt.s32.f32 %v800_v35 }
 0xbde   : > { %804 = vmin.xlane.f32.xlu1 %v803_v29 }
 0xc63   : > { %v789_v32 = vpop.xlane.xlu0 %788 }
 0xc64   : > { %vm790_vm5 = vcmp.eq.f32.partialorder %v787_v17, %v789_v32  ;;  %v795_v39 = vcvt.f32.s32 %v789_v32 }
 0xc65   : > { %v791_v34 = vsel %vm790_vm5, %v786_v33, inf }
 0xc66   : > { %792 = vmin.xlane.f32.xlu0 %v791_v34  ;;  %v796_v41 = vshll.u32 %v795_v39, 16 }
 0xc67   : > { %v805_v36 = vpop.xlane.xlu1 %804 }
 0xc68   : > { %vm806_vm6 = vcmp.eq.f32.partialorder %v803_v29, %v805_v36  ;;  %v811_v43 = vcvt.f32.s32 %v805_v36 }
 0xc69   : > { %v807_v38 = vsel %vm806_vm6, %v802_v37, inf }
 0xc6a   : > { %808 = vmin.xlane.f32.xlu1 %v807_v38  ;;  %v812_v48 = vshll.u32 %v811_v43, 16 }
 0xcef   : > { %v793_v40 = vpop.xlane.xlu0 %792 }
 0xcf0   : > { %v794_v42 = vcvt.f32.s32 %v793_v40 }
 0xcf2   : > { %v797_v44 = vadd.s32 %v796_v41, %v794_v42 }
 0xcf3   : > { %v809_v45 = vpop.xlane.xlu1 %808 }
 0xcf4   : > { %817 = vst.msk [vmem:[%s2359_s11] sm:$0xff] %vm814_vm14, %v797_v44  ;;  %vm819_vm7 = vcmp.eq.s32.totalorder %v2325_v25, %v797_v44  ;;  %vm820_vm8 = vcmp.eq.s32.totalorder %v2329_v26, %v797_v44  ;;  %v810_v49 = vcvt.f32.s32 %v809_v45 }
 0xcf5   : > { %v823_v46 = vsel %vm819_vm7, -inf, %v764_v2  ;;  %v824_v47 = vsel %vm820_vm8, -inf, %v765_v3  ;;  %vm932_vm8 = vcmask 72768  }
 0xcf6   : > { %v827_v50 = vmax.f32 %v823_v46, %v824_v47  ;;  %v813_v51 = vadd.s32 %v812_v48, %v810_v49 }
 0xcf8   : > { %828 = vmax.xlane.f32.xlu0 %v827_v50  ;;  %818 = vst.msk [vmem:[%s2359_s11 + $0x8] sm:$0xff] %vm814_vm14, %v813_v51  ;;  %vm821_vm9 = vcmp.eq.s32.totalorder %v2325_v25, %v813_v51  ;;  %vm822_vm10 = vcmp.eq.s32.totalorder %v2329_v26, %v813_v51 }
 0xcf9   : > { %v825_v52 = vsel %vm821_vm9, -inf, %v766_v8  ;;  %v826_v53 = vsel %vm822_vm10, -inf, %v767_v9 }
 0xcfa   : > { %v830_v54 = vmax.f32 %v825_v52, %v826_v53 }
 0xcfc   : > { %831 = vmax.xlane.f32.xlu1 %v830_v54 }
 0xd81   : > { %v829_v55 = vpop.xlane.xlu0 %828 }
 0xd82   : > { %vm833_vm12 = vcmp.eq.f32.partialorder %v823_v46, %v829_v55  ;;  %vm834_vm13 = vcmp.eq.f32.partialorder %v824_v47, %v829_v55  ;;  %874 = vst.msk [vmem:[%s2339_s7] sm:$0xff] %vm873_vm11, %v829_v55 }
 0xd83   : > { %v837_v56 = vsel %vm833_vm12, %v2325_v25, 256  ;;  %v838_v57 = vsel %vm834_vm13, %v2329_v26, 256 }
 0xd84   : > { %vm841_vm14 = vcmp.lt.s32.totalorder %v837_v56, %v838_v57 }
 0xd85   : > { %v842_v58 = vsel %vm841_vm14, %v837_v56, %v838_v57  ;;  %v832_v60 = vpop.xlane.xlu1 %831 }
 0xd86   : > { %v844_v59 = vshra.s32 %v842_v58, 16  ;;  %vm835_vm15 = vcmp.eq.f32.partialorder %v825_v52, %v832_v60  ;;  %vm836_vm0 = vcmp.eq.f32.partialorder %v826_v53, %v832_v60  ;;  %875 = vst.msk [vmem:[%s2339_s7 + $0x8] sm:$0xff] %vm873_vm11, %v832_v60  ;;  %v843_v3 = vand.u32 65535, %v842_v58 }
 0xd87   : > { %v839_v62 = vsel %vm835_vm15, %v2325_v25, 256  ;;  %v840_v63 = vsel %vm836_vm0, %v2329_v26, 256 }
 0xd88   : > { %v846_v61 = vcvt.s32.f32 %v844_v59  ;;  %vm857_vm1 = vcmp.lt.s32.totalorder %v839_v62, %v840_v63  ;;  %v845_v5 = vcvt.s32.f32 %v843_v3 }
 0xd89   : > { %v858_v0 = vsel %vm857_vm1, %v839_v62, %v840_v63 }
 0xd8a   : > { %847 = vmin.xlane.f32.xlu0 %v846_v61  ;;  %v860_v1 = vshra.s32 %v858_v0, 16  ;;  %v859_v7 = vand.u32 65535, %v858_v0 }
 0xd8c   : > { %v862_v2 = vcvt.s32.f32 %v860_v1  ;;  %v861_v9 = vcvt.s32.f32 %v859_v7 }
 0xd8e   : > { %863 = vmin.xlane.f32.xlu1 %v862_v2 }
 0xe13   : > { %v848_v4 = vpop.xlane.xlu0 %847 }
 0xe14   : > { %vm849_vm2 = vcmp.eq.f32.partialorder %v846_v61, %v848_v4  ;;  %v854_v11 = vcvt.f32.s32 %v848_v4 }
 0xe15   : > { %v850_v6 = vsel %vm849_vm2, %v845_v5, inf }
 0xe16   : > { %851 = vmin.xlane.f32.xlu0 %v850_v6  ;;  %v855_v13 = vshll.u32 %v854_v11, 16 }
 0xe17   : > { %v864_v8 = vpop.xlane.xlu1 %863 }
 0xe18   : > { %vm865_vm3 = vcmp.eq.f32.partialorder %v862_v2, %v864_v8  ;;  %v870_v15 = vcvt.f32.s32 %v864_v8 }
 0xe19   : > { %v866_v10 = vsel %vm865_vm3, %v861_v9, inf }
 0xe1a   : > { %867 = vmin.xlane.f32.xlu1 %v866_v10  ;;  %v871_v24 = vshll.u32 %v870_v15, 16 }
 0xe9f   : > { %v852_v12 = vpop.xlane.xlu0 %851 }
 0xea0   : > { %v853_v14 = vcvt.f32.s32 %v852_v12 }
 0xea2   : > { %v856_v16 = vadd.s32 %v855_v13, %v853_v14 }
 0xea3   : > { %v868_v17 = vpop.xlane.xlu1 %867 }
 0xea4   : > { %876 = vst.msk [vmem:[%s2359_s11] sm:$0xff] %vm873_vm11, %v856_v16  ;;  %vm878_vm4 = vcmp.eq.s32.totalorder %v2325_v25, %v856_v16  ;;  %vm879_vm5 = vcmp.eq.s32.totalorder %v2329_v26, %v856_v16  ;;  %v869_v28 = vcvt.f32.s32 %v868_v17 }
 0xea5   : > { %v882_v20 = vsel %vm878_vm4, -inf, %v823_v46  ;;  %v883_v23 = vsel %vm879_vm5, -inf, %v824_v47  ;;  %vm991_vm5 = vcmask 80968  }
 0xea6   : > { %v886_v29 = vmax.f32 %v882_v20, %v883_v23  ;;  %v872_v31 = vadd.s32 %v871_v24, %v869_v28 }
 0xea8   : > { %887 = vmax.xlane.f32.xlu0 %v886_v29  ;;  %877 = vst.msk [vmem:[%s2359_s11 + $0x8] sm:$0xff] %vm873_vm11, %v872_v31  ;;  %vm880_vm6 = vcmp.eq.s32.totalorder %v2325_v25, %v872_v31  ;;  %vm881_vm7 = vcmp.eq.s32.totalorder %v2329_v26, %v872_v31 }
 0xea9   : > { %v884_v32 = vsel %vm880_vm6, -inf, %v825_v52  ;;  %v885_v33 = vsel %vm881_vm7, -inf, %v826_v53 }
 0xeaa   : > { %v889_v34 = vmax.f32 %v884_v32, %v885_v33 }
 0xeac   : > { %890 = vmax.xlane.f32.xlu1 %v889_v34 }
 0xf31   : > { %v888_v35 = vpop.xlane.xlu0 %887 }
 0xf32   : > { %vm892_vm9 = vcmp.eq.f32.partialorder %v882_v20, %v888_v35  ;;  %vm893_vm10 = vcmp.eq.f32.partialorder %v883_v23, %v888_v35  ;;  %933 = vst.msk [vmem:[%s2339_s7] sm:$0xff] %vm932_vm8, %v888_v35 }
 0xf33   : > { %v896_v36 = vsel %vm892_vm9, %v2325_v25, 256  ;;  %v897_v37 = vsel %vm893_vm10, %v2329_v26, 256 }
 0xf34   : > { %vm900_vm11 = vcmp.lt.s32.totalorder %v896_v36, %v897_v37 }
 0xf35   : > { %v901_v38 = vsel %vm900_vm11, %v896_v36, %v897_v37  ;;  %v891_v40 = vpop.xlane.xlu1 %890 }
 0xf36   : > { %v903_v39 = vshra.s32 %v901_v38, 16  ;;  %vm894_vm12 = vcmp.eq.f32.partialorder %v884_v32, %v891_v40  ;;  %vm895_vm13 = vcmp.eq.f32.partialorder %v885_v33, %v891_v40  ;;  %934 = vst.msk [vmem:[%s2339_s7 + $0x8] sm:$0xff] %vm932_vm8, %v891_v40  ;;  %v902_v47 = vand.u32 65535, %v901_v38 }
 0xf37   : > { %v898_v42 = vsel %vm894_vm12, %v2325_v25, 256  ;;  %v899_v43 = vsel %vm895_vm13, %v2329_v26, 256 }
 0xf38   : > { %v905_v41 = vcvt.s32.f32 %v903_v39  ;;  %vm916_vm14 = vcmp.lt.s32.totalorder %v898_v42, %v899_v43  ;;  %v904_v49 = vcvt.s32.f32 %v902_v47 }
 0xf39   : > { %v917_v44 = vsel %vm916_vm14, %v898_v42, %v899_v43 }
 0xf3a   : > { %906 = vmin.xlane.f32.xlu0 %v905_v41  ;;  %v919_v45 = vshra.s32 %v917_v44, 16  ;;  %v918_v51 = vand.u32 65535, %v917_v44 }
 0xf3c   : > { %v921_v46 = vcvt.s32.f32 %v919_v45  ;;  %v920_v53 = vcvt.s32.f32 %v918_v51 }
 0xf3e   : > { %922 = vmin.xlane.f32.xlu1 %v921_v46 }
 0xfc3   : > { %v907_v48 = vpop.xlane.xlu0 %906 }
 0xfc4   : > { %vm908_vm15 = vcmp.eq.f32.partialorder %v905_v41, %v907_v48  ;;  %v913_v55 = vcvt.f32.s32 %v907_v48 }
 0xfc5   : > { %v909_v50 = vsel %vm908_vm15, %v904_v49, inf }
 0xfc6   : > { %910 = vmin.xlane.f32.xlu0 %v909_v50  ;;  %v914_v57 = vshll.u32 %v913_v55, 16 }
 0xfc7   : > { %v923_v52 = vpop.xlane.xlu1 %922 }
 0xfc8   : > { %vm924_vm0 = vcmp.eq.f32.partialorder %v921_v46, %v923_v52  ;;  %v929_v59 = vcvt.f32.s32 %v923_v52 }
 0xfc9   : > { %v925_v54 = vsel %vm924_vm0, %v920_v53, inf }
 0xfca   : > { %926 = vmin.xlane.f32.xlu1 %v925_v54  ;;  %v930_v0 = vshll.u32 %v929_v59, 16 }
0x104f   : > { %v911_v56 = vpop.xlane.xlu0 %910 }
0x1050   : > { %v912_v58 = vcvt.f32.s32 %v911_v56 }
0x1052   : > { %v915_v60 = vadd.s32 %v914_v57, %v912_v58 }
0x1053   : > { %v927_v61 = vpop.xlane.xlu1 %926 }
0x1054   : > { %935 = vst.msk [vmem:[%s2359_s11] sm:$0xff] %vm932_vm8, %v915_v60  ;;  %vm937_vm1 = vcmp.eq.s32.totalorder %v2325_v25, %v915_v60  ;;  %vm938_vm2 = vcmp.eq.s32.totalorder %v2329_v26, %v915_v60  ;;  %v928_v1 = vcvt.f32.s32 %v927_v61 }
0x1055   : > { %v941_v62 = vsel %vm937_vm1, -inf, %v882_v20  ;;  %v942_v63 = vsel %vm938_vm2, -inf, %v883_v23  ;;  %vm1050_vm2 = vcmask 89168  }
0x1056   : > { %v945_v2 = vmax.f32 %v941_v62, %v942_v63  ;;  %v931_v3 = vadd.s32 %v930_v0, %v928_v1 }
0x1058   : > { %946 = vmax.xlane.f32.xlu0 %v945_v2  ;;  %936 = vst.msk [vmem:[%s2359_s11 + $0x8] sm:$0xff] %vm932_vm8, %v931_v3  ;;  %vm939_vm3 = vcmp.eq.s32.totalorder %v2325_v25, %v931_v3  ;;  %vm940_vm4 = vcmp.eq.s32.totalorder %v2329_v26, %v931_v3 }
0x1059   : > { %v943_v4 = vsel %vm939_vm3, -inf, %v884_v32  ;;  %v944_v5 = vsel %vm940_vm4, -inf, %v885_v33 }
0x105a   : > { %v948_v6 = vmax.f32 %v943_v4, %v944_v5 }
0x105c   : > { %949 = vmax.xlane.f32.xlu1 %v948_v6 }
0x10e1   : > { %v947_v7 = vpop.xlane.xlu0 %946 }
0x10e2   : > { %vm951_vm6 = vcmp.eq.f32.partialorder %v941_v62, %v947_v7  ;;  %vm952_vm7 = vcmp.eq.f32.partialorder %v942_v63, %v947_v7  ;;  %992 = vst.msk [vmem:[%s2339_s7] sm:$0xff] %vm991_vm5, %v947_v7 }
0x10e3   : > { %v955_v8 = vsel %vm951_vm6, %v2325_v25, 256  ;;  %v956_v9 = vsel %vm952_vm7, %v2329_v26, 256 }
0x10e4   : > { %vm959_vm8 = vcmp.lt.s32.totalorder %v955_v8, %v956_v9 }
0x10e5   : > { %v960_v10 = vsel %vm959_vm8, %v955_v8, %v956_v9  ;;  %v950_v12 = vpop.xlane.xlu1 %949 }
0x10e6   : > { %v962_v11 = vshra.s32 %v960_v10, 16  ;;  %vm953_vm9 = vcmp.eq.f32.partialorder %v943_v4, %v950_v12  ;;  %vm954_vm10 = vcmp.eq.f32.partialorder %v944_v5, %v950_v12  ;;  %993 = vst.msk [vmem:[%s2339_s7 + $0x8] sm:$0xff] %vm991_vm5, %v950_v12  ;;  %v961_v23 = vand.u32 65535, %v960_v10 }
0x10e7   : > { %v957_v14 = vsel %vm953_vm9, %v2325_v25, 256  ;;  %v958_v15 = vsel %vm954_vm10, %v2329_v26, 256 }
0x10e8   : > { %v964_v13 = vcvt.s32.f32 %v962_v11  ;;  %vm975_vm11 = vcmp.lt.s32.totalorder %v957_v14, %v958_v15  ;;  %v963_v28 = vcvt.s32.f32 %v961_v23 }
0x10e9   : > { %v976_v16 = vsel %vm975_vm11, %v957_v14, %v958_v15 }
0x10ea   : > { %965 = vmin.xlane.f32.xlu0 %v964_v13  ;;  %v978_v17 = vshra.s32 %v976_v16, 16  ;;  %v977_v31 = vand.u32 65535, %v976_v16 }
0x10ec   : > { %v980_v20 = vcvt.s32.f32 %v978_v17  ;;  %v979_v33 = vcvt.s32.f32 %v977_v31 }
0x10ee   : > { %981 = vmin.xlane.f32.xlu1 %v980_v20 }
0x1173   : > { %v966_v24 = vpop.xlane.xlu0 %965 }
0x1174   : > { %vm967_vm12 = vcmp.eq.f32.partialorder %v964_v13, %v966_v24  ;;  %v972_v35 = vcvt.f32.s32 %v966_v24 }
0x1175   : > { %v968_v29 = vsel %vm967_vm12, %v963_v28, inf }
0x1176   : > { %969 = vmin.xlane.f32.xlu0 %v968_v29  ;;  %v973_v37 = vshll.u32 %v972_v35, 16 }
0x1177   : > { %v982_v32 = vpop.xlane.xlu1 %981 }
0x1178   : > { %vm983_vm13 = vcmp.eq.f32.partialorder %v980_v20, %v982_v32  ;;  %v988_v39 = vcvt.f32.s32 %v982_v32 }
0x1179   : > { %v984_v34 = vsel %vm983_vm13, %v979_v33, inf }
0x117a   : > { %985 = vmin.xlane.f32.xlu1 %v984_v34  ;;  %v989_v44 = vshll.u32 %v988_v39, 16 }
0x11ff   : > { %v970_v36 = vpop.xlane.xlu0 %969 }
0x1200   : > { %v971_v38 = vcvt.f32.s32 %v970_v36 }
0x1202   : > { %v974_v40 = vadd.s32 %v973_v37, %v971_v38 }
0x1203   : > { %v986_v41 = vpop.xlane.xlu1 %985 }
0x1204   : > { %994 = vst.msk [vmem:[%s2359_s11] sm:$0xff] %vm991_vm5, %v974_v40  ;;  %vm996_vm14 = vcmp.eq.s32.totalorder %v2325_v25, %v974_v40  ;;  %vm997_vm15 = vcmp.eq.s32.totalorder %v2329_v26, %v974_v40  ;;  %v987_v45 = vcvt.f32.s32 %v986_v41 }
0x1205   : > { %v1000_v42 = vsel %vm996_vm14, -inf, %v941_v62  ;;  %v1001_v43 = vsel %vm997_vm15, -inf, %v942_v63  ;;  %vm1109_vm15 = vcmask 97368  }
0x1206   : > { %v1004_v46 = vmax.f32 %v1000_v42, %v1001_v43  ;;  %v990_v47 = vadd.s32 %v989_v44, %v987_v45 }
0x1208   : > { %1005 = vmax.xlane.f32.xlu0 %v1004_v46  ;;  %995 = vst.msk [vmem:[%s2359_s11 + $0x8] sm:$0xff] %vm991_vm5, %v990_v47  ;;  %vm998_vm0 = vcmp.eq.s32.totalorder %v2325_v25, %v990_v47  ;;  %vm999_vm1 = vcmp.eq.s32.totalorder %v2329_v26, %v990_v47 }
0x1209   : > { %v1002_v48 = vsel %vm998_vm0, -inf, %v943_v4  ;;  %v1003_v49 = vsel %vm999_vm1, -inf, %v944_v5 }
0x120a   : > { %v1007_v50 = vmax.f32 %v1002_v48, %v1003_v49 }
0x120c   : > { %1008 = vmax.xlane.f32.xlu1 %v1007_v50 }
0x1291   : > { %v1006_v51 = vpop.xlane.xlu0 %1005 }
0x1292   : > { %vm1010_vm3 = vcmp.eq.f32.partialorder %v1000_v42, %v1006_v51  ;;  %vm1011_vm4 = vcmp.eq.f32.partialorder %v1001_v43, %v1006_v51  ;;  %1051 = vst.msk [vmem:[%s2339_s7] sm:$0xff] %vm1050_vm2, %v1006_v51 }
0x1293   : > { %v1014_v52 = vsel %vm1010_vm3, %v2325_v25, 256  ;;  %v1015_v53 = vsel %vm1011_vm4, %v2329_v26, 256 }
0x1294   : > { %vm1018_vm5 = vcmp.lt.s32.totalorder %v1014_v52, %v1015_v53 }
0x1295   : > { %v1019_v54 = vsel %vm1018_vm5, %v1014_v52, %v1015_v53  ;;  %v1009_v56 = vpop.xlane.xlu1 %1008 }
0x1296   : > { %v1021_v55 = vshra.s32 %v1019_v54, 16  ;;  %vm1012_vm6 = vcmp.eq.f32.partialorder %v1002_v48, %v1009_v56  ;;  %vm1013_vm7 = vcmp.eq.f32.partialorder %v1003_v49, %v1009_v56  ;;  %1052 = vst.msk [vmem:[%s2339_s7 + $0x8] sm:$0xff] %vm1050_vm2, %v1009_v56  ;;  %v1020_v63 = vand.u32 65535, %v1019_v54 }
0x1297   : > { %v1016_v58 = vsel %vm1012_vm6, %v2325_v25, 256  ;;  %v1017_v59 = vsel %vm1013_vm7, %v2329_v26, 256 }
0x1298   : > { %v1023_v57 = vcvt.s32.f32 %v1021_v55  ;;  %vm1034_vm8 = vcmp.lt.s32.totalorder %v1016_v58, %v1017_v59  ;;  %v1022_v1 = vcvt.s32.f32 %v1020_v63 }
0x1299   : > { %v1035_v60 = vsel %vm1034_vm8, %v1016_v58, %v1017_v59 }
0x129a   : > { %1024 = vmin.xlane.f32.xlu0 %v1023_v57  ;;  %v1037_v61 = vshra.s32 %v1035_v60, 16  ;;  %v1036_v3 = vand.u32 65535, %v1035_v60 }
0x129c   : > { %v1039_v62 = vcvt.s32.f32 %v1037_v61  ;;  %v1038_v5 = vcvt.s32.f32 %v1036_v3 }
0x129e   : > { %1040 = vmin.xlane.f32.xlu1 %v1039_v62 }
0x1323   : > { %v1025_v0 = vpop.xlane.xlu0 %1024 }
0x1324   : > { %vm1026_vm9 = vcmp.eq.f32.partialorder %v1023_v57, %v1025_v0  ;;  %v1031_v7 = vcvt.f32.s32 %v1025_v0 }
0x1325   : > { %v1027_v2 = vsel %vm1026_vm9, %v1022_v1, inf }
0x1326   : > { %1028 = vmin.xlane.f32.xlu0 %v1027_v2  ;;  %v1032_v9 = vshll.u32 %v1031_v7, 16 }
0x1327   : > { %v1041_v4 = vpop.xlane.xlu1 %1040 }
0x1328   : > { %vm1042_vm10 = vcmp.eq.f32.partialorder %v1039_v62, %v1041_v4  ;;  %v1047_v11 = vcvt.f32.s32 %v1041_v4 }
0x1329   : > { %v1043_v6 = vsel %vm1042_vm10, %v1038_v5, inf }
0x132a   : > { %1044 = vmin.xlane.f32.xlu1 %v1043_v6  ;;  %v1048_v16 = vshll.u32 %v1047_v11, 16 }
0x13af   : > { %v1029_v8 = vpop.xlane.xlu0 %1028 }
0x13b0   : > { %v1030_v10 = vcvt.f32.s32 %v1029_v8 }
0x13b2   : > { %v1033_v12 = vadd.s32 %v1032_v9, %v1030_v10 }
0x13b3   : > { %v1045_v13 = vpop.xlane.xlu1 %1044 }
0x13b4   : > { %1053 = vst.msk [vmem:[%s2359_s11] sm:$0xff] %vm1050_vm2, %v1033_v12  ;;  %vm1055_vm11 = vcmp.eq.s32.totalorder %v2325_v25, %v1033_v12  ;;  %vm1056_vm12 = vcmp.eq.s32.totalorder %v2329_v26, %v1033_v12  ;;  %v1046_v17 = vcvt.f32.s32 %v1045_v13 }
0x13b5   : > { %v1059_v14 = vsel %vm1055_vm11, -inf, %v1000_v42  ;;  %v1060_v15 = vsel %vm1056_vm12, -inf, %v1001_v43  ;;  %vm1168_vm12 = vcmask 105568  }
0x13b6   : > { %v1063_v20 = vmax.f32 %v1059_v14, %v1060_v15  ;;  %v1049_v23 = vadd.s32 %v1048_v16, %v1046_v17 }
0x13b8   : > { %1064 = vmax.xlane.f32.xlu0 %v1063_v20  ;;  %1054 = vst.msk [vmem:[%s2359_s11 + $0x8] sm:$0xff] %vm1050_vm2, %v1049_v23  ;;  %vm1057_vm13 = vcmp.eq.s32.totalorder %v2325_v25, %v1049_v23  ;;  %vm1058_vm14 = vcmp.eq.s32.totalorder %v2329_v26, %v1049_v23 }
0x13b9   : > { %v1061_v24 = vsel %vm1057_vm13, -inf, %v1002_v48  ;;  %v1062_v28 = vsel %vm1058_vm14, -inf, %v1003_v49 }
0x13ba   : > { %v1066_v29 = vmax.f32 %v1061_v24, %v1062_v28 }
0x13bc   : > { %1067 = vmax.xlane.f32.xlu1 %v1066_v29 }
0x1441   : > { %v1065_v31 = vpop.xlane.xlu0 %1064 }
0x1442   : > { %vm1069_vm0 = vcmp.eq.f32.partialorder %v1059_v14, %v1065_v31  ;;  %vm1070_vm1 = vcmp.eq.f32.partialorder %v1060_v15, %v1065_v31  ;;  %1110 = vst.msk [vmem:[%s2339_s7] sm:$0xff] %vm1109_vm15, %v1065_v31 }
0x1443   : > { %v1073_v32 = vsel %vm1069_vm0, %v2325_v25, 256  ;;  %v1074_v33 = vsel %vm1070_vm1, %v2329_v26, 256 }
0x1444   : > { %vm1077_vm2 = vcmp.lt.s32.totalorder %v1073_v32, %v1074_v33 }
0x1445   : > { %v1078_v34 = vsel %vm1077_vm2, %v1073_v32, %v1074_v33  ;;  %v1068_v36 = vpop.xlane.xlu1 %1067 }
0x1446   : > { %v1080_v35 = vshra.s32 %v1078_v34, 16  ;;  %vm1071_vm3 = vcmp.eq.f32.partialorder %v1061_v24, %v1068_v36  ;;  %vm1072_vm4 = vcmp.eq.f32.partialorder %v1062_v28, %v1068_v36  ;;  %1111 = vst.msk [vmem:[%s2339_s7 + $0x8] sm:$0xff] %vm1109_vm15, %v1068_v36  ;;  %v1079_v43 = vand.u32 65535, %v1078_v34 }
0x1447   : > { %v1075_v38 = vsel %vm1071_vm3, %v2325_v25, 256  ;;  %v1076_v39 = vsel %vm1072_vm4, %v2329_v26, 256 }
0x1448   : > { %v1082_v37 = vcvt.s32.f32 %v1080_v35  ;;  %vm1093_vm5 = vcmp.lt.s32.totalorder %v1075_v38, %v1076_v39  ;;  %v1081_v45 = vcvt.s32.f32 %v1079_v43 }
0x1449   : > { %v1094_v40 = vsel %vm1093_vm5, %v1075_v38, %v1076_v39 }
0x144a   : > { %1083 = vmin.xlane.f32.xlu0 %v1082_v37  ;;  %v1096_v41 = vshra.s32 %v1094_v40, 16  ;;  %v1095_v47 = vand.u32 65535, %v1094_v40 }
0x144c   : > { %v1098_v42 = vcvt.s32.f32 %v1096_v41  ;;  %v1097_v49 = vcvt.s32.f32 %v1095_v47 }
0x144e   : > { %1099 = vmin.xlane.f32.xlu1 %v1098_v42 }
0x14d3   : > { %v1084_v44 = vpop.xlane.xlu0 %1083 }
0x14d4   : > { %vm1085_vm6 = vcmp.eq.f32.partialorder %v1082_v37, %v1084_v44  ;;  %v1090_v51 = vcvt.f32.s32 %v1084_v44 }
0x14d5   : > { %v1086_v46 = vsel %vm1085_vm6, %v1081_v45, inf }
0x14d6   : > { %1087 = vmin.xlane.f32.xlu0 %v1086_v46  ;;  %v1091_v53 = vshll.u32 %v1090_v51, 16 }
0x14d7   : > { %v1100_v48 = vpop.xlane.xlu1 %1099 }
0x14d8   : > { %vm1101_vm7 = vcmp.eq.f32.partialorder %v1098_v42, %v1100_v48  ;;  %v1106_v55 = vcvt.f32.s32 %v1100_v48 }
0x14d9   : > { %v1102_v50 = vsel %vm1101_vm7, %v1097_v49, inf }
0x14da   : > { %1103 = vmin.xlane.f32.xlu1 %v1102_v50  ;;  %v1107_v60 = vshll.u32 %v1106_v55, 16 }
0x155f   : > { %v1088_v52 = vpop.xlane.xlu0 %1087 }
0x1560   : > { %v1089_v54 = vcvt.f32.s32 %v1088_v52 }
0x1562   : > { %v1092_v56 = vadd.s32 %v1091_v53, %v1089_v54 }
0x1563   : > { %v1104_v57 = vpop.xlane.xlu1 %1103 }
0x1564   : > { %1112 = vst.msk [vmem:[%s2359_s11] sm:$0xff] %vm1109_vm15, %v1092_v56  ;;  %vm1114_vm8 = vcmp.eq.s32.totalorder %v2325_v25, %v1092_v56  ;;  %vm1115_vm9 = vcmp.eq.s32.totalorder %v2329_v26, %v1092_v56  ;;  %v1105_v61 = vcvt.f32.s32 %v1104_v57 }
0x1565   : > { %v1118_v58 = vsel %vm1114_vm8, -inf, %v1059_v14  ;;  %v1119_v59 = vsel %vm1115_vm9, -inf, %v1060_v15  ;;  %vm1227_vm9 = vcmask 113768  }
0x1566   : > { %v1122_v62 = vmax.f32 %v1118_v58, %v1119_v59  ;;  %v1108_v63 = vadd.s32 %v1107_v60, %v1105_v61 }
0x1568   : > { %1123 = vmax.xlane.f32.xlu0 %v1122_v62  ;;  %1113 = vst.msk [vmem:[%s2359_s11 + $0x8] sm:$0xff] %vm1109_vm15, %v1108_v63  ;;  %vm1116_vm10 = vcmp.eq.s32.totalorder %v2325_v25, %v1108_v63  ;;  %vm1117_vm11 = vcmp.eq.s32.totalorder %v2329_v26, %v1108_v63 }
0x1569   : > { %v1120_v0 = vsel %vm1116_vm10, -inf, %v1061_v24  ;;  %v1121_v1 = vsel %vm1117_vm11, -inf, %v1062_v28 }
0x156a   : > { %v1125_v2 = vmax.f32 %v1120_v0, %v1121_v1 }
0x156c   : > { %1126 = vmax.xlane.f32.xlu1 %v1125_v2 }
0x15f1   : > { %v1124_v3 = vpop.xlane.xlu0 %1123 }
0x15f2   : > { %vm1128_vm13 = vcmp.eq.f32.partialorder %v1118_v58, %v1124_v3  ;;  %vm1129_vm14 = vcmp.eq.f32.partialorder %v1119_v59, %v1124_v3  ;;  %1169 = vst.msk [vmem:[%s2339_s7] sm:$0xff] %vm1168_vm12, %v1124_v3 }
0x15f3   : > { %v1132_v4 = vsel %vm1128_vm13, %v2325_v25, 256  ;;  %v1133_v5 = vsel %vm1129_vm14, %v2329_v26, 256 }
0x15f4   : > { %vm1136_vm15 = vcmp.lt.s32.totalorder %v1132_v4, %v1133_v5 }
0x15f5   : > { %v1137_v6 = vsel %vm1136_vm15, %v1132_v4, %v1133_v5  ;;  %v1127_v8 = vpop.xlane.xlu1 %1126 }
0x15f6   : > { %v1139_v7 = vshra.s32 %v1137_v6, 16  ;;  %vm1130_vm0 = vcmp.eq.f32.partialorder %v1120_v0, %v1127_v8  ;;  %vm1131_vm1 = vcmp.eq.f32.partialorder %v1121_v1, %v1127_v8  ;;  %1170 = vst.msk [vmem:[%s2339_s7 + $0x8] sm:$0xff] %vm1168_vm12, %v1127_v8  ;;  %v1138_v15 = vand.u32 65535, %v1137_v6 }
0x15f7   : > { %v1134_v10 = vsel %vm1130_vm0, %v2325_v25, 256  ;;  %v1135_v11 = vsel %vm1131_vm1, %v2329_v26, 256 }
0x15f8   : > { %v1141_v9 = vcvt.s32.f32 %v1139_v7  ;;  %vm1152_vm2 = vcmp.lt.s32.totalorder %v1134_v10, %v1135_v11  ;;  %v1140_v17 = vcvt.s32.f32 %v1138_v15 }
0x15f9   : > { %v1153_v12 = vsel %vm1152_vm2, %v1134_v10, %v1135_v11 }
0x15fa   : > { %1142 = vmin.xlane.f32.xlu0 %v1141_v9  ;;  %v1155_v13 = vshra.s32 %v1153_v12, 16  ;;  %v1154_v23 = vand.u32 65535, %v1153_v12 }
0x15fc   : > { %v1157_v14 = vcvt.s32.f32 %v1155_v13  ;;  %v1156_v28 = vcvt.s32.f32 %v1154_v23 }
0x15fe   : > { %1158 = vmin.xlane.f32.xlu1 %v1157_v14 }
0x1683   : > { %v1143_v16 = vpop.xlane.xlu0 %1142 }
0x1684   : > { %vm1144_vm3 = vcmp.eq.f32.partialorder %v1141_v9, %v1143_v16  ;;  %v1149_v31 = vcvt.f32.s32 %v1143_v16 }
0x1685   : > { %v1145_v20 = vsel %vm1144_vm3, %v1140_v17, inf }
0x1686   : > { %1146 = vmin.xlane.f32.xlu0 %v1145_v20  ;;  %v1150_v33 = vshll.u32 %v1149_v31, 16 }
0x1687   : > { %v1159_v24 = vpop.xlane.xlu1 %1158 }
0x1688   : > { %vm1160_vm4 = vcmp.eq.f32.partialorder %v1157_v14, %v1159_v24  ;;  %v1165_v35 = vcvt.f32.s32 %v1159_v24 }
0x1689   : > { %v1161_v29 = vsel %vm1160_vm4, %v1156_v28, inf }
0x168a   : > { %1162 = vmin.xlane.f32.xlu1 %v1161_v29  ;;  %v1166_v40 = vshll.u32 %v1165_v35, 16 }
0x170f   : > { %v1147_v32 = vpop.xlane.xlu0 %1146 }
0x1710   : > { %v1148_v34 = vcvt.f32.s32 %v1147_v32 }
0x1712   : > { %v1151_v36 = vadd.s32 %v1150_v33, %v1148_v34 }
0x1713   : > { %v1163_v37 = vpop.xlane.xlu1 %1162 }
0x1714   : > { %1171 = vst.msk [vmem:[%s2359_s11] sm:$0xff] %vm1168_vm12, %v1151_v36  ;;  %vm1173_vm5 = vcmp.eq.s32.totalorder %v2325_v25, %v1151_v36  ;;  %vm1174_vm6 = vcmp.eq.s32.totalorder %v2329_v26, %v1151_v36  ;;  %v1164_v41 = vcvt.f32.s32 %v1163_v37 }
0x1715   : > { %v1177_v38 = vsel %vm1173_vm5, -inf, %v1118_v58  ;;  %v1178_v39 = vsel %vm1174_vm6, -inf, %v1119_v59  ;;  %vm1286_vm6 = vcmask 121968  }
0x1716   : > { %v1181_v42 = vmax.f32 %v1177_v38, %v1178_v39  ;;  %v1167_v43 = vadd.s32 %v1166_v40, %v1164_v41 }
0x1718   : > { %1182 = vmax.xlane.f32.xlu0 %v1181_v42  ;;  %1172 = vst.msk [vmem:[%s2359_s11 + $0x8] sm:$0xff] %vm1168_vm12, %v1167_v43  ;;  %vm1175_vm7 = vcmp.eq.s32.totalorder %v2325_v25, %v1167_v43  ;;  %vm1176_vm8 = vcmp.eq.s32.totalorder %v2329_v26, %v1167_v43 }
0x1719   : > { %v1179_v44 = vsel %vm1175_vm7, -inf, %v1120_v0  ;;  %v1180_v45 = vsel %vm1176_vm8, -inf, %v1121_v1 }
0x171a   : > { %v1184_v46 = vmax.f32 %v1179_v44, %v1180_v45 }
0x171c   : > { %1185 = vmax.xlane.f32.xlu1 %v1184_v46 }
0x17a1   : > { %v1183_v47 = vpop.xlane.xlu0 %1182 }
0x17a2   : > { %vm1187_vm10 = vcmp.eq.f32.partialorder %v1177_v38, %v1183_v47  ;;  %vm1188_vm11 = vcmp.eq.f32.partialorder %v1178_v39, %v1183_v47  ;;  %1228 = vst.msk [vmem:[%s2339_s7] sm:$0xff] %vm1227_vm9, %v1183_v47 }
0x17a3   : > { %v1191_v48 = vsel %vm1187_vm10, %v2325_v25, 256  ;;  %v1192_v49 = vsel %vm1188_vm11, %v2329_v26, 256 }
0x17a4   : > { %vm1195_vm12 = vcmp.lt.s32.totalorder %v1191_v48, %v1192_v49 }
0x17a5   : > { %v1196_v50 = vsel %vm1195_vm12, %v1191_v48, %v1192_v49  ;;  %v1186_v52 = vpop.xlane.xlu1 %1185 }
0x17a6   : > { %v1198_v51 = vshra.s32 %v1196_v50, 16  ;;  %vm1189_vm13 = vcmp.eq.f32.partialorder %v1179_v44, %v1186_v52  ;;  %vm1190_vm14 = vcmp.eq.f32.partialorder %v1180_v45, %v1186_v52  ;;  %1229 = vst.msk [vmem:[%s2339_s7 + $0x8] sm:$0xff] %vm1227_vm9, %v1186_v52  ;;  %v1197_v59 = vand.u32 65535, %v1196_v50 }
0x17a7   : > { %v1193_v54 = vsel %vm1189_vm13, %v2325_v25, 256  ;;  %v1194_v55 = vsel %vm1190_vm14, %v2329_v26, 256 }
0x17a8   : > { %v1200_v53 = vcvt.s32.f32 %v1198_v51  ;;  %vm1211_vm15 = vcmp.lt.s32.totalorder %v1193_v54, %v1194_v55  ;;  %v1199_v61 = vcvt.s32.f32 %v1197_v59 }
0x17a9   : > { %v1212_v56 = vsel %vm1211_vm15, %v1193_v54, %v1194_v55 }
0x17aa   : > { %1201 = vmin.xlane.f32.xlu0 %v1200_v53  ;;  %v1214_v57 = vshra.s32 %v1212_v56, 16  ;;  %v1213_v63 = vand.u32 65535, %v1212_v56 }
0x17ac   : > { %v1216_v58 = vcvt.s32.f32 %v1214_v57  ;;  %v1215_v1 = vcvt.s32.f32 %v1213_v63 }
0x17ae   : > { %1217 = vmin.xlane.f32.xlu1 %v1216_v58 }
0x1833   : > { %v1202_v60 = vpop.xlane.xlu0 %1201 }
0x1834   : > { %vm1203_vm0 = vcmp.eq.f32.partialorder %v1200_v53, %v1202_v60  ;;  %v1208_v3 = vcvt.f32.s32 %v1202_v60 }
0x1835   : > { %v1204_v62 = vsel %vm1203_vm0, %v1199_v61, inf }
0x1836   : > { %1205 = vmin.xlane.f32.xlu0 %v1204_v62  ;;  %v1209_v5 = vshll.u32 %v1208_v3, 16 }
0x1837   : > { %v1218_v0 = vpop.xlane.xlu1 %1217 }
0x1838   : > { %vm1219_vm1 = vcmp.eq.f32.partialorder %v1216_v58, %v1218_v0  ;;  %v1224_v7 = vcvt.f32.s32 %v1218_v0 }
0x1839   : > { %v1220_v2 = vsel %vm1219_vm1, %v1215_v1, inf }
0x183a   : > { %1221 = vmin.xlane.f32.xlu1 %v1220_v2  ;;  %v1225_v12 = vshll.u32 %v1224_v7, 16 }
0x18bf   : > { %v1206_v4 = vpop.xlane.xlu0 %1205 }
0x18c0   : > { %v1207_v6 = vcvt.f32.s32 %v1206_v4 }
0x18c2   : > { %v1210_v8 = vadd.s32 %v1209_v5, %v1207_v6 }
0x18c3   : > { %v1222_v9 = vpop.xlane.xlu1 %1221 }
0x18c4   : > { %1230 = vst.msk [vmem:[%s2359_s11] sm:$0xff] %vm1227_vm9, %v1210_v8  ;;  %vm1232_vm2 = vcmp.eq.s32.totalorder %v2325_v25, %v1210_v8  ;;  %vm1233_vm3 = vcmp.eq.s32.totalorder %v2329_v26, %v1210_v8  ;;  %v1223_v13 = vcvt.f32.s32 %v1222_v9 }
0x18c5   : > { %v1236_v10 = vsel %vm1232_vm2, -inf, %v1177_v38  ;;  %v1237_v11 = vsel %vm1233_vm3, -inf, %v1178_v39  ;;  %vm1345_vm3 = vcmask 130168  }
0x18c6   : > { %v1240_v14 = vmax.f32 %v1236_v10, %v1237_v11  ;;  %v1226_v15 = vadd.s32 %v1225_v12, %v1223_v13 }
0x18c8   : > { %1241 = vmax.xlane.f32.xlu0 %v1240_v14  ;;  %1231 = vst.msk [vmem:[%s2359_s11 + $0x8] sm:$0xff] %vm1227_vm9, %v1226_v15  ;;  %vm1234_vm4 = vcmp.eq.s32.totalorder %v2325_v25, %v1226_v15  ;;  %vm1235_vm5 = vcmp.eq.s32.totalorder %v2329_v26, %v1226_v15 }
0x18c9   : > { %v1238_v16 = vsel %vm1234_vm4, -inf, %v1179_v44  ;;  %v1239_v17 = vsel %vm1235_vm5, -inf, %v1180_v45 }
0x18ca   : > { %v1243_v20 = vmax.f32 %v1238_v16, %v1239_v17 }
0x18cc   : > { %1244 = vmax.xlane.f32.xlu1 %v1243_v20 }
0x1951   : > { %v1242_v23 = vpop.xlane.xlu0 %1241 }
0x1952   : > { %vm1246_vm7 = vcmp.eq.f32.partialorder %v1236_v10, %v1242_v23  ;;  %vm1247_vm8 = vcmp.eq.f32.partialorder %v1237_v11, %v1242_v23  ;;  %1287 = vst.msk [vmem:[%s2339_s7] sm:$0xff] %vm1286_vm6, %v1242_v23 }
0x1953   : > { %v1250_v24 = vsel %vm1246_vm7, %v2325_v25, 256  ;;  %v1251_v28 = vsel %vm1247_vm8, %v2329_v26, 256 }
0x1954   : > { %vm1254_vm9 = vcmp.lt.s32.totalorder %v1250_v24, %v1251_v28 }
0x1955   : > { %v1255_v29 = vsel %vm1254_vm9, %v1250_v24, %v1251_v28  ;;  %v1245_v32 = vpop.xlane.xlu1 %1244 }
0x1956   : > { %v1257_v31 = vshra.s32 %v1255_v29, 16  ;;  %vm1248_vm10 = vcmp.eq.f32.partialorder %v1238_v16, %v1245_v32  ;;  %vm1249_vm11 = vcmp.eq.f32.partialorder %v1239_v17, %v1245_v32  ;;  %1288 = vst.msk [vmem:[%s2339_s7 + $0x8] sm:$0xff] %vm1286_vm6, %v1245_v32  ;;  %v1256_v39 = vand.u32 65535, %v1255_v29 }
0x1957   : > { %v1252_v34 = vsel %vm1248_vm10, %v2325_v25, 256  ;;  %v1253_v35 = vsel %vm1249_vm11, %v2329_v26, 256 }
0x1958   : > { %v1259_v33 = vcvt.s32.f32 %v1257_v31  ;;  %vm1270_vm12 = vcmp.lt.s32.totalorder %v1252_v34, %v1253_v35  ;;  %v1258_v41 = vcvt.s32.f32 %v1256_v39 }
0x1959   : > { %v1271_v36 = vsel %vm1270_vm12, %v1252_v34, %v1253_v35 }
0x195a   : > { %1260 = vmin.xlane.f32.xlu0 %v1259_v33  ;;  %v1273_v37 = vshra.s32 %v1271_v36, 16  ;;  %v1272_v43 = vand.u32 65535, %v1271_v36 }
0x195c   : > { %v1275_v38 = vcvt.s32.f32 %v1273_v37  ;;  %v1274_v45 = vcvt.s32.f32 %v1272_v43 }
0x195e   : > { %1276 = vmin.xlane.f32.xlu1 %v1275_v38 }
0x19e3   : > { %v1261_v40 = vpop.xlane.xlu0 %1260 }
0x19e4   : > { %vm1262_vm13 = vcmp.eq.f32.partialorder %v1259_v33, %v1261_v40  ;;  %v1267_v47 = vcvt.f32.s32 %v1261_v40 }
0x19e5   : > { %v1263_v42 = vsel %vm1262_vm13, %v1258_v41, inf }
0x19e6   : > { %1264 = vmin.xlane.f32.xlu0 %v1263_v42  ;;  %v1268_v49 = vshll.u32 %v1267_v47, 16 }
0x19e7   : > { %v1277_v44 = vpop.xlane.xlu1 %1276 }
0x19e8   : > { %vm1278_vm14 = vcmp.eq.f32.partialorder %v1275_v38, %v1277_v44  ;;  %v1283_v51 = vcvt.f32.s32 %v1277_v44 }
0x19e9   : > { %v1279_v46 = vsel %vm1278_vm14, %v1274_v45, inf }
0x19ea   : > { %1280 = vmin.xlane.f32.xlu1 %v1279_v46  ;;  %v1284_v56 = vshll.u32 %v1283_v51, 16 }
0x1a6f   : > { %v1265_v48 = vpop.xlane.xlu0 %1264 }
0x1a70   : > { %v1266_v50 = vcvt.f32.s32 %v1265_v48 }
0x1a72   : > { %v1269_v52 = vadd.s32 %v1268_v49, %v1266_v50 }
0x1a73   : > { %v1281_v53 = vpop.xlane.xlu1 %1280 }
0x1a74   : > { %1289 = vst.msk [vmem:[%s2359_s11] sm:$0xff] %vm1286_vm6, %v1269_v52  ;;  %vm1291_vm15 = vcmp.eq.s32.totalorder %v2325_v25, %v1269_v52  ;;  %vm1292_vm0 = vcmp.eq.s32.totalorder %v2329_v26, %v1269_v52  ;;  %v1282_v57 = vcvt.f32.s32 %v1281_v53 }
0x1a75   : > { %v1295_v54 = vsel %vm1291_vm15, -inf, %v1236_v10  ;;  %v1296_v55 = vsel %vm1292_vm0, -inf, %v1237_v11  ;;  %vm1404_vm0 = vcmask 138368  }
0x1a76   : > { %v1299_v58 = vmax.f32 %v1295_v54, %v1296_v55  ;;  %v1285_v59 = vadd.s32 %v1284_v56, %v1282_v57 }
0x1a78   : > { %1300 = vmax.xlane.f32.xlu0 %v1299_v58  ;;  %1290 = vst.msk [vmem:[%s2359_s11 + $0x8] sm:$0xff] %vm1286_vm6, %v1285_v59  ;;  %vm1293_vm1 = vcmp.eq.s32.totalorder %v2325_v25, %v1285_v59  ;;  %vm1294_vm2 = vcmp.eq.s32.totalorder %v2329_v26, %v1285_v59 }
0x1a79   : > { %v1297_v60 = vsel %vm1293_vm1, -inf, %v1238_v16  ;;  %v1298_v61 = vsel %vm1294_vm2, -inf, %v1239_v17 }
0x1a7a   : > { %v1302_v62 = vmax.f32 %v1297_v60, %v1298_v61 }
0x1a7c   : > { %1303 = vmax.xlane.f32.xlu1 %v1302_v62 }
0x1b01   : > { %v1301_v63 = vpop.xlane.xlu0 %1300 }
0x1b02   : > { %vm1305_vm4 = vcmp.eq.f32.partialorder %v1295_v54, %v1301_v63  ;;  %vm1306_vm5 = vcmp.eq.f32.partialorder %v1296_v55, %v1301_v63  ;;  %1346 = vst.msk [vmem:[%s2339_s7] sm:$0xff] %vm1345_vm3, %v1301_v63 }
0x1b03   : > { %v1309_v0 = vsel %vm1305_vm4, %v2325_v25, 256  ;;  %v1310_v1 = vsel %vm1306_vm5, %v2329_v26, 256 }
0x1b04   : > { %vm1313_vm6 = vcmp.lt.s32.totalorder %v1309_v0, %v1310_v1 }
0x1b05   : > { %v1314_v2 = vsel %vm1313_vm6, %v1309_v0, %v1310_v1  ;;  %v1304_v4 = vpop.xlane.xlu1 %1303 }
0x1b06   : > { %v1316_v3 = vshra.s32 %v1314_v2, 16  ;;  %vm1307_vm7 = vcmp.eq.f32.partialorder %v1297_v60, %v1304_v4  ;;  %vm1308_vm8 = vcmp.eq.f32.partialorder %v1298_v61, %v1304_v4  ;;  %1347 = vst.msk [vmem:[%s2339_s7 + $0x8] sm:$0xff] %vm1345_vm3, %v1304_v4  ;;  %v1315_v11 = vand.u32 65535, %v1314_v2 }
0x1b07   : > { %v1311_v6 = vsel %vm1307_vm7, %v2325_v25, 256  ;;  %v1312_v7 = vsel %vm1308_vm8, %v2329_v26, 256 }
0x1b08   : > { %v1318_v5 = vcvt.s32.f32 %v1316_v3  ;;  %vm1329_vm9 = vcmp.lt.s32.totalorder %v1311_v6, %v1312_v7  ;;  %v1317_v13 = vcvt.s32.f32 %v1315_v11 }
0x1b09   : > { %v1330_v8 = vsel %vm1329_vm9, %v1311_v6, %v1312_v7 }
0x1b0a   : > { %1319 = vmin.xlane.f32.xlu0 %v1318_v5  ;;  %v1332_v9 = vshra.s32 %v1330_v8, 16  ;;  %v1331_v15 = vand.u32 65535, %v1330_v8 }
0x1b0c   : > { %v1334_v10 = vcvt.s32.f32 %v1332_v9  ;;  %v1333_v17 = vcvt.s32.f32 %v1331_v15 }
0x1b0e   : > { %1335 = vmin.xlane.f32.xlu1 %v1334_v10 }
0x1b93   : > { %v1320_v12 = vpop.xlane.xlu0 %1319 }
0x1b94   : > { %vm1321_vm10 = vcmp.eq.f32.partialorder %v1318_v5, %v1320_v12  ;;  %v1326_v23 = vcvt.f32.s32 %v1320_v12 }
0x1b95   : > { %v1322_v14 = vsel %vm1321_vm10, %v1317_v13, inf }
0x1b96   : > { %1323 = vmin.xlane.f32.xlu0 %v1322_v14  ;;  %v1327_v28 = vshll.u32 %v1326_v23, 16 }
0x1b97   : > { %v1336_v16 = vpop.xlane.xlu1 %1335 }
0x1b98   : > { %vm1337_vm11 = vcmp.eq.f32.partialorder %v1334_v10, %v1336_v16  ;;  %v1342_v31 = vcvt.f32.s32 %v1336_v16 }
0x1b99   : > { %v1338_v20 = vsel %vm1337_vm11, %v1333_v17, inf }
0x1b9a   : > { %1339 = vmin.xlane.f32.xlu1 %v1338_v20  ;;  %v1343_v36 = vshll.u32 %v1342_v31, 16 }
0x1c1f   : > { %v1324_v24 = vpop.xlane.xlu0 %1323 }
0x1c20   : > { %v1325_v29 = vcvt.f32.s32 %v1324_v24 }
0x1c22   : > { %v1328_v32 = vadd.s32 %v1327_v28, %v1325_v29 }
0x1c23   : > { %v1340_v33 = vpop.xlane.xlu1 %1339 }
0x1c24   : > { %1348 = vst.msk [vmem:[%s2359_s11] sm:$0xff] %vm1345_vm3, %v1328_v32  ;;  %vm1350_vm12 = vcmp.eq.s32.totalorder %v2325_v25, %v1328_v32  ;;  %vm1351_vm13 = vcmp.eq.s32.totalorder %v2329_v26, %v1328_v32  ;;  %v1341_v37 = vcvt.f32.s32 %v1340_v33 }
0x1c25   : > { %v1354_v34 = vsel %vm1350_vm12, -inf, %v1295_v54  ;;  %v1355_v35 = vsel %vm1351_vm13, -inf, %v1296_v55  ;;  %vm1463_vm13 = vcmask 146568  }
0x1c26   : > { %v1358_v38 = vmax.f32 %v1354_v34, %v1355_v35  ;;  %v1344_v39 = vadd.s32 %v1343_v36, %v1341_v37 }
0x1c28   : > { %1359 = vmax.xlane.f32.xlu0 %v1358_v38  ;;  %1349 = vst.msk [vmem:[%s2359_s11 + $0x8] sm:$0xff] %vm1345_vm3, %v1344_v39  ;;  %vm1352_vm14 = vcmp.eq.s32.totalorder %v2325_v25, %v1344_v39  ;;  %vm1353_vm15 = vcmp.eq.s32.totalorder %v2329_v26, %v1344_v39 }
0x1c29   : > { %v1356_v40 = vsel %vm1352_vm14, -inf, %v1297_v60  ;;  %v1357_v41 = vsel %vm1353_vm15, -inf, %v1298_v61 }
0x1c2a   : > { %v1361_v42 = vmax.f32 %v1356_v40, %v1357_v41 }
0x1c2c   : > { %1362 = vmax.xlane.f32.xlu1 %v1361_v42 }
0x1cb1   : > { %v1360_v43 = vpop.xlane.xlu0 %1359 }
0x1cb2   : > { %vm1364_vm1 = vcmp.eq.f32.partialorder %v1354_v34, %v1360_v43  ;;  %vm1365_vm2 = vcmp.eq.f32.partialorder %v1355_v35, %v1360_v43  ;;  %1405 = vst.msk [vmem:[%s2339_s7] sm:$0xff] %vm1404_vm0, %v1360_v43 }
0x1cb3   : > { %v1368_v44 = vsel %vm1364_vm1, %v2325_v25, 256  ;;  %v1369_v45 = vsel %vm1365_vm2, %v2329_v26, 256 }
0x1cb4   : > { %vm1372_vm3 = vcmp.lt.s32.totalorder %v1368_v44, %v1369_v45 }
0x1cb5   : > { %v1373_v46 = vsel %vm1372_vm3, %v1368_v44, %v1369_v45  ;;  %v1363_v48 = vpop.xlane.xlu1 %1362 }
0x1cb6   : > { %v1375_v47 = vshra.s32 %v1373_v46, 16  ;;  %vm1366_vm4 = vcmp.eq.f32.partialorder %v1356_v40, %v1363_v48  ;;  %vm1367_vm5 = vcmp.eq.f32.partialorder %v1357_v41, %v1363_v48  ;;  %1406 = vst.msk [vmem:[%s2339_s7 + $0x8] sm:$0xff] %vm1404_vm0, %v1363_v48  ;;  %v1374_v55 = vand.u32 65535, %v1373_v46 }
0x1cb7   : > { %v1370_v50 = vsel %vm1366_vm4, %v2325_v25, 256  ;;  %v1371_v51 = vsel %vm1367_vm5, %v2329_v26, 256 }
0x1cb8   : > { %v1377_v49 = vcvt.s32.f32 %v1375_v47  ;;  %vm1388_vm6 = vcmp.lt.s32.totalorder %v1370_v50, %v1371_v51  ;;  %v1376_v57 = vcvt.s32.f32 %v1374_v55 }
0x1cb9   : > { %v1389_v52 = vsel %vm1388_vm6, %v1370_v50, %v1371_v51 }
0x1cba   : > { %1378 = vmin.xlane.f32.xlu0 %v1377_v49  ;;  %v1391_v53 = vshra.s32 %v1389_v52, 16  ;;  %v1390_v59 = vand.u32 65535, %v1389_v52 }
0x1cbc   : > { %v1393_v54 = vcvt.s32.f32 %v1391_v53  ;;  %v1392_v61 = vcvt.s32.f32 %v1390_v59 }
0x1cbe   : > { %1394 = vmin.xlane.f32.xlu1 %v1393_v54 }
0x1d43   : > { %v1379_v56 = vpop.xlane.xlu0 %1378 }
0x1d44   : > { %vm1380_vm7 = vcmp.eq.f32.partialorder %v1377_v49, %v1379_v56  ;;  %v1385_v63 = vcvt.f32.s32 %v1379_v56 }
0x1d45   : > { %v1381_v58 = vsel %vm1380_vm7, %v1376_v57, inf }
0x1d46   : > { %1382 = vmin.xlane.f32.xlu0 %v1381_v58  ;;  %v1386_v1 = vshll.u32 %v1385_v63, 16 }
0x1d47   : > { %v1395_v60 = vpop.xlane.xlu1 %1394 }
0x1d48   : > { %vm1396_vm8 = vcmp.eq.f32.partialorder %v1393_v54, %v1395_v60  ;;  %v1401_v3 = vcvt.f32.s32 %v1395_v60 }
0x1d49   : > { %v1397_v62 = vsel %vm1396_vm8, %v1392_v61, inf }
0x1d4a   : > { %1398 = vmin.xlane.f32.xlu1 %v1397_v62  ;;  %v1402_v8 = vshll.u32 %v1401_v3, 16 }
0x1dcf   : > { %v1383_v0 = vpop.xlane.xlu0 %1382 }
0x1dd0   : > { %v1384_v2 = vcvt.f32.s32 %v1383_v0 }
0x1dd2   : > { %v1387_v4 = vadd.s32 %v1386_v1, %v1384_v2 }
0x1dd3   : > { %v1399_v5 = vpop.xlane.xlu1 %1398 }
0x1dd4   : > { %1407 = vst.msk [vmem:[%s2359_s11] sm:$0xff] %vm1404_vm0, %v1387_v4  ;;  %vm1409_vm9 = vcmp.eq.s32.totalorder %v2325_v25, %v1387_v4  ;;  %vm1410_vm10 = vcmp.eq.s32.totalorder %v2329_v26, %v1387_v4  ;;  %v1400_v9 = vcvt.f32.s32 %v1399_v5 }
0x1dd5   : > { %v1413_v6 = vsel %vm1409_vm9, -inf, %v1354_v34  ;;  %v1414_v7 = vsel %vm1410_vm10, -inf, %v1355_v35  ;;  %vm1522_vm10 = vcmask 154768  }
0x1dd6   : > { %v1417_v10 = vmax.f32 %v1413_v6, %v1414_v7  ;;  %v1403_v11 = vadd.s32 %v1402_v8, %v1400_v9 }
0x1dd8   : > { %1418 = vmax.xlane.f32.xlu0 %v1417_v10  ;;  %1408 = vst.msk [vmem:[%s2359_s11 + $0x8] sm:$0xff] %vm1404_vm0, %v1403_v11  ;;  %vm1411_vm11 = vcmp.eq.s32.totalorder %v2325_v25, %v1403_v11  ;;  %vm1412_vm12 = vcmp.eq.s32.totalorder %v2329_v26, %v1403_v11 }
0x1dd9   : > { %v1415_v12 = vsel %vm1411_vm11, -inf, %v1356_v40  ;;  %v1416_v13 = vsel %vm1412_vm12, -inf, %v1357_v41 }
0x1dda   : > { %v1420_v14 = vmax.f32 %v1415_v12, %v1416_v13 }
0x1ddc   : > { %1421 = vmax.xlane.f32.xlu1 %v1420_v14 }
0x1e61   : > { %v1419_v15 = vpop.xlane.xlu0 %1418 }
0x1e62   : > { %vm1423_vm14 = vcmp.eq.f32.partialorder %v1413_v6, %v1419_v15  ;;  %vm1424_vm15 = vcmp.eq.f32.partialorder %v1414_v7, %v1419_v15  ;;  %1464 = vst.msk [vmem:[%s2339_s7] sm:$0xff] %vm1463_vm13, %v1419_v15 }
0x1e63   : > { %v1427_v16 = vsel %vm1423_vm14, %v2325_v25, 256  ;;  %v1428_v17 = vsel %vm1424_vm15, %v2329_v26, 256 }
0x1e64   : > { %vm1431_vm0 = vcmp.lt.s32.totalorder %v1427_v16, %v1428_v17 }
0x1e65   : > { %v1432_v20 = vsel %vm1431_vm0, %v1427_v16, %v1428_v17  ;;  %v1422_v24 = vpop.xlane.xlu1 %1421 }
0x1e66   : > { %v1434_v23 = vshra.s32 %v1432_v20, 16  ;;  %vm1425_vm1 = vcmp.eq.f32.partialorder %v1415_v12, %v1422_v24  ;;  %vm1426_vm2 = vcmp.eq.f32.partialorder %v1416_v13, %v1422_v24  ;;  %1465 = vst.msk [vmem:[%s2339_s7 + $0x8] sm:$0xff] %vm1463_vm13, %v1422_v24  ;;  %v1433_v35 = vand.u32 65535, %v1432_v20 }
0x1e67   : > { %v1429_v29 = vsel %vm1425_vm1, %v2325_v25, 256  ;;  %v1430_v31 = vsel %vm1426_vm2, %v2329_v26, 256 }
0x1e68   : > { %v1436_v28 = vcvt.s32.f32 %v1434_v23  ;;  %vm1447_vm3 = vcmp.lt.s32.totalorder %v1429_v29, %v1430_v31  ;;  %v1435_v37 = vcvt.s32.f32 %v1433_v35 }
0x1e69   : > { %v1448_v32 = vsel %vm1447_vm3, %v1429_v29, %v1430_v31 }
0x1e6a   : > { %1437 = vmin.xlane.f32.xlu0 %v1436_v28  ;;  %v1450_v33 = vshra.s32 %v1448_v32, 16  ;;  %v1449_v39 = vand.u32 65535, %v1448_v32 }
0x1e6c   : > { %v1452_v34 = vcvt.s32.f32 %v1450_v33  ;;  %v1451_v41 = vcvt.s32.f32 %v1449_v39  ;;  %v1586_v39 = vsub.f32 %v2313_v18, %v2331_v27 }
0x1e6e   : > { %1453 = vmin.xlane.f32.xlu1 %v1452_v34 }
0x1ef3   : > { %v1438_v36 = vpop.xlane.xlu0 %1437 }
0x1ef4   : > { %vm1439_vm4 = vcmp.eq.f32.partialorder %v1436_v28, %v1438_v36  ;;  %v1444_v43 = vcvt.f32.s32 %v1438_v36 }
0x1ef5   : > { %v1440_v38 = vsel %vm1439_vm4, %v1435_v37, inf }
0x1ef6   : > { %1441 = vmin.xlane.f32.xlu0 %v1440_v38  ;;  %v1445_v45 = vshll.u32 %v1444_v43, 16  ;;  %v1588_v43 = vsub.f32 %v2319_v21, %v2346_v30 }
0x1ef7   : > { %v1454_v40 = vpop.xlane.xlu1 %1453 }
0x1ef8   : > { %vm1455_vm5 = vcmp.eq.f32.partialorder %v1452_v34, %v1454_v40  ;;  %v1460_v47 = vcvt.f32.s32 %v1454_v40  ;;  %v1587_v40 = vsub.f32 %v2315_v19, %v2331_v27 }
0x1ef9   : > { %v1456_v42 = vsel %vm1455_vm5, %v1451_v41, inf  ;;  %v1590_v41 = vmul.f32 1.442695, %v1586_v39 }
0x1efa   : > { %1457 = vmin.xlane.f32.xlu1 %v1456_v42  ;;  %v1461_v52 = vshll.u32 %v1460_v47, 16  ;;  %v1592_v42 = vmul.f32 1.442695, %v1587_v40 }
0x1efb   : > { %1951 = vpow2.f32 %v1590_v41 }
0x1efc   : > { %1953 = vpow2.f32 %v1592_v42 }
0x1f7f   : > { %v1442_v44 = vpop.xlane.xlu0 %1441 }
0x1f80   : > { %v1443_v46 = vcvt.f32.s32 %v1442_v44  ;;  %v1589_v44 = vsub.f32 %v2321_v22, %v2346_v30 }
0x1f82   : > { %v1446_v48 = vadd.s32 %v1445_v45, %v1443_v46  ;;  %v1594_v45 = vmul.f32 1.442695, %v1588_v43  ;;  %v1596_v46 = vmul.f32 1.442695, %v1589_v44 }
0x1f83   : > { %v1458_v49 = vpop.xlane.xlu1 %1457 }
0x1f84   : > { %1466 = vst.msk [vmem:[%s2359_s11] sm:$0xff] %vm1463_vm13, %v1446_v48  ;;  %vm1468_vm6 = vcmp.eq.s32.totalorder %v2325_v25, %v1446_v48  ;;  %vm1469_vm7 = vcmp.eq.s32.totalorder %v2329_v26, %v1446_v48  ;;  %v1459_v53 = vcvt.f32.s32 %v1458_v49  ;;  %1955 = vpow2.f32 %v1594_v45  ;;  %v1952_v49 = vpop.eup %1951 }
0x1f85   : > { %v1472_v50 = vsel %vm1468_vm6, -inf, %v1413_v6  ;;  %v1473_v51 = vsel %vm1469_vm7, -inf, %v1414_v7  ;;  %vm1581_vm7 = vcmask 162968   ;;  %1957 = vpow2.f32 %v1596_v46 }
0x1f86   : > { %v1476_v54 = vmax.f32 %v1472_v50, %v1473_v51  ;;  %v1462_v55 = vadd.s32 %v1461_v52, %v1459_v53 }
0x1f88   : > { %1477 = vmax.xlane.f32.xlu0 %v1476_v54  ;;  %1467 = vst.msk [vmem:[%s2359_s11 + $0x8] sm:$0xff] %vm1463_vm13, %v1462_v55  ;;  %vm1470_vm8 = vcmp.eq.s32.totalorder %v2325_v25, %v1462_v55  ;;  %vm1471_vm9 = vcmp.eq.s32.totalorder %v2329_v26, %v1462_v55 }
0x1f89   : > { %v1474_v56 = vsel %vm1470_vm8, -inf, %v1415_v12  ;;  %v1475_v57 = vsel %vm1471_vm9, -inf, %v1416_v13 }
0x1f8a   : > { %v1479_v58 = vmax.f32 %v1474_v56, %v1475_v57 }
0x1f8c   : > { %1480 = vmax.xlane.f32.xlu1 %v1479_v58 }
0x2011   : > { %v1478_v59 = vpop.xlane.xlu0 %1477 }
0x2012   : > { %vm1482_vm11 = vcmp.eq.f32.partialorder %v1472_v50, %v1478_v59  ;;  %vm1483_vm12 = vcmp.eq.f32.partialorder %v1473_v51, %v1478_v59  ;;  %1523 = vst.msk [vmem:[%s2339_s7] sm:$0xff] %vm1522_vm10, %v1478_v59 }
0x2013   : > { %v1486_v60 = vsel %vm1482_vm11, %v2325_v25, 256  ;;  %v1487_v61 = vsel %vm1483_vm12, %v2329_v26, 256 }
0x2014   : > { %vm1490_vm13 = vcmp.lt.s32.totalorder %v1486_v60, %v1487_v61 }
0x2015   : > { %v1491_v62 = vsel %vm1490_vm13, %v1486_v60, %v1487_v61  ;;  %v1481_v0 = vpop.xlane.xlu1 %1480 }
0x2016   : > { %v1493_v63 = vshra.s32 %v1491_v62, 16  ;;  %vm1484_vm14 = vcmp.eq.f32.partialorder %v1474_v56, %v1481_v0  ;;  %vm1485_vm15 = vcmp.eq.f32.partialorder %v1475_v57, %v1481_v0  ;;  %1524 = vst.msk [vmem:[%s2339_s7 + $0x8] sm:$0xff] %vm1522_vm10, %v1481_v0  ;;  %v1492_v7 = vand.u32 65535, %v1491_v62 }
0x2017   : > { %v1488_v2 = vsel %vm1484_vm14, %v2325_v25, 256  ;;  %v1489_v3 = vsel %vm1485_vm15, %v2329_v26, 256 }
0x2018   : > { %v1495_v1 = vcvt.s32.f32 %v1493_v63  ;;  %vm1506_vm0 = vcmp.lt.s32.totalorder %v1488_v2, %v1489_v3  ;;  %v1494_v9 = vcvt.s32.f32 %v1492_v7 }
0x2019   : > { %v1507_v4 = vsel %vm1506_vm0, %v1488_v2, %v1489_v3  ;;  %vm1616_vm0 = vcmask 162816  }
0x201a   : > { %1496 = vmin.xlane.f32.xlu0 %v1495_v1  ;;  %v1509_v5 = vshra.s32 %v1507_v4, 16  ;;  %v1508_v11 = vand.u32 65535, %v1507_v4 }
0x201c   : > { %v1511_v6 = vcvt.s32.f32 %v1509_v5  ;;  %v1510_v13 = vcvt.s32.f32 %v1508_v11 }
0x201e   : > { %1512 = vmin.xlane.f32.xlu1 %v1511_v6 }
0x20a3   : > { %v1497_v8 = vpop.xlane.xlu0 %1496 }
0x20a4   : > { %vm1498_vm1 = vcmp.eq.f32.partialorder %v1495_v1, %v1497_v8  ;;  %v1503_v15 = vcvt.f32.s32 %v1497_v8 }
0x20a5   : > { %v1499_v10 = vsel %vm1498_vm1, %v1494_v9, inf }
0x20a6   : > { %1500 = vmin.xlane.f32.xlu0 %v1499_v10  ;;  %v1504_v17 = vshll.u32 %v1503_v15, 16 }
0x20a7   : > { %v1513_v12 = vpop.xlane.xlu1 %1512 }
0x20a8   : > { %vm1514_vm2 = vcmp.eq.f32.partialorder %v1511_v6, %v1513_v12  ;;  %v1519_v23 = vcvt.f32.s32 %v1513_v12 }
0x20a9   : > { %v1515_v14 = vsel %vm1514_vm2, %v1510_v13, inf }
0x20aa   : > { %1516 = vmin.xlane.f32.xlu1 %v1515_v14  ;;  %v1520_v32 = vshll.u32 %v1519_v23, 16 }
0x212f   : > { %v1501_v16 = vpop.xlane.xlu0 %1500 }
0x2130   : > { %v1502_v20 = vcvt.f32.s32 %v1501_v16 }
0x2132   : > { %v1505_v24 = vadd.s32 %v1504_v17, %v1502_v20 }
0x2133   : > { %v1517_v28 = vpop.xlane.xlu1 %1516 }
0x2134   : > { %1525 = vst.msk [vmem:[%s2359_s11] sm:$0xff] %vm1522_vm10, %v1505_v24  ;;  %vm1527_vm3 = vcmp.eq.s32.totalorder %v2325_v25, %v1505_v24  ;;  %vm1528_vm4 = vcmp.eq.s32.totalorder %v2329_v26, %v1505_v24  ;;  %v1518_v33 = vcvt.f32.s32 %v1517_v28 }
0x2135   : > { %v1531_v29 = vsel %vm1527_vm3, -inf, %v1472_v50  ;;  %v1532_v31 = vsel %vm1528_vm4, -inf, %v1473_v51  ;;  %v1954_v51 = vpop.eup %1953 }
0x2136   : > { %v1535_v34 = vmax.f32 %v1531_v29, %v1532_v31  ;;  %v1521_v35 = vadd.s32 %v1520_v32, %v1518_v33 }
0x2138   : > { %1536 = vmax.xlane.f32.xlu0 %v1535_v34  ;;  %1526 = vst.msk [vmem:[%s2359_s11 + $0x8] sm:$0xff] %vm1522_vm10, %v1521_v35  ;;  %vm1529_vm5 = vcmp.eq.s32.totalorder %v2325_v25, %v1521_v35  ;;  %vm1530_vm6 = vcmp.eq.s32.totalorder %v2329_v26, %v1521_v35 }
0x2139   : > { %v1533_v36 = vsel %vm1529_vm5, -inf, %v1474_v56  ;;  %v1534_v37 = vsel %vm1530_vm6, -inf, %v1475_v57  ;;  %v1598_v56 = vadd.f32 %v1954_v51, %v1952_v49  ;;  %v1956_v57 = vpop.eup %1955 }
0x213a   : > { %v1538_v38 = vmax.f32 %v1533_v36, %v1534_v37  ;;  %v1958_v59 = vpop.eup %1957 }
0x213b   : > { %v1601_v60 = vadd.f32 %v1958_v59, %v1956_v57 }
0x213c   : > { %1539 = vmax.xlane.f32.xlu1 %v1538_v38 }
0x21c1   : > { %v1537_v18 = vpop.xlane.xlu0 %1536 }
0x21c2   : > { %vm1541_vm8 = vcmp.eq.f32.partialorder %v1531_v29, %v1537_v18  ;;  %vm1542_vm9 = vcmp.eq.f32.partialorder %v1532_v31, %v1537_v18  ;;  %1582 = vst.msk [vmem:[%s2339_s7] sm:$0xff] %vm1581_vm7, %v1537_v18 }
0x21c3   : > { %v1545_v19 = vsel %vm1541_vm8, %v2325_v25, 256  ;;  %v1546_v21 = vsel %vm1542_vm9, %v2329_v26, 256 }
0x21c4   : > { %vm1549_vm10 = vcmp.lt.s32.totalorder %v1545_v19, %v1546_v21 }
0x21c5   : > { %v1550_v47 = vsel %vm1549_vm10, %v1545_v19, %v1546_v21  ;;  %v1540_v48 = vpop.xlane.xlu1 %1539 }
0x21c6   : > { %v1552_v22 = vshra.s32 %v1550_v47, 16  ;;  %vm1543_vm11 = vcmp.eq.f32.partialorder %v1533_v36, %v1540_v48  ;;  %vm1544_vm12 = vcmp.eq.f32.partialorder %v1534_v37, %v1540_v48  ;;  %1583 = vst.msk [vmem:[%s2339_s7 + $0x8] sm:$0xff] %vm1581_vm7, %v1540_v48  ;;  %v1551_v62 = vand.u32 65535, %v1550_v47 }
0x21c7   : > { %v1547_v52 = vsel %vm1543_vm11, %v2325_v25, 256  ;;  %v1548_v53 = vsel %vm1544_vm12, %v2329_v26, 256 }
0x21c8   : > { %v1554_v50 = vcvt.s32.f32 %v1552_v22  ;;  %vm1565_vm13 = vcmp.lt.s32.totalorder %v1547_v52, %v1548_v53  ;;  %v1553_v26 = vcvt.s32.f32 %v1551_v62 }
0x21c9   : > { %v1566_v54 = vsel %vm1565_vm13, %v1547_v52, %v1548_v53  ;;  %v1606_v61 = vld [vmem:[%s2339_s7] sm:$0xff] }
0x21ca   : > { %1555 = vmin.xlane.f32.xlu0 %v1554_v50  ;;  %v1568_v55 = vshra.s32 %v1566_v54, 16  ;;  %v1608_v63 = vsub.f32 %v1606_v61, %v2331_v27  ;;  %v1567_v3 = vand.u32 65535, %v1566_v54 }
0x21cc   : > { %v1570_v58 = vcvt.s32.f32 %v1568_v55  ;;  %v1610_v1 = vmul.f32 1.442695, %v1608_v63  ;;  %v1569_v7 = vcvt.s32.f32 %v1567_v3 }
0x21cd   : > { %v1607_v25 = vld [vmem:[%s2339_s7 + $0x8] sm:$0xff] }
0x21ce   : > { %1599 = vadd.xlane.f32.xlu0 %v1598_v56  ;;  %1571 = vmin.xlane.f32.xlu1 %v1570_v58  ;;  %v1609_v4 = vsub.f32 %v1607_v25, %v2346_v30  ;;  %1959 = vpow2.f32 %v1610_v1 }
0x21d0   : > { %v1612_v8 = vmul.f32 1.442695, %v1609_v4 }
0x21d2   : > { %1602 = vadd.xlane.f32.xlu1 %v1601_v60 }
0x21db   : > { %v1960_v30 = vpop.eup %1959 }
0x2253   : > { %v1556_v0 = vpop.xlane.xlu0 %1555 }
0x2254   : > { %vm1557_vm14 = vcmp.eq.f32.partialorder %v1554_v50, %v1556_v0 }
0x2255   : > { %v1558_v2 = vsel %vm1557_vm14, %v1553_v26, inf }
0x2256   : > { %1559 = vmin.xlane.f32.xlu0 %v1558_v2 }
0x2257   : > { %v1600_v5 = vpop.xlane.xlu0 %1599  ;;  %v1572_v6 = vpop.xlane.xlu1 %1571 }
0x2258   : > { %1961 = vrcp.f32 %v1600_v5  ;;  %vm1573_vm15 = vcmp.eq.f32.partialorder %v1570_v58, %v1572_v6 }
0x2259   : > { %v1574_v27 = vsel %vm1573_vm15, %v1569_v7, inf  ;;  %1963 = vpow2.f32 %v1612_v8 }
0x225a   : > { %1575 = vmin.xlane.f32.xlu1 %v1574_v27 }
0x225b   : > { %v1603_v9 = vpop.xlane.xlu1 %1602 }
0x225c   : > { %1965 = vrcp.f32 %v1603_v9 }
0x2265   : > { %v1962_v10 = vpop.eup %1961 }
0x2266   : > { %v1614_v11 = vmul.f32 %v1962_v10, %v1960_v30  ;;  %v1964_v12 = vpop.eup %1963 }
0x2268   : > { %1617 = vst.msk [vmem:[%s2339_s7] sm:$0xff] %vm1616_vm0, %v1614_v11 }
0x2269   : > { %v1966_v13 = vpop.eup %1965 }
0x226a   : > { %v1615_v14 = vmul.f32 %v1966_v13, %v1964_v12 }
0x226c   : > { %1618 = vst.msk [vmem:[%s2339_s7 + $0x8] sm:$0xff] %vm1616_vm0, %v1615_v14 }
0x226d   : > { %2036 = shalt.err (!%p2033_p7)
}
0x226e   : > { %s2037_s0 = scalar_lea.hbm %s2689_s8, 256  ;;  %s2041_s5 = scalar_lea.hbm %s2783_s2, 512 }
0x226f   : > { %p2038_p1 = scmp.ne.s32.totalorder %s2689_s8, %s2037_s0  ;;  %p2042_p3 = scmp.lt.s32.totalorder %s2689_s8, %s2783_s2 }
0x2270   : > { %p2043_p8 = scmp.lt.s32.totalorder %s2041_s5, %s2037_s0 }
0x2271   : > { %p2039_p10 = pnand %p2038_p1, %p2221_p9 }
0x2272   : > { %p2044_p0 = por %p2043_p8, %p2042_p3 }
0x2273   : > { %p2040_p13 = pneg %p2039_p10 }
0x2275   : > { %p2045_p2 = pnand %p2044_p0, %p2040_p13 }
0x2277   : > { %2048 = shalt.err (!%p2045_p2)
}
0x2278   : > { %s2147_s21 = smov 128   ;;  %s2148_s6 = smov 8   ;;  %v1562_v15 = vcvt.f32.s32 %v1556_v0  ;;  %v1578_v23 = vcvt.f32.s32 %v1572_v6 }
0x2279   : > { %1851 = dma.vmem_to_hbm [thread:$0]  (%p2221_p9), %s2691_s19, 256, %s2689_s8, %s1620_s10, %s2147_s21, %s2147_s21, %s2148_s6  }
0x227a   : > { %v1563_v17 = vshll.u32 %v1562_v15, 16  ;;  %s1658_s22 = sshll.u32 %s2359_s11, 4  ;;  %v1579_v29 = vshll.u32 %v1578_v23, 16  ;;  %s2728_s19 = scalar_lea.hbm %s2784_s3, %s1845_s18  ;;  %s2730_s22 = int_to_ptr.vmem [resolvable:$true] %s1658_s22 }
0x227b   : > { %s1625_s8 = scalar_lea.sflag [#allocation9], %s2278_s28  ;;  %s2049_s10 = scalar_lea.vmem %s2730_s22, 256 }
0x227c   : > { %p2050_p5 = scmp.ne.s32.totalorder %s2730_s22, %s2049_s10  ;;  %s2149_s30 = smov [#allocation8]  }
0x227d   : > { %s2053_s15 = sshll.u32 %s2149_s30, 4  ;;  %s2054_s15 = int_to_ptr.vmem [resolvable:$false] %s2053_s15 }
0x227e   : > { %p2051_p6 = pnand %p2050_p5, %p2221_p9  ;;  %s2055_s0 = scalar_lea.vmem %s2054_s15, 512 }
0x227f   : > { %p2056_p7 = scmp.lt.s32.totalorder %s2730_s22, %s2054_s15  ;;  %p2057_p1 = scmp.lt.s32.totalorder %s2055_s0, %s2049_s10 }
0x2280   : > { %p2052_p4 = pneg %p2051_p6 }
0x2281   : > { %p2058_p10 = por %p2057_p1, %p2056_p7 }
0x2283   : > { %p2059_p13 = pnand %p2058_p10, %p2052_p4 }
0x22df   : > { %v1560_v16 = vpop.xlane.xlu0 %1559 }
0x22e0   : > { %v1561_v20 = vcvt.f32.s32 %v1560_v16 }
0x22e2   : > { %v1564_v24 = vadd.s32 %v1563_v17, %v1561_v20 }
0x22e3   : > { %v1576_v28 = vpop.xlane.xlu1 %1575 }
0x22e4   : > { %1584 = vst.msk [vmem:[%s2359_s11] sm:$0xff] %vm1581_vm7, %v1564_v24  ;;  %v1577_v31 = vcvt.f32.s32 %v1576_v28 }
0x22e6   : > { %v1580_v32 = vadd.s32 %v1579_v29, %v1577_v31 }
0x22e8   : > { %1585 = vst.msk [vmem:[%s2359_s11 + $0x8] sm:$0xff] %vm1581_vm7, %v1580_v32 }
0x22e9   : > { %2062 = shalt.err (!%p2059_p13)
}
0x22ea   : > { %s2063_s11 = scalar_lea.hbm %s2728_s19, 256  ;;  %s2067_s9 = scalar_lea.hbm %s2784_s3, 512 }
0x22eb   : > { %p2064_p3 = scmp.ne.s32.totalorder %s2728_s19, %s2063_s11  ;;  %p2068_p2 = scmp.lt.s32.totalorder %s2728_s19, %s2784_s3 }
0x22ec   : > { %p2069_p5 = scmp.lt.s32.totalorder %s2067_s9, %s2063_s11 }
0x22ed   : > { %p2065_p8 = pnand %p2064_p3, %p2221_p9 }
0x22ee   : > { %p2070_p6 = por %p2069_p5, %p2068_p2 }
0x22ef   : > { %p2066_p0 = pneg %p2065_p8 }
0x22f1   : > { %p2071_p4 = pnand %p2070_p6, %p2066_p0 }
0x22f3   : > { %2074 = shalt.err (!%p2071_p4)
}
0x22f4   : > { %1852 = dma.vmem_to_hbm [thread:$0]  (%p2221_p9), %s2730_s22, 256, %s2728_s19, %s1625_s8, %s2147_s21, %s2147_s21, %s2148_s6  }
0x22f5 PF: > { %s1673_s24 = sand.u32 1, %s2117_s12   ;;  %p1863_p7 = pnand %p1806_p12, %p2228_p11 }
0x22f6   : > { %s1674_s7 = scalar_lea.sflag [#allocation4], %s1673_s24 }
0x22f7   : > { %p1864_p1 = pneg %p1863_p7 }
0x22f9   : > { %2108 = dma.done.wait (%p1864_p1), %s1674_s7, 256  }
0x22fa   : > { %2110 = vsyncadd (%p1864_p1), %s1674_s7, 4294967040  ;;  %s1683_s23 = scalar_lea.sflag [#allocation9], %s1673_s24 }
0x22fb   : > { %2112 = dma.done.wait (%p1864_p1), %s1683_s23, 256  }
0x22fc   : > { %2114 = vsyncadd (%p1864_p1), %s1683_s23, 4294967040  ;;  %s26_s17 = sadd.s32 1, %s2137_s17   ;;  %s2793_s12 = smov %s2121_s13 }
0x22fd   : > { %p23_p10 = scmp.ge.s32.totalorder %s26_s17, 4   ;;  %s2794_s13 = smov %s2125_s14 }
0x22fe   : > { %s2795_s14 = smov %s2226_s26  ;;  %s2796_s15 = smov %s2133_s16 }
0x22ff   : > { %s2797_s16 = smov %s2799_s20  ;;  %25 = sbr.rel (!%p23_p10) target bundleno = 12 (0xc), region = 103 }
0x2304   :  { %1688 = vsyncpa [#allocation3], 1 }
0x2305   :  { %1690 = vsyncpa [#allocation3 + $0x1], 1 }
0x2306   :  { %1691 = vsyncpa [#allocation6], 1 }
0x2307   :  { %1693 = vsyncpa [#allocation6 + $0x1], 1 }
0x2308   :  { %1694 = vsyncpa [#allocation4], 1 }
0x2309   :  { %1696 = vsyncpa [#allocation4 + $0x1], 1 }
0x230a   :  { %1697 = vsyncpa [#allocation9], 1 }
0x230b   :  { %1699 = vsyncpa [#allocation9 + $0x1], 1 }

</bundles_post_ra>
